<compile_context>
chip_gen: v6e
topology: v6e:2x2x1
jax: 0.10.0
libtpu: 0.0.40
codegen_flags: <defaults>
</compile_context>

<pallas_src>
import jax
import jax.numpy as jnp
from jax.experimental import pallas as pl
from jax.experimental.pallas import tpu as pltpu

NUM_LAYERS = 64   # num_embeddings and output logits size
EMBED_DIM = 32
HIDDEN_DIM = 64
HP = 128          # hidden dim padded to a full 128-lane panel per gate
LP = 128          # logits padded to lane-dense 128 (sliced back to 64 outside)

_BUCKETS = (8, 16, 32, 64, 128)


def _pick_bucket(n):
    for b in _BUCKETS:
        if n <= b:
            return b
    return -(-n // 128) * 128


def gru_policy_kernel(n_ref, idx_ref, gi_hbm, whh_ref, bhh_ref,
                      wfc_hbm, bfc_hbm, out_ref,
                      gi_buf, wfc_buf, bfc_buf, gi_sem, fc_sem):
    """GRU recurrence + final Linear, single gridless invocation.

    n_ref   : [1]            int32 true sequence length (SMEM)
    idx_ref : [T]            int32 GI-table row indices, padded to bucket T
                             (SMEM); row NUM_LAYERS is the zero-embedding row.
    gi_hbm  : [L+1, 3*HP]    precomputed input gates  emb @ W_ih^T + b_ih
                             (gate panels r|z|n, each padded to HP lanes), HBM
    whh_ref : [HP, 3*HP]     W_hh^T, rows/cols zero-padded to HP (VMEM)
    bhh_ref : [1, 3*HP]      (VMEM)
    wfc_hbm : [HP, LP]       W_fc^T, zero-padded (HBM, copied in async)
    bfc_hbm : [1, LP]        (HBM, copied in async)
    out_ref : [1, LP]        padded logits (first NUM_LAYERS lanes valid)
    """
    T = idx_ref.shape[0]

    # FC weights are only needed after the recurrence: start the copy now,
    # wait right before the final dot.
    wfc_cp = pltpu.make_async_copy(wfc_hbm, wfc_buf, fc_sem.at[0])
    bfc_cp = pltpu.make_async_copy(bfc_hbm, bfc_buf, fc_sem.at[1])
    wfc_cp.start()
    bfc_cp.start()

    # Gather only the T needed GI rows (1.5 KB each) from HBM; all DMAs are
    # issued up front and waited per-row just before their step.
    gi_copies = []
    for t in range(T):
        cp = pltpu.make_async_copy(gi_hbm.at[pl.ds(idx_ref[t], 1), :],
                                   gi_buf.at[pl.ds(t, 1), :],
                                   gi_sem.at[t])
        cp.start()
        gi_copies.append(cp)

    n = n_ref[0]  # scalar read before any DMA wait (sst->sld forwarding)
    bhh = bhh_ref[...]
    h = jnp.zeros((1, HP), dtype=jnp.float32)

    # Static unroll: T is trace-static (bucketed), gives the LLO scheduler
    # full visibility of the serial chain.
    for t in range(T):
        gi_copies[t].wait()
        gi = gi_buf[pl.ds(t, 1), :]                                       # (1, 3*HP)
        # W_hh^T read at the use site (no 48-vreg live hoist across the loop).
        gh = jnp.dot(h, whh_ref[...], preferred_element_type=jnp.float32) + bhh
        # Fused r/z sigmoid: one EUP push over two lane-aligned gate panels.
        rz = jax.nn.sigmoid(gi[:, 0:2 * HP] + gh[:, 0:2 * HP])
        r = rz[:, 0:HP]
        z = rz[:, HP:2 * HP]
        ng = jnp.tanh(gi[:, 2 * HP:3 * HP] + r * gh[:, 2 * HP:3 * HP])
        h_new = (1.0 - z) * ng + z * h
        # Mask padded steps (t >= n): arithmetic select keeps h unchanged.
        m = (t < n).astype(jnp.float32)
        h = m * h_new + (1.0 - m) * h
        # Padded-lane note: W_hh^T / W_fc^T padded *rows* are exactly zero, so
        # padded h lanes can never contribute to valid outputs.

    wfc_cp.wait()
    bfc_cp.wait()
    out_ref[...] = (jnp.dot(h, wfc_buf[...],
                            preferred_element_type=jnp.float32) + bfc_buf[...])


def init_params(key):
    """Deterministic parameter init mimicking PyTorch defaults."""
    ks = jax.random.split(key, 8)
    k_gru = 1.0 / jnp.sqrt(HIDDEN_DIM)
    k_fc = 1.0 / jnp.sqrt(HIDDEN_DIM)
    params = {
        # nn.Embedding: N(0, 1)
        "emb_table": jax.random.normal(ks[0], (NUM_LAYERS, EMBED_DIM), jnp.float32),
        # nn.GRU (single layer): U(-1/sqrt(H), 1/sqrt(H)); gate order r, z, n
        "w_ih": jax.random.uniform(ks[1], (3 * HIDDEN_DIM, EMBED_DIM),
                                   jnp.float32, -k_gru, k_gru),
        "w_hh": jax.random.uniform(ks[2], (3 * HIDDEN_DIM, HIDDEN_DIM),
                                   jnp.float32, -k_gru, k_gru),
        "b_ih": jax.random.uniform(ks[3], (3 * HIDDEN_DIM,),
                                   jnp.float32, -k_gru, k_gru),
        "b_hh": jax.random.uniform(ks[4], (3 * HIDDEN_DIM,),
                                   jnp.float32, -k_gru, k_gru),
        # nn.Linear(H, num_layers): U(-1/sqrt(H), 1/sqrt(H))
        "w_fc": jax.random.uniform(ks[5], (NUM_LAYERS, HIDDEN_DIM),
                                   jnp.float32, -k_fc, k_fc),
        "b_fc": jax.random.uniform(ks[6], (NUM_LAYERS,),
                                   jnp.float32, -k_fc, k_fc),
    }
    return params


def prepare_params(params):
    """One-time prep: transpose, pad gates to 128-lane panels, and fold the
    embedding lookup + input projection into a per-token gate table."""
    H = HIDDEN_DIM

    def pad_gate_cols(w_t):
        # w_t: [K, 3H] -> [K, 3*HP], each gate panel lane-aligned to HP.
        K = w_t.shape[0]
        out = jnp.zeros((K, 3 * HP), jnp.float32)
        for g in range(3):
            out = out.at[:, g * HP:g * HP + H].set(w_t[:, g * H:(g + 1) * H])
        return out

    def pad_gate_bias(b):
        out = jnp.zeros((1, 3 * HP), jnp.float32)
        for g in range(3):
            out = out.at[0, g * HP:g * HP + H].set(b[g * H:(g + 1) * H])
        return out

    wih_t = pad_gate_cols(params["w_ih"].T)                          # [E, 3*HP]
    bih = pad_gate_bias(params["b_ih"])                              # [1, 3*HP]

    whh_t = jnp.zeros((HP, 3 * HP), jnp.float32)
    whh_t = whh_t.at[:H, :].set(pad_gate_cols(params["w_hh"].T))     # [HP, 3*HP]
    bhh = pad_gate_bias(params["b_hh"])                              # [1, 3*HP]

    # GI[i] = emb_table[i] @ W_ih^T + b_ih ; extra row NUM_LAYERS is the
    # zero-embedding (empty-sequence dummy input) row, i.e. just b_ih.
    # Stored 2-D [L+1, 3*HP] so 8 rows pack per (8,128) tile (no 8x sublane
    # padding); kept in HBM and row-gathered in-kernel.
    gi = jnp.dot(params["emb_table"], wih_t,
                 preferred_element_type=jnp.float32,
                 precision=jax.lax.Precision.HIGHEST) + bih           # [L, 3*HP]
    gi_table = jnp.concatenate([gi, bih], axis=0)                     # [L+1, 3*HP]

    wfc_t = jnp.zeros((HP, LP), jnp.float32)
    wfc_t = wfc_t.at[:H, :NUM_LAYERS].set(params["w_fc"].T)           # [HP, LP]
    bfc = jnp.zeros((1, LP), jnp.float32)
    bfc = bfc.at[0, :NUM_LAYERS].set(params["b_fc"])                  # [1, LP]

    return {"gi_table": gi_table, "whh_t": whh_t, "bhh": bhh,
            "wfc_t": wfc_t, "bfc": bfc}


@jax.jit
def _gru_policy_logits(idx, n, prepped):
    T = idx.shape[0]
    smem = pl.BlockSpec(memory_space=pltpu.MemorySpace.SMEM)
    vmem = pl.BlockSpec(memory_space=pltpu.MemorySpace.VMEM)
    hbm = pl.BlockSpec(memory_space=pl.ANY)
    out = pl.pallas_call(
        gru_policy_kernel,
        out_shape=jax.ShapeDtypeStruct((1, LP), jnp.float32),
        in_specs=[smem, smem, hbm, vmem, vmem, hbm, hbm],
        out_specs=vmem,
        scratch_shapes=[
            pltpu.VMEM((T, 3 * HP), jnp.float32),   # gathered GI rows
            pltpu.VMEM((HP, LP), jnp.float32),      # fc weight staging
            pltpu.VMEM((1, LP), jnp.float32),       # fc bias staging
            pltpu.SemaphoreType.DMA((T,)),          # per-row GI gather sems
            pltpu.SemaphoreType.DMA((2,)),          # fc weight/bias sems
        ],
    )(n, idx, prepped["gi_table"], prepped["whh_t"], prepped["bhh"],
      prepped["wfc_t"], prepped["bfc"])
    return out[:, :NUM_LAYERS]


def gru_policy_forward(layer_seq, prepped):
    """Equivalent of GRUPolicy.forward(layer_seq) -> logits [1, num_layers]."""
    if len(layer_seq) == 0:
        # dummy zero timestep -> GI row NUM_LAYERS (= b_ih only)
        vals = [NUM_LAYERS]
    else:
        # Validate indices host-side: in-kernel DMA gathers are not bounds-checked.
        vals = [min(max(int(v), 0), NUM_LAYERS - 1) for v in layer_seq]
    n = len(vals)
    t_pad = _pick_bucket(n)                      # fixed buckets -> no retrace per length
    vals = vals + [0] * (t_pad - n)              # padded steps are masked in-kernel
    idx = jnp.asarray(vals, dtype=jnp.int32)
    n_arr = jnp.asarray([n], dtype=jnp.int32)
    return _gru_policy_logits(idx, n_arr, prepped)


def gru_policy_reference(layer_seq, params):
    """Pure-JAX reference for verification (unpadded, standard formulation)."""
    if len(layer_seq) == 0:
        emb = jnp.zeros((1, EMBED_DIM), dtype=jnp.float32)
    else:
        emb = params["emb_table"][jnp.asarray(layer_seq, jnp.int32)]
    H = HIDDEN_DIM
    h = jnp.zeros((1, H), jnp.float32)
    for t in range(emb.shape[0]):
        x_t = emb[t:t + 1]
        gi = x_t @ params["w_ih"].T + params["b_ih"]
        gh = h @ params["w_hh"].T + params["b_hh"]
        r = jax.nn.sigmoid(gi[:, 0:H] + gh[:, 0:H])
        z = jax.nn.sigmoid(gi[:, H:2 * H] + gh[:, H:2 * H])
        ng = jnp.tanh(gi[:, 2 * H:3 * H] + r * gh[:, 2 * H:3 * H])
        h = (1.0 - z) * ng + z * h
    return h @ params["w_fc"].T + params["b_fc"]


if __name__ == "__main__":
    key = jax.random.PRNGKey(0)
    params = init_params(key)
    prepped = prepare_params(params)

    # A small layer-index sequence of length T=8 (values in [0, num_layers)).
    seq_key = jax.random.fold_in(key, 123)
    layer_seq = [int(v) for v in
                 jax.random.randint(seq_key, (8,), 0, NUM_LAYERS)]

    logits = jax.block_until_ready(gru_policy_forward(layer_seq, prepped))
    ref = gru_policy_reference(layer_seq, params)
    assert logits.shape == (1, NUM_LAYERS)
    assert jnp.allclose(logits, ref, rtol=1e-3, atol=1e-3)

    # Length-5 sequence (same bucket of 8): exercises the masked padded steps
    # without retracing/recompiling the kernel.
    short_seq = layer_seq[:5]
    logits_s = jax.block_until_ready(gru_policy_forward(short_seq, prepped))
    ref_s = gru_policy_reference(short_seq, params)
    assert logits_s.shape == (1, NUM_LAYERS)
    assert jnp.allclose(logits_s, ref_s, rtol=1e-3, atol=1e-3)

    # Empty-sequence branch (dummy zero-embedding timestep).
    logits_e = jax.block_until_ready(gru_policy_forward([], prepped))
    ref_e = gru_policy_reference([], params)
    assert logits_e.shape == (1, NUM_LAYERS)
    assert jnp.allclose(logits_e, ref_e, rtol=1e-3, atol=1e-3)

    print("KERNEL_OK")
</pallas_src>

<mosaic_0001>
module attributes {stable_mosaic.version = 11 : i64} {
  func.func @gru_policy_kernel(%arg0: memref<1xi32, #tpu.memory_space<smem>>, %arg1: memref<8xi32, #tpu.memory_space<smem>>, %arg2: memref<65x384xf32, #tpu.memory_space<any>>, %arg3: memref<128x384xf32, #tpu.memory_space<vmem>>, %arg4: memref<1x384xf32, #tpu.memory_space<vmem>>, %arg5: memref<128x128xf32, #tpu.memory_space<any>>, %arg6: memref<1x128xf32, #tpu.memory_space<any>>, %arg7: memref<1x128xf32, #tpu.memory_space<vmem>>, %arg8: memref<8x384xf32, #tpu.memory_space<vmem>>, %arg9: memref<128x128xf32, #tpu.memory_space<vmem>>, %arg10: memref<1x128xf32, #tpu.memory_space<vmem>>, %arg11: memref<8x!tpu.dma_semaphore, #tpu.memory_space<semaphore_mem>>, %arg12: memref<2x!tpu.dma_semaphore, #tpu.memory_space<semaphore_mem>>) attributes {dimension_semantics = [], scalar_prefetch = 0 : i64, scratch_operands = 5 : i64, tpu.core_type = #tpu.core_type<tc>} {
    %c0_i32 = arith.constant 0 : i32
    %0 = tpu.memref_slice %arg12[%c0_i32] : memref<2x!tpu.dma_semaphore, #tpu.memory_space<semaphore_mem>> -> memref<1x!tpu.dma_semaphore, #tpu.memory_space<semaphore_mem>>
    %1 = tpu.memref_squeeze %0 : memref<1x!tpu.dma_semaphore, #tpu.memory_space<semaphore_mem>> -> memref<!tpu.dma_semaphore, #tpu.memory_space<semaphore_mem>>
    tpu.enqueue_dma source(%arg5 : memref<128x128xf32, #tpu.memory_space<any>>) target(%arg9 : memref<128x128xf32, #tpu.memory_space<vmem>>) target_semaphore(%1 : memref<!tpu.dma_semaphore, #tpu.memory_space<semaphore_mem>>)
    %c1_i32 = arith.constant 1 : i32
    %2 = tpu.memref_slice %arg12[%c1_i32] : memref<2x!tpu.dma_semaphore, #tpu.memory_space<semaphore_mem>> -> memref<1x!tpu.dma_semaphore, #tpu.memory_space<semaphore_mem>>
    %3 = tpu.memref_squeeze %2 : memref<1x!tpu.dma_semaphore, #tpu.memory_space<semaphore_mem>> -> memref<!tpu.dma_semaphore, #tpu.memory_space<semaphore_mem>>
    tpu.enqueue_dma source(%arg6 : memref<1x128xf32, #tpu.memory_space<any>>) target(%arg10 : memref<1x128xf32, #tpu.memory_space<vmem>>) target_semaphore(%3 : memref<!tpu.dma_semaphore, #tpu.memory_space<semaphore_mem>>)
    %c0 = arith.constant 0 : index
    %4 = memref.load %arg1[%c0] : memref<8xi32, #tpu.memory_space<smem>>
    %c0_i32_0 = arith.constant 0 : i32
    %c0_i32_1 = arith.constant 0 : i32
    %5 = tpu.memref_slice %arg2[%4, %c0_i32_1] : memref<65x384xf32, #tpu.memory_space<any>> -> memref<1x384xf32, #tpu.memory_space<any>>
    %c0_i32_2 = arith.constant 0 : i32
    %c0_i32_3 = arith.constant 0 : i32
    %6 = tpu.memref_slice %arg8[%c0_i32_2, %c0_i32_3] : memref<8x384xf32, #tpu.memory_space<vmem>> -> memref<1x384xf32, #tpu.memory_space<vmem>>
    %7 = tpu.memref_slice %arg11[%c0_i32_0] : memref<8x!tpu.dma_semaphore, #tpu.memory_space<semaphore_mem>> -> memref<1x!tpu.dma_semaphore, #tpu.memory_space<semaphore_mem>>
    %8 = tpu.memref_squeeze %7 : memref<1x!tpu.dma_semaphore, #tpu.memory_space<semaphore_mem>> -> memref<!tpu.dma_semaphore, #tpu.memory_space<semaphore_mem>>
    tpu.enqueue_dma source(%5 : memref<1x384xf32, #tpu.memory_space<any>>) target(%6 : memref<1x384xf32, #tpu.memory_space<vmem>>) target_semaphore(%8 : memref<!tpu.dma_semaphore, #tpu.memory_space<semaphore_mem>>)
    %c1 = arith.constant 1 : index
    %9 = memref.load %arg1[%c1] : memref<8xi32, #tpu.memory_space<smem>>
    %c1_i32_4 = arith.constant 1 : i32
    %c0_i32_5 = arith.constant 0 : i32
    %10 = tpu.memref_slice %arg2[%9, %c0_i32_5] : memref<65x384xf32, #tpu.memory_space<any>> -> memref<1x384xf32, #tpu.memory_space<any>>
    %c1_i32_6 = arith.constant 1 : i32
    %c0_i32_7 = arith.constant 0 : i32
    %11 = tpu.memref_slice %arg8[%c1_i32_6, %c0_i32_7] : memref<8x384xf32, #tpu.memory_space<vmem>> -> memref<1x384xf32, #tpu.memory_space<vmem>>
    %12 = tpu.memref_slice %arg11[%c1_i32_4] : memref<8x!tpu.dma_semaphore, #tpu.memory_space<semaphore_mem>> -> memref<1x!tpu.dma_semaphore, #tpu.memory_space<semaphore_mem>>
    %13 = tpu.memref_squeeze %12 : memref<1x!tpu.dma_semaphore, #tpu.memory_space<semaphore_mem>> -> memref<!tpu.dma_semaphore, #tpu.memory_space<semaphore_mem>>
    tpu.enqueue_dma source(%10 : memref<1x384xf32, #tpu.memory_space<any>>) target(%11 : memref<1x384xf32, #tpu.memory_space<vmem>>) target_semaphore(%13 : memref<!tpu.dma_semaphore, #tpu.memory_space<semaphore_mem>>)
    %c2 = arith.constant 2 : index
    %14 = memref.load %arg1[%c2] : memref<8xi32, #tpu.memory_space<smem>>
    %c2_i32 = arith.constant 2 : i32
    %c0_i32_8 = arith.constant 0 : i32
    %15 = tpu.memref_slice %arg2[%14, %c0_i32_8] : memref<65x384xf32, #tpu.memory_space<any>> -> memref<1x384xf32, #tpu.memory_space<any>>
    %c2_i32_9 = arith.constant 2 : i32
    %c0_i32_10 = arith.constant 0 : i32
    %16 = tpu.memref_slice %arg8[%c2_i32_9, %c0_i32_10] : memref<8x384xf32, #tpu.memory_space<vmem>> -> memref<1x384xf32, #tpu.memory_space<vmem>>
    %17 = tpu.memref_slice %arg11[%c2_i32] : memref<8x!tpu.dma_semaphore, #tpu.memory_space<semaphore_mem>> -> memref<1x!tpu.dma_semaphore, #tpu.memory_space<semaphore_mem>>
    %18 = tpu.memref_squeeze %17 : memref<1x!tpu.dma_semaphore, #tpu.memory_space<semaphore_mem>> -> memref<!tpu.dma_semaphore, #tpu.memory_space<semaphore_mem>>
    tpu.enqueue_dma source(%15 : memref<1x384xf32, #tpu.memory_space<any>>) target(%16 : memref<1x384xf32, #tpu.memory_space<vmem>>) target_semaphore(%18 : memref<!tpu.dma_semaphore, #tpu.memory_space<semaphore_mem>>)
    %c3 = arith.constant 3 : index
    %19 = memref.load %arg1[%c3] : memref<8xi32, #tpu.memory_space<smem>>
    %c3_i32 = arith.constant 3 : i32
    %c0_i32_11 = arith.constant 0 : i32
    %20 = tpu.memref_slice %arg2[%19, %c0_i32_11] : memref<65x384xf32, #tpu.memory_space<any>> -> memref<1x384xf32, #tpu.memory_space<any>>
    %c3_i32_12 = arith.constant 3 : i32
    %c0_i32_13 = arith.constant 0 : i32
    %21 = tpu.memref_slice %arg8[%c3_i32_12, %c0_i32_13] : memref<8x384xf32, #tpu.memory_space<vmem>> -> memref<1x384xf32, #tpu.memory_space<vmem>>
    %22 = tpu.memref_slice %arg11[%c3_i32] : memref<8x!tpu.dma_semaphore, #tpu.memory_space<semaphore_mem>> -> memref<1x!tpu.dma_semaphore, #tpu.memory_space<semaphore_mem>>
    %23 = tpu.memref_squeeze %22 : memref<1x!tpu.dma_semaphore, #tpu.memory_space<semaphore_mem>> -> memref<!tpu.dma_semaphore, #tpu.memory_space<semaphore_mem>>
    tpu.enqueue_dma source(%20 : memref<1x384xf32, #tpu.memory_space<any>>) target(%21 : memref<1x384xf32, #tpu.memory_space<vmem>>) target_semaphore(%23 : memref<!tpu.dma_semaphore, #tpu.memory_space<semaphore_mem>>)
    %c4 = arith.constant 4 : index
    %24 = memref.load %arg1[%c4] : memref<8xi32, #tpu.memory_space<smem>>
    %c4_i32 = arith.constant 4 : i32
    %c0_i32_14 = arith.constant 0 : i32
    %25 = tpu.memref_slice %arg2[%24, %c0_i32_14] : memref<65x384xf32, #tpu.memory_space<any>> -> memref<1x384xf32, #tpu.memory_space<any>>
    %c4_i32_15 = arith.constant 4 : i32
    %c0_i32_16 = arith.constant 0 : i32
    %26 = tpu.memref_slice %arg8[%c4_i32_15, %c0_i32_16] : memref<8x384xf32, #tpu.memory_space<vmem>> -> memref<1x384xf32, #tpu.memory_space<vmem>>
    %27 = tpu.memref_slice %arg11[%c4_i32] : memref<8x!tpu.dma_semaphore, #tpu.memory_space<semaphore_mem>> -> memref<1x!tpu.dma_semaphore, #tpu.memory_space<semaphore_mem>>
    %28 = tpu.memref_squeeze %27 : memref<1x!tpu.dma_semaphore, #tpu.memory_space<semaphore_mem>> -> memref<!tpu.dma_semaphore, #tpu.memory_space<semaphore_mem>>
    tpu.enqueue_dma source(%25 : memref<1x384xf32, #tpu.memory_space<any>>) target(%26 : memref<1x384xf32, #tpu.memory_space<vmem>>) target_semaphore(%28 : memref<!tpu.dma_semaphore, #tpu.memory_space<semaphore_mem>>)
    %c5 = arith.constant 5 : index
    %29 = memref.load %arg1[%c5] : memref<8xi32, #tpu.memory_space<smem>>
    %c5_i32 = arith.constant 5 : i32
    %c0_i32_17 = arith.constant 0 : i32
    %30 = tpu.memref_slice %arg2[%29, %c0_i32_17] : memref<65x384xf32, #tpu.memory_space<any>> -> memref<1x384xf32, #tpu.memory_space<any>>
    %c5_i32_18 = arith.constant 5 : i32
    %c0_i32_19 = arith.constant 0 : i32
    %31 = tpu.memref_slice %arg8[%c5_i32_18, %c0_i32_19] : memref<8x384xf32, #tpu.memory_space<vmem>> -> memref<1x384xf32, #tpu.memory_space<vmem>>
    %32 = tpu.memref_slice %arg11[%c5_i32] : memref<8x!tpu.dma_semaphore, #tpu.memory_space<semaphore_mem>> -> memref<1x!tpu.dma_semaphore, #tpu.memory_space<semaphore_mem>>
    %33 = tpu.memref_squeeze %32 : memref<1x!tpu.dma_semaphore, #tpu.memory_space<semaphore_mem>> -> memref<!tpu.dma_semaphore, #tpu.memory_space<semaphore_mem>>
    tpu.enqueue_dma source(%30 : memref<1x384xf32, #tpu.memory_space<any>>) target(%31 : memref<1x384xf32, #tpu.memory_space<vmem>>) target_semaphore(%33 : memref<!tpu.dma_semaphore, #tpu.memory_space<semaphore_mem>>)
    %c6 = arith.constant 6 : index
    %34 = memref.load %arg1[%c6] : memref<8xi32, #tpu.memory_space<smem>>
    %c6_i32 = arith.constant 6 : i32
    %c0_i32_20 = arith.constant 0 : i32
    %35 = tpu.memref_slice %arg2[%34, %c0_i32_20] : memref<65x384xf32, #tpu.memory_space<any>> -> memref<1x384xf32, #tpu.memory_space<any>>
    %c6_i32_21 = arith.constant 6 : i32
    %c0_i32_22 = arith.constant 0 : i32
    %36 = tpu.memref_slice %arg8[%c6_i32_21, %c0_i32_22] : memref<8x384xf32, #tpu.memory_space<vmem>> -> memref<1x384xf32, #tpu.memory_space<vmem>>
    %37 = tpu.memref_slice %arg11[%c6_i32] : memref<8x!tpu.dma_semaphore, #tpu.memory_space<semaphore_mem>> -> memref<1x!tpu.dma_semaphore, #tpu.memory_space<semaphore_mem>>
    %38 = tpu.memref_squeeze %37 : memref<1x!tpu.dma_semaphore, #tpu.memory_space<semaphore_mem>> -> memref<!tpu.dma_semaphore, #tpu.memory_space<semaphore_mem>>
    tpu.enqueue_dma source(%35 : memref<1x384xf32, #tpu.memory_space<any>>) target(%36 : memref<1x384xf32, #tpu.memory_space<vmem>>) target_semaphore(%38 : memref<!tpu.dma_semaphore, #tpu.memory_space<semaphore_mem>>)
    %c7 = arith.constant 7 : index
    %39 = memref.load %arg1[%c7] : memref<8xi32, #tpu.memory_space<smem>>
    %c7_i32 = arith.constant 7 : i32
    %c0_i32_23 = arith.constant 0 : i32
    %40 = tpu.memref_slice %arg2[%39, %c0_i32_23] : memref<65x384xf32, #tpu.memory_space<any>> -> memref<1x384xf32, #tpu.memory_space<any>>
    %c7_i32_24 = arith.constant 7 : i32
    %c0_i32_25 = arith.constant 0 : i32
    %41 = tpu.memref_slice %arg8[%c7_i32_24, %c0_i32_25] : memref<8x384xf32, #tpu.memory_space<vmem>> -> memref<1x384xf32, #tpu.memory_space<vmem>>
    %42 = tpu.memref_slice %arg11[%c7_i32] : memref<8x!tpu.dma_semaphore, #tpu.memory_space<semaphore_mem>> -> memref<1x!tpu.dma_semaphore, #tpu.memory_space<semaphore_mem>>
    %43 = tpu.memref_squeeze %42 : memref<1x!tpu.dma_semaphore, #tpu.memory_space<semaphore_mem>> -> memref<!tpu.dma_semaphore, #tpu.memory_space<semaphore_mem>>
    tpu.enqueue_dma source(%40 : memref<1x384xf32, #tpu.memory_space<any>>) target(%41 : memref<1x384xf32, #tpu.memory_space<vmem>>) target_semaphore(%43 : memref<!tpu.dma_semaphore, #tpu.memory_space<semaphore_mem>>)
    %c0_26 = arith.constant 0 : index
    %44 = memref.load %arg0[%c0_26] : memref<1xi32, #tpu.memory_space<smem>>
    %c0_27 = arith.constant 0 : index
    %c0_28 = arith.constant 0 : index
    %45 = vector.load %arg4[%c0_27, %c0_28] : memref<1x384xf32, #tpu.memory_space<vmem>>, vector<1x384xf32>
    %cst = arith.constant 0.000000e+00 : f32
    %46 = vector.broadcast %cst : f32 to vector<1x128xf32>
    %c0_i32_29 = arith.constant 0 : i32
    %c0_i32_30 = arith.constant 0 : i32
    %47 = tpu.memref_slice %arg2[%4, %c0_i32_30] : memref<65x384xf32, #tpu.memory_space<any>> -> memref<1x384xf32, #tpu.memory_space<any>>
    %c0_i32_31 = arith.constant 0 : i32
    %c0_i32_32 = arith.constant 0 : i32
    %48 = tpu.memref_slice %arg8[%c0_i32_31, %c0_i32_32] : memref<8x384xf32, #tpu.memory_space<vmem>> -> memref<1x384xf32, #tpu.memory_space<vmem>>
    %49 = tpu.memref_slice %arg11[%c0_i32_29] : memref<8x!tpu.dma_semaphore, #tpu.memory_space<semaphore_mem>> -> memref<1x!tpu.dma_semaphore, #tpu.memory_space<semaphore_mem>>
    %50 = tpu.memref_squeeze %49 : memref<1x!tpu.dma_semaphore, #tpu.memory_space<semaphore_mem>> -> memref<!tpu.dma_semaphore, #tpu.memory_space<semaphore_mem>>
    tpu.wait_dma2 semaphore(%50 : memref<!tpu.dma_semaphore, #tpu.memory_space<semaphore_mem>>) src(%47 : memref<1x384xf32, #tpu.memory_space<any>>) dst(%48 : memref<1x384xf32, #tpu.memory_space<vmem>>)
    %c0_33 = arith.constant 0 : index
    %c0_34 = arith.constant 0 : index
    %51 = vector.load %arg8[%c0_33, %c0_34] : memref<8x384xf32, #tpu.memory_space<vmem>>, vector<1x384xf32>
    %c0_35 = arith.constant 0 : index
    %c0_36 = arith.constant 0 : index
    %52 = vector.load %arg3[%c0_35, %c0_36] : memref<128x384xf32, #tpu.memory_space<vmem>>, vector<128x384xf32>
    %cst_37 = arith.constant dense<0.000000e+00> : vector<1x384xf32>
    %53 = tpu.matmul %46, %52, %cst_37 {dimension_numbers = #tpu.dot_dimension_numbers<[1], [0], [0], [1], [0, 0, 1, 1], [], []>} : vector<1x128xf32>, vector<128x384xf32>, vector<1x384xf32> -> vector<1x384xf32>
    %54 = arith.addf %53, %45 : vector<1x384xf32>
    %55 = vector.extract_strided_slice %51 {offsets = [0, 0], sizes = [1, 256], strides = [1, 1]} : vector<1x384xf32> to vector<1x256xf32>
    %56 = vector.extract_strided_slice %54 {offsets = [0, 0], sizes = [1, 256], strides = [1, 1]} : vector<1x384xf32> to vector<1x256xf32>
    %57 = arith.addf %55, %56 : vector<1x256xf32>
    %58 = arith.negf %57 : vector<1x256xf32>
    %59 = math.exp %58 : vector<1x256xf32>
    %cst_38 = arith.constant 1.000000e+00 : f32
    %60 = vector.broadcast %cst_38 : f32 to vector<1x256xf32>
    %61 = arith.addf %60, %59 : vector<1x256xf32>
    %62 = arith.divf %60, %61 : vector<1x256xf32>
    %63 = vector.extract_strided_slice %62 {offsets = [0, 0], sizes = [1, 128], strides = [1, 1]} : vector<1x256xf32> to vector<1x128xf32>
    %64 = vector.extract_strided_slice %62 {offsets = [0, 128], sizes = [1, 128], strides = [1, 1]} : vector<1x256xf32> to vector<1x128xf32>
    %65 = vector.extract_strided_slice %51 {offsets = [0, 256], sizes = [1, 128], strides = [1, 1]} : vector<1x384xf32> to vector<1x128xf32>
    %66 = vector.extract_strided_slice %54 {offsets = [0, 256], sizes = [1, 128], strides = [1, 1]} : vector<1x384xf32> to vector<1x128xf32>
    %67 = arith.mulf %63, %66 : vector<1x128xf32>
    %68 = arith.addf %65, %67 : vector<1x128xf32>
    %69 = math.tanh %68 : vector<1x128xf32>
    %cst_39 = arith.constant 1.000000e+00 : f32
    %70 = vector.broadcast %cst_39 : f32 to vector<1x128xf32>
    %71 = arith.subf %70, %64 : vector<1x128xf32>
    %72 = arith.mulf %71, %69 : vector<1x128xf32>
    %73 = arith.mulf %64, %46 : vector<1x128xf32>
    %74 = arith.addf %72, %73 : vector<1x128xf32>
    %c0_i32_40 = arith.constant 0 : i32
    %75 = arith.cmpi sgt, %44, %c0_i32_40 : i32
    %76 = arith.extui %75 : i1 to i32
    %77 = arith.sitofp %76 : i32 to f32
    %78 = vector.broadcast %77 : f32 to vector<1x128xf32>
    %79 = arith.mulf %78, %74 : vector<1x128xf32>
    %cst_41 = arith.constant 1.000000e+00 : f32
    %80 = arith.subf %cst_41, %77 : f32
    %81 = vector.broadcast %80 : f32 to vector<1x128xf32>
    %82 = arith.mulf %81, %46 : vector<1x128xf32>
    %83 = arith.addf %79, %82 : vector<1x128xf32>
    %c1_i32_42 = arith.constant 1 : i32
    %c0_i32_43 = arith.constant 0 : i32
    %84 = tpu.memref_slice %arg2[%9, %c0_i32_43] : memref<65x384xf32, #tpu.memory_space<any>> -> memref<1x384xf32, #tpu.memory_space<any>>
    %c1_i32_44 = arith.constant 1 : i32
    %c0_i32_45 = arith.constant 0 : i32
    %85 = tpu.memref_slice %arg8[%c1_i32_44, %c0_i32_45] : memref<8x384xf32, #tpu.memory_space<vmem>> -> memref<1x384xf32, #tpu.memory_space<vmem>>
    %86 = tpu.memref_slice %arg11[%c1_i32_42] : memref<8x!tpu.dma_semaphore, #tpu.memory_space<semaphore_mem>> -> memref<1x!tpu.dma_semaphore, #tpu.memory_space<semaphore_mem>>
    %87 = tpu.memref_squeeze %86 : memref<1x!tpu.dma_semaphore, #tpu.memory_space<semaphore_mem>> -> memref<!tpu.dma_semaphore, #tpu.memory_space<semaphore_mem>>
    tpu.wait_dma2 semaphore(%87 : memref<!tpu.dma_semaphore, #tpu.memory_space<semaphore_mem>>) src(%84 : memref<1x384xf32, #tpu.memory_space<any>>) dst(%85 : memref<1x384xf32, #tpu.memory_space<vmem>>)
    %c1_46 = arith.constant 1 : index
    %c0_47 = arith.constant 0 : index
    %88 = vector.load %arg8[%c1_46, %c0_47] : memref<8x384xf32, #tpu.memory_space<vmem>>, vector<1x384xf32>
    %c0_48 = arith.constant 0 : index
    %c0_49 = arith.constant 0 : index
    %89 = vector.load %arg3[%c0_48, %c0_49] : memref<128x384xf32, #tpu.memory_space<vmem>>, vector<128x384xf32>
    %cst_50 = arith.constant dense<0.000000e+00> : vector<1x384xf32>
    %90 = tpu.matmul %83, %89, %cst_50 {dimension_numbers = #tpu.dot_dimension_numbers<[1], [0], [0], [1], [0, 0, 1, 1], [], []>} : vector<1x128xf32>, vector<128x384xf32>, vector<1x384xf32> -> vector<1x384xf32>
    %91 = arith.addf %90, %45 : vector<1x384xf32>
    %92 = vector.extract_strided_slice %88 {offsets = [0, 0], sizes = [1, 256], strides = [1, 1]} : vector<1x384xf32> to vector<1x256xf32>
    %93 = vector.extract_strided_slice %91 {offsets = [0, 0], sizes = [1, 256], strides = [1, 1]} : vector<1x384xf32> to vector<1x256xf32>
    %94 = arith.addf %92, %93 : vector<1x256xf32>
    %95 = arith.negf %94 : vector<1x256xf32>
    %96 = math.exp %95 : vector<1x256xf32>
    %cst_51 = arith.constant 1.000000e+00 : f32
    %97 = vector.broadcast %cst_51 : f32 to vector<1x256xf32>
    %98 = arith.addf %97, %96 : vector<1x256xf32>
    %99 = arith.divf %97, %98 : vector<1x256xf32>
    %100 = vector.extract_strided_slice %99 {offsets = [0, 0], sizes = [1, 128], strides = [1, 1]} : vector<1x256xf32> to vector<1x128xf32>
    %101 = vector.extract_strided_slice %99 {offsets = [0, 128], sizes = [1, 128], strides = [1, 1]} : vector<1x256xf32> to vector<1x128xf32>
    %102 = vector.extract_strided_slice %88 {offsets = [0, 256], sizes = [1, 128], strides = [1, 1]} : vector<1x384xf32> to vector<1x128xf32>
    %103 = vector.extract_strided_slice %91 {offsets = [0, 256], sizes = [1, 128], strides = [1, 1]} : vector<1x384xf32> to vector<1x128xf32>
    %104 = arith.mulf %100, %103 : vector<1x128xf32>
    %105 = arith.addf %102, %104 : vector<1x128xf32>
    %106 = math.tanh %105 : vector<1x128xf32>
    %cst_52 = arith.constant 1.000000e+00 : f32
    %107 = vector.broadcast %cst_52 : f32 to vector<1x128xf32>
    %108 = arith.subf %107, %101 : vector<1x128xf32>
    %109 = arith.mulf %108, %106 : vector<1x128xf32>
    %110 = arith.mulf %101, %83 : vector<1x128xf32>
    %111 = arith.addf %109, %110 : vector<1x128xf32>
    %c1_i32_53 = arith.constant 1 : i32
    %112 = arith.cmpi sgt, %44, %c1_i32_53 : i32
    %113 = arith.extui %112 : i1 to i32
    %114 = arith.sitofp %113 : i32 to f32
    %115 = vector.broadcast %114 : f32 to vector<1x128xf32>
    %116 = arith.mulf %115, %111 : vector<1x128xf32>
    %cst_54 = arith.constant 1.000000e+00 : f32
    %117 = arith.subf %cst_54, %114 : f32
    %118 = vector.broadcast %117 : f32 to vector<1x128xf32>
    %119 = arith.mulf %118, %83 : vector<1x128xf32>
    %120 = arith.addf %116, %119 : vector<1x128xf32>
    %c2_i32_55 = arith.constant 2 : i32
    %c0_i32_56 = arith.constant 0 : i32
    %121 = tpu.memref_slice %arg2[%14, %c0_i32_56] : memref<65x384xf32, #tpu.memory_space<any>> -> memref<1x384xf32, #tpu.memory_space<any>>
    %c2_i32_57 = arith.constant 2 : i32
    %c0_i32_58 = arith.constant 0 : i32
    %122 = tpu.memref_slice %arg8[%c2_i32_57, %c0_i32_58] : memref<8x384xf32, #tpu.memory_space<vmem>> -> memref<1x384xf32, #tpu.memory_space<vmem>>
    %123 = tpu.memref_slice %arg11[%c2_i32_55] : memref<8x!tpu.dma_semaphore, #tpu.memory_space<semaphore_mem>> -> memref<1x!tpu.dma_semaphore, #tpu.memory_space<semaphore_mem>>
    %124 = tpu.memref_squeeze %123 : memref<1x!tpu.dma_semaphore, #tpu.memory_space<semaphore_mem>> -> memref<!tpu.dma_semaphore, #tpu.memory_space<semaphore_mem>>
    tpu.wait_dma2 semaphore(%124 : memref<!tpu.dma_semaphore, #tpu.memory_space<semaphore_mem>>) src(%121 : memref<1x384xf32, #tpu.memory_space<any>>) dst(%122 : memref<1x384xf32, #tpu.memory_space<vmem>>)
    %c2_59 = arith.constant 2 : index
    %c0_60 = arith.constant 0 : index
    %125 = vector.load %arg8[%c2_59, %c0_60] : memref<8x384xf32, #tpu.memory_space<vmem>>, vector<1x384xf32>
    %c0_61 = arith.constant 0 : index
    %c0_62 = arith.constant 0 : index
    %126 = vector.load %arg3[%c0_61, %c0_62] : memref<128x384xf32, #tpu.memory_space<vmem>>, vector<128x384xf32>
    %cst_63 = arith.constant dense<0.000000e+00> : vector<1x384xf32>
    %127 = tpu.matmul %120, %126, %cst_63 {dimension_numbers = #tpu.dot_dimension_numbers<[1], [0], [0], [1], [0, 0, 1, 1], [], []>} : vector<1x128xf32>, vector<128x384xf32>, vector<1x384xf32> -> vector<1x384xf32>
    %128 = arith.addf %127, %45 : vector<1x384xf32>
    %129 = vector.extract_strided_slice %125 {offsets = [0, 0], sizes = [1, 256], strides = [1, 1]} : vector<1x384xf32> to vector<1x256xf32>
    %130 = vector.extract_strided_slice %128 {offsets = [0, 0], sizes = [1, 256], strides = [1, 1]} : vector<1x384xf32> to vector<1x256xf32>
    %131 = arith.addf %129, %130 : vector<1x256xf32>
    %132 = arith.negf %131 : vector<1x256xf32>
    %133 = math.exp %132 : vector<1x256xf32>
    %cst_64 = arith.constant 1.000000e+00 : f32
    %134 = vector.broadcast %cst_64 : f32 to vector<1x256xf32>
    %135 = arith.addf %134, %133 : vector<1x256xf32>
    %136 = arith.divf %134, %135 : vector<1x256xf32>
    %137 = vector.extract_strided_slice %136 {offsets = [0, 0], sizes = [1, 128], strides = [1, 1]} : vector<1x256xf32> to vector<1x128xf32>
    %138 = vector.extract_strided_slice %136 {offsets = [0, 128], sizes = [1, 128], strides = [1, 1]} : vector<1x256xf32> to vector<1x128xf32>
    %139 = vector.extract_strided_slice %125 {offsets = [0, 256], sizes = [1, 128], strides = [1, 1]} : vector<1x384xf32> to vector<1x128xf32>
    %140 = vector.extract_strided_slice %128 {offsets = [0, 256], sizes = [1, 128], strides = [1, 1]} : vector<1x384xf32> to vector<1x128xf32>
    %141 = arith.mulf %137, %140 : vector<1x128xf32>
    %142 = arith.addf %139, %141 : vector<1x128xf32>
    %143 = math.tanh %142 : vector<1x128xf32>
    %cst_65 = arith.constant 1.000000e+00 : f32
    %144 = vector.broadcast %cst_65 : f32 to vector<1x128xf32>
    %145 = arith.subf %144, %138 : vector<1x128xf32>
    %146 = arith.mulf %145, %143 : vector<1x128xf32>
    %147 = arith.mulf %138, %120 : vector<1x128xf32>
    %148 = arith.addf %146, %147 : vector<1x128xf32>
    %c2_i32_66 = arith.constant 2 : i32
    %149 = arith.cmpi sgt, %44, %c2_i32_66 : i32
    %150 = arith.extui %149 : i1 to i32
    %151 = arith.sitofp %150 : i32 to f32
    %152 = vector.broadcast %151 : f32 to vector<1x128xf32>
    %153 = arith.mulf %152, %148 : vector<1x128xf32>
    %cst_67 = arith.constant 1.000000e+00 : f32
    %154 = arith.subf %cst_67, %151 : f32
    %155 = vector.broadcast %154 : f32 to vector<1x128xf32>
    %156 = arith.mulf %155, %120 : vector<1x128xf32>
    %157 = arith.addf %153, %156 : vector<1x128xf32>
    %c3_i32_68 = arith.constant 3 : i32
    %c0_i32_69 = arith.constant 0 : i32
    %158 = tpu.memref_slice %arg2[%19, %c0_i32_69] : memref<65x384xf32, #tpu.memory_space<any>> -> memref<1x384xf32, #tpu.memory_space<any>>
    %c3_i32_70 = arith.constant 3 : i32
    %c0_i32_71 = arith.constant 0 : i32
    %159 = tpu.memref_slice %arg8[%c3_i32_70, %c0_i32_71] : memref<8x384xf32, #tpu.memory_space<vmem>> -> memref<1x384xf32, #tpu.memory_space<vmem>>
    %160 = tpu.memref_slice %arg11[%c3_i32_68] : memref<8x!tpu.dma_semaphore, #tpu.memory_space<semaphore_mem>> -> memref<1x!tpu.dma_semaphore, #tpu.memory_space<semaphore_mem>>
    %161 = tpu.memref_squeeze %160 : memref<1x!tpu.dma_semaphore, #tpu.memory_space<semaphore_mem>> -> memref<!tpu.dma_semaphore, #tpu.memory_space<semaphore_mem>>
    tpu.wait_dma2 semaphore(%161 : memref<!tpu.dma_semaphore, #tpu.memory_space<semaphore_mem>>) src(%158 : memref<1x384xf32, #tpu.memory_space<any>>) dst(%159 : memref<1x384xf32, #tpu.memory_space<vmem>>)
    %c3_72 = arith.constant 3 : index
    %c0_73 = arith.constant 0 : index
    %162 = vector.load %arg8[%c3_72, %c0_73] : memref<8x384xf32, #tpu.memory_space<vmem>>, vector<1x384xf32>
    %c0_74 = arith.constant 0 : index
    %c0_75 = arith.constant 0 : index
    %163 = vector.load %arg3[%c0_74, %c0_75] : memref<128x384xf32, #tpu.memory_space<vmem>>, vector<128x384xf32>
    %cst_76 = arith.constant dense<0.000000e+00> : vector<1x384xf32>
    %164 = tpu.matmul %157, %163, %cst_76 {dimension_numbers = #tpu.dot_dimension_numbers<[1], [0], [0], [1], [0, 0, 1, 1], [], []>} : vector<1x128xf32>, vector<128x384xf32>, vector<1x384xf32> -> vector<1x384xf32>
    %165 = arith.addf %164, %45 : vector<1x384xf32>
    %166 = vector.extract_strided_slice %162 {offsets = [0, 0], sizes = [1, 256], strides = [1, 1]} : vector<1x384xf32> to vector<1x256xf32>
    %167 = vector.extract_strided_slice %165 {offsets = [0, 0], sizes = [1, 256], strides = [1, 1]} : vector<1x384xf32> to vector<1x256xf32>
    %168 = arith.addf %166, %167 : vector<1x256xf32>
    %169 = arith.negf %168 : vector<1x256xf32>
    %170 = math.exp %169 : vector<1x256xf32>
    %cst_77 = arith.constant 1.000000e+00 : f32
    %171 = vector.broadcast %cst_77 : f32 to vector<1x256xf32>
    %172 = arith.addf %171, %170 : vector<1x256xf32>
    %173 = arith.divf %171, %172 : vector<1x256xf32>
    %174 = vector.extract_strided_slice %173 {offsets = [0, 0], sizes = [1, 128], strides = [1, 1]} : vector<1x256xf32> to vector<1x128xf32>
    %175 = vector.extract_strided_slice %173 {offsets = [0, 128], sizes = [1, 128], strides = [1, 1]} : vector<1x256xf32> to vector<1x128xf32>
    %176 = vector.extract_strided_slice %162 {offsets = [0, 256], sizes = [1, 128], strides = [1, 1]} : vector<1x384xf32> to vector<1x128xf32>
    %177 = vector.extract_strided_slice %165 {offsets = [0, 256], sizes = [1, 128], strides = [1, 1]} : vector<1x384xf32> to vector<1x128xf32>
    %178 = arith.mulf %174, %177 : vector<1x128xf32>
    %179 = arith.addf %176, %178 : vector<1x128xf32>
    %180 = math.tanh %179 : vector<1x128xf32>
    %cst_78 = arith.constant 1.000000e+00 : f32
    %181 = vector.broadcast %cst_78 : f32 to vector<1x128xf32>
    %182 = arith.subf %181, %175 : vector<1x128xf32>
    %183 = arith.mulf %182, %180 : vector<1x128xf32>
    %184 = arith.mulf %175, %157 : vector<1x128xf32>
    %185 = arith.addf %183, %184 : vector<1x128xf32>
    %c3_i32_79 = arith.constant 3 : i32
    %186 = arith.cmpi sgt, %44, %c3_i32_79 : i32
    %187 = arith.extui %186 : i1 to i32
    %188 = arith.sitofp %187 : i32 to f32
    %189 = vector.broadcast %188 : f32 to vector<1x128xf32>
    %190 = arith.mulf %189, %185 : vector<1x128xf32>
    %cst_80 = arith.constant 1.000000e+00 : f32
    %191 = arith.subf %cst_80, %188 : f32
    %192 = vector.broadcast %191 : f32 to vector<1x128xf32>
    %193 = arith.mulf %192, %157 : vector<1x128xf32>
    %194 = arith.addf %190, %193 : vector<1x128xf32>
    %c4_i32_81 = arith.constant 4 : i32
    %c0_i32_82 = arith.constant 0 : i32
    %195 = tpu.memref_slice %arg2[%24, %c0_i32_82] : memref<65x384xf32, #tpu.memory_space<any>> -> memref<1x384xf32, #tpu.memory_space<any>>
    %c4_i32_83 = arith.constant 4 : i32
    %c0_i32_84 = arith.constant 0 : i32
    %196 = tpu.memref_slice %arg8[%c4_i32_83, %c0_i32_84] : memref<8x384xf32, #tpu.memory_space<vmem>> -> memref<1x384xf32, #tpu.memory_space<vmem>>
    %197 = tpu.memref_slice %arg11[%c4_i32_81] : memref<8x!tpu.dma_semaphore, #tpu.memory_space<semaphore_mem>> -> memref<1x!tpu.dma_semaphore, #tpu.memory_space<semaphore_mem>>
    %198 = tpu.memref_squeeze %197 : memref<1x!tpu.dma_semaphore, #tpu.memory_space<semaphore_mem>> -> memref<!tpu.dma_semaphore, #tpu.memory_space<semaphore_mem>>
    tpu.wait_dma2 semaphore(%198 : memref<!tpu.dma_semaphore, #tpu.memory_space<semaphore_mem>>) src(%195 : memref<1x384xf32, #tpu.memory_space<any>>) dst(%196 : memref<1x384xf32, #tpu.memory_space<vmem>>)
    %c4_85 = arith.constant 4 : index
    %c0_86 = arith.constant 0 : index
    %199 = vector.load %arg8[%c4_85, %c0_86] : memref<8x384xf32, #tpu.memory_space<vmem>>, vector<1x384xf32>
    %c0_87 = arith.constant 0 : index
    %c0_88 = arith.constant 0 : index
    %200 = vector.load %arg3[%c0_87, %c0_88] : memref<128x384xf32, #tpu.memory_space<vmem>>, vector<128x384xf32>
    %cst_89 = arith.constant dense<0.000000e+00> : vector<1x384xf32>
    %201 = tpu.matmul %194, %200, %cst_89 {dimension_numbers = #tpu.dot_dimension_numbers<[1], [0], [0], [1], [0, 0, 1, 1], [], []>} : vector<1x128xf32>, vector<128x384xf32>, vector<1x384xf32> -> vector<1x384xf32>
    %202 = arith.addf %201, %45 : vector<1x384xf32>
    %203 = vector.extract_strided_slice %199 {offsets = [0, 0], sizes = [1, 256], strides = [1, 1]} : vector<1x384xf32> to vector<1x256xf32>
    %204 = vector.extract_strided_slice %202 {offsets = [0, 0], sizes = [1, 256], strides = [1, 1]} : vector<1x384xf32> to vector<1x256xf32>
    %205 = arith.addf %203, %204 : vector<1x256xf32>
    %206 = arith.negf %205 : vector<1x256xf32>
    %207 = math.exp %206 : vector<1x256xf32>
    %cst_90 = arith.constant 1.000000e+00 : f32
    %208 = vector.broadcast %cst_90 : f32 to vector<1x256xf32>
    %209 = arith.addf %208, %207 : vector<1x256xf32>
    %210 = arith.divf %208, %209 : vector<1x256xf32>
    %211 = vector.extract_strided_slice %210 {offsets = [0, 0], sizes = [1, 128], strides = [1, 1]} : vector<1x256xf32> to vector<1x128xf32>
    %212 = vector.extract_strided_slice %210 {offsets = [0, 128], sizes = [1, 128], strides = [1, 1]} : vector<1x256xf32> to vector<1x128xf32>
    %213 = vector.extract_strided_slice %199 {offsets = [0, 256], sizes = [1, 128], strides = [1, 1]} : vector<1x384xf32> to vector<1x128xf32>
    %214 = vector.extract_strided_slice %202 {offsets = [0, 256], sizes = [1, 128], strides = [1, 1]} : vector<1x384xf32> to vector<1x128xf32>
    %215 = arith.mulf %211, %214 : vector<1x128xf32>
    %216 = arith.addf %213, %215 : vector<1x128xf32>
    %217 = math.tanh %216 : vector<1x128xf32>
    %cst_91 = arith.constant 1.000000e+00 : f32
    %218 = vector.broadcast %cst_91 : f32 to vector<1x128xf32>
    %219 = arith.subf %218, %212 : vector<1x128xf32>
    %220 = arith.mulf %219, %217 : vector<1x128xf32>
    %221 = arith.mulf %212, %194 : vector<1x128xf32>
    %222 = arith.addf %220, %221 : vector<1x128xf32>
    %c4_i32_92 = arith.constant 4 : i32
    %223 = arith.cmpi sgt, %44, %c4_i32_92 : i32
    %224 = arith.extui %223 : i1 to i32
    %225 = arith.sitofp %224 : i32 to f32
    %226 = vector.broadcast %225 : f32 to vector<1x128xf32>
    %227 = arith.mulf %226, %222 : vector<1x128xf32>
    %cst_93 = arith.constant 1.000000e+00 : f32
    %228 = arith.subf %cst_93, %225 : f32
    %229 = vector.broadcast %228 : f32 to vector<1x128xf32>
    %230 = arith.mulf %229, %194 : vector<1x128xf32>
    %231 = arith.addf %227, %230 : vector<1x128xf32>
    %c5_i32_94 = arith.constant 5 : i32
    %c0_i32_95 = arith.constant 0 : i32
    %232 = tpu.memref_slice %arg2[%29, %c0_i32_95] : memref<65x384xf32, #tpu.memory_space<any>> -> memref<1x384xf32, #tpu.memory_space<any>>
    %c5_i32_96 = arith.constant 5 : i32
    %c0_i32_97 = arith.constant 0 : i32
    %233 = tpu.memref_slice %arg8[%c5_i32_96, %c0_i32_97] : memref<8x384xf32, #tpu.memory_space<vmem>> -> memref<1x384xf32, #tpu.memory_space<vmem>>
    %234 = tpu.memref_slice %arg11[%c5_i32_94] : memref<8x!tpu.dma_semaphore, #tpu.memory_space<semaphore_mem>> -> memref<1x!tpu.dma_semaphore, #tpu.memory_space<semaphore_mem>>
    %235 = tpu.memref_squeeze %234 : memref<1x!tpu.dma_semaphore, #tpu.memory_space<semaphore_mem>> -> memref<!tpu.dma_semaphore, #tpu.memory_space<semaphore_mem>>
    tpu.wait_dma2 semaphore(%235 : memref<!tpu.dma_semaphore, #tpu.memory_space<semaphore_mem>>) src(%232 : memref<1x384xf32, #tpu.memory_space<any>>) dst(%233 : memref<1x384xf32, #tpu.memory_space<vmem>>)
    %c5_98 = arith.constant 5 : index
    %c0_99 = arith.constant 0 : index
    %236 = vector.load %arg8[%c5_98, %c0_99] : memref<8x384xf32, #tpu.memory_space<vmem>>, vector<1x384xf32>
    %c0_100 = arith.constant 0 : index
    %c0_101 = arith.constant 0 : index
    %237 = vector.load %arg3[%c0_100, %c0_101] : memref<128x384xf32, #tpu.memory_space<vmem>>, vector<128x384xf32>
    %cst_102 = arith.constant dense<0.000000e+00> : vector<1x384xf32>
    %238 = tpu.matmul %231, %237, %cst_102 {dimension_numbers = #tpu.dot_dimension_numbers<[1], [0], [0], [1], [0, 0, 1, 1], [], []>} : vector<1x128xf32>, vector<128x384xf32>, vector<1x384xf32> -> vector<1x384xf32>
    %239 = arith.addf %238, %45 : vector<1x384xf32>
    %240 = vector.extract_strided_slice %236 {offsets = [0, 0], sizes = [1, 256], strides = [1, 1]} : vector<1x384xf32> to vector<1x256xf32>
    %241 = vector.extract_strided_slice %239 {offsets = [0, 0], sizes = [1, 256], strides = [1, 1]} : vector<1x384xf32> to vector<1x256xf32>
    %242 = arith.addf %240, %241 : vector<1x256xf32>
    %243 = arith.negf %242 : vector<1x256xf32>
    %244 = math.exp %243 : vector<1x256xf32>
    %cst_103 = arith.constant 1.000000e+00 : f32
    %245 = vector.broadcast %cst_103 : f32 to vector<1x256xf32>
    %246 = arith.addf %245, %244 : vector<1x256xf32>
    %247 = arith.divf %245, %246 : vector<1x256xf32>
    %248 = vector.extract_strided_slice %247 {offsets = [0, 0], sizes = [1, 128], strides = [1, 1]} : vector<1x256xf32> to vector<1x128xf32>
    %249 = vector.extract_strided_slice %247 {offsets = [0, 128], sizes = [1, 128], strides = [1, 1]} : vector<1x256xf32> to vector<1x128xf32>
    %250 = vector.extract_strided_slice %236 {offsets = [0, 256], sizes = [1, 128], strides = [1, 1]} : vector<1x384xf32> to vector<1x128xf32>
    %251 = vector.extract_strided_slice %239 {offsets = [0, 256], sizes = [1, 128], strides = [1, 1]} : vector<1x384xf32> to vector<1x128xf32>
    %252 = arith.mulf %248, %251 : vector<1x128xf32>
    %253 = arith.addf %250, %252 : vector<1x128xf32>
    %254 = math.tanh %253 : vector<1x128xf32>
    %cst_104 = arith.constant 1.000000e+00 : f32
    %255 = vector.broadcast %cst_104 : f32 to vector<1x128xf32>
    %256 = arith.subf %255, %249 : vector<1x128xf32>
    %257 = arith.mulf %256, %254 : vector<1x128xf32>
    %258 = arith.mulf %249, %231 : vector<1x128xf32>
    %259 = arith.addf %257, %258 : vector<1x128xf32>
    %c5_i32_105 = arith.constant 5 : i32
    %260 = arith.cmpi sgt, %44, %c5_i32_105 : i32
    %261 = arith.extui %260 : i1 to i32
    %262 = arith.sitofp %261 : i32 to f32
    %263 = vector.broadcast %262 : f32 to vector<1x128xf32>
    %264 = arith.mulf %263, %259 : vector<1x128xf32>
    %cst_106 = arith.constant 1.000000e+00 : f32
    %265 = arith.subf %cst_106, %262 : f32
    %266 = vector.broadcast %265 : f32 to vector<1x128xf32>
    %267 = arith.mulf %266, %231 : vector<1x128xf32>
    %268 = arith.addf %264, %267 : vector<1x128xf32>
    %c6_i32_107 = arith.constant 6 : i32
    %c0_i32_108 = arith.constant 0 : i32
    %269 = tpu.memref_slice %arg2[%34, %c0_i32_108] : memref<65x384xf32, #tpu.memory_space<any>> -> memref<1x384xf32, #tpu.memory_space<any>>
    %c6_i32_109 = arith.constant 6 : i32
    %c0_i32_110 = arith.constant 0 : i32
    %270 = tpu.memref_slice %arg8[%c6_i32_109, %c0_i32_110] : memref<8x384xf32, #tpu.memory_space<vmem>> -> memref<1x384xf32, #tpu.memory_space<vmem>>
    %271 = tpu.memref_slice %arg11[%c6_i32_107] : memref<8x!tpu.dma_semaphore, #tpu.memory_space<semaphore_mem>> -> memref<1x!tpu.dma_semaphore, #tpu.memory_space<semaphore_mem>>
    %272 = tpu.memref_squeeze %271 : memref<1x!tpu.dma_semaphore, #tpu.memory_space<semaphore_mem>> -> memref<!tpu.dma_semaphore, #tpu.memory_space<semaphore_mem>>
    tpu.wait_dma2 semaphore(%272 : memref<!tpu.dma_semaphore, #tpu.memory_space<semaphore_mem>>) src(%269 : memref<1x384xf32, #tpu.memory_space<any>>) dst(%270 : memref<1x384xf32, #tpu.memory_space<vmem>>)
    %c6_111 = arith.constant 6 : index
    %c0_112 = arith.constant 0 : index
    %273 = vector.load %arg8[%c6_111, %c0_112] : memref<8x384xf32, #tpu.memory_space<vmem>>, vector<1x384xf32>
    %c0_113 = arith.constant 0 : index
    %c0_114 = arith.constant 0 : index
    %274 = vector.load %arg3[%c0_113, %c0_114] : memref<128x384xf32, #tpu.memory_space<vmem>>, vector<128x384xf32>
    %cst_115 = arith.constant dense<0.000000e+00> : vector<1x384xf32>
    %275 = tpu.matmul %268, %274, %cst_115 {dimension_numbers = #tpu.dot_dimension_numbers<[1], [0], [0], [1], [0, 0, 1, 1], [], []>} : vector<1x128xf32>, vector<128x384xf32>, vector<1x384xf32> -> vector<1x384xf32>
    %276 = arith.addf %275, %45 : vector<1x384xf32>
    %277 = vector.extract_strided_slice %273 {offsets = [0, 0], sizes = [1, 256], strides = [1, 1]} : vector<1x384xf32> to vector<1x256xf32>
    %278 = vector.extract_strided_slice %276 {offsets = [0, 0], sizes = [1, 256], strides = [1, 1]} : vector<1x384xf32> to vector<1x256xf32>
    %279 = arith.addf %277, %278 : vector<1x256xf32>
    %280 = arith.negf %279 : vector<1x256xf32>
    %281 = math.exp %280 : vector<1x256xf32>
    %cst_116 = arith.constant 1.000000e+00 : f32
    %282 = vector.broadcast %cst_116 : f32 to vector<1x256xf32>
    %283 = arith.addf %282, %281 : vector<1x256xf32>
    %284 = arith.divf %282, %283 : vector<1x256xf32>
    %285 = vector.extract_strided_slice %284 {offsets = [0, 0], sizes = [1, 128], strides = [1, 1]} : vector<1x256xf32> to vector<1x128xf32>
    %286 = vector.extract_strided_slice %284 {offsets = [0, 128], sizes = [1, 128], strides = [1, 1]} : vector<1x256xf32> to vector<1x128xf32>
    %287 = vector.extract_strided_slice %273 {offsets = [0, 256], sizes = [1, 128], strides = [1, 1]} : vector<1x384xf32> to vector<1x128xf32>
    %288 = vector.extract_strided_slice %276 {offsets = [0, 256], sizes = [1, 128], strides = [1, 1]} : vector<1x384xf32> to vector<1x128xf32>
    %289 = arith.mulf %285, %288 : vector<1x128xf32>
    %290 = arith.addf %287, %289 : vector<1x128xf32>
    %291 = math.tanh %290 : vector<1x128xf32>
    %cst_117 = arith.constant 1.000000e+00 : f32
    %292 = vector.broadcast %cst_117 : f32 to vector<1x128xf32>
    %293 = arith.subf %292, %286 : vector<1x128xf32>
    %294 = arith.mulf %293, %291 : vector<1x128xf32>
    %295 = arith.mulf %286, %268 : vector<1x128xf32>
    %296 = arith.addf %294, %295 : vector<1x128xf32>
    %c6_i32_118 = arith.constant 6 : i32
    %297 = arith.cmpi sgt, %44, %c6_i32_118 : i32
    %298 = arith.extui %297 : i1 to i32
    %299 = arith.sitofp %298 : i32 to f32
    %300 = vector.broadcast %299 : f32 to vector<1x128xf32>
    %301 = arith.mulf %300, %296 : vector<1x128xf32>
    %cst_119 = arith.constant 1.000000e+00 : f32
    %302 = arith.subf %cst_119, %299 : f32
    %303 = vector.broadcast %302 : f32 to vector<1x128xf32>
    %304 = arith.mulf %303, %268 : vector<1x128xf32>
    %305 = arith.addf %301, %304 : vector<1x128xf32>
    %c7_i32_120 = arith.constant 7 : i32
    %c0_i32_121 = arith.constant 0 : i32
    %306 = tpu.memref_slice %arg2[%39, %c0_i32_121] : memref<65x384xf32, #tpu.memory_space<any>> -> memref<1x384xf32, #tpu.memory_space<any>>
    %c7_i32_122 = arith.constant 7 : i32
    %c0_i32_123 = arith.constant 0 : i32
    %307 = tpu.memref_slice %arg8[%c7_i32_122, %c0_i32_123] : memref<8x384xf32, #tpu.memory_space<vmem>> -> memref<1x384xf32, #tpu.memory_space<vmem>>
    %308 = tpu.memref_slice %arg11[%c7_i32_120] : memref<8x!tpu.dma_semaphore, #tpu.memory_space<semaphore_mem>> -> memref<1x!tpu.dma_semaphore, #tpu.memory_space<semaphore_mem>>
    %309 = tpu.memref_squeeze %308 : memref<1x!tpu.dma_semaphore, #tpu.memory_space<semaphore_mem>> -> memref<!tpu.dma_semaphore, #tpu.memory_space<semaphore_mem>>
    tpu.wait_dma2 semaphore(%309 : memref<!tpu.dma_semaphore, #tpu.memory_space<semaphore_mem>>) src(%306 : memref<1x384xf32, #tpu.memory_space<any>>) dst(%307 : memref<1x384xf32, #tpu.memory_space<vmem>>)
    %c7_124 = arith.constant 7 : index
    %c0_125 = arith.constant 0 : index
    %310 = vector.load %arg8[%c7_124, %c0_125] : memref<8x384xf32, #tpu.memory_space<vmem>>, vector<1x384xf32>
    %c0_126 = arith.constant 0 : index
    %c0_127 = arith.constant 0 : index
    %311 = vector.load %arg3[%c0_126, %c0_127] : memref<128x384xf32, #tpu.memory_space<vmem>>, vector<128x384xf32>
    %cst_128 = arith.constant dense<0.000000e+00> : vector<1x384xf32>
    %312 = tpu.matmul %305, %311, %cst_128 {dimension_numbers = #tpu.dot_dimension_numbers<[1], [0], [0], [1], [0, 0, 1, 1], [], []>} : vector<1x128xf32>, vector<128x384xf32>, vector<1x384xf32> -> vector<1x384xf32>
    %313 = arith.addf %312, %45 : vector<1x384xf32>
    %314 = vector.extract_strided_slice %310 {offsets = [0, 0], sizes = [1, 256], strides = [1, 1]} : vector<1x384xf32> to vector<1x256xf32>
    %315 = vector.extract_strided_slice %313 {offsets = [0, 0], sizes = [1, 256], strides = [1, 1]} : vector<1x384xf32> to vector<1x256xf32>
    %316 = arith.addf %314, %315 : vector<1x256xf32>
    %317 = arith.negf %316 : vector<1x256xf32>
    %318 = math.exp %317 : vector<1x256xf32>
    %cst_129 = arith.constant 1.000000e+00 : f32
    %319 = vector.broadcast %cst_129 : f32 to vector<1x256xf32>
    %320 = arith.addf %319, %318 : vector<1x256xf32>
    %321 = arith.divf %319, %320 : vector<1x256xf32>
    %322 = vector.extract_strided_slice %321 {offsets = [0, 0], sizes = [1, 128], strides = [1, 1]} : vector<1x256xf32> to vector<1x128xf32>
    %323 = vector.extract_strided_slice %321 {offsets = [0, 128], sizes = [1, 128], strides = [1, 1]} : vector<1x256xf32> to vector<1x128xf32>
    %324 = vector.extract_strided_slice %310 {offsets = [0, 256], sizes = [1, 128], strides = [1, 1]} : vector<1x384xf32> to vector<1x128xf32>
    %325 = vector.extract_strided_slice %313 {offsets = [0, 256], sizes = [1, 128], strides = [1, 1]} : vector<1x384xf32> to vector<1x128xf32>
    %326 = arith.mulf %322, %325 : vector<1x128xf32>
    %327 = arith.addf %324, %326 : vector<1x128xf32>
    %328 = math.tanh %327 : vector<1x128xf32>
    %cst_130 = arith.constant 1.000000e+00 : f32
    %329 = vector.broadcast %cst_130 : f32 to vector<1x128xf32>
    %330 = arith.subf %329, %323 : vector<1x128xf32>
    %331 = arith.mulf %330, %328 : vector<1x128xf32>
    %332 = arith.mulf %323, %305 : vector<1x128xf32>
    %333 = arith.addf %331, %332 : vector<1x128xf32>
    %c7_i32_131 = arith.constant 7 : i32
    %334 = arith.cmpi sgt, %44, %c7_i32_131 : i32
    %335 = arith.extui %334 : i1 to i32
    %336 = arith.sitofp %335 : i32 to f32
    %337 = vector.broadcast %336 : f32 to vector<1x128xf32>
    %338 = arith.mulf %337, %333 : vector<1x128xf32>
    %cst_132 = arith.constant 1.000000e+00 : f32
    %339 = arith.subf %cst_132, %336 : f32
    %340 = vector.broadcast %339 : f32 to vector<1x128xf32>
    %341 = arith.mulf %340, %305 : vector<1x128xf32>
    %342 = arith.addf %338, %341 : vector<1x128xf32>
    %c0_i32_133 = arith.constant 0 : i32
    %343 = tpu.memref_slice %arg12[%c0_i32_133] : memref<2x!tpu.dma_semaphore, #tpu.memory_space<semaphore_mem>> -> memref<1x!tpu.dma_semaphore, #tpu.memory_space<semaphore_mem>>
    %344 = tpu.memref_squeeze %343 : memref<1x!tpu.dma_semaphore, #tpu.memory_space<semaphore_mem>> -> memref<!tpu.dma_semaphore, #tpu.memory_space<semaphore_mem>>
    tpu.wait_dma2 semaphore(%344 : memref<!tpu.dma_semaphore, #tpu.memory_space<semaphore_mem>>) src(%arg5 : memref<128x128xf32, #tpu.memory_space<any>>) dst(%arg9 : memref<128x128xf32, #tpu.memory_space<vmem>>)
    %c1_i32_134 = arith.constant 1 : i32
    %345 = tpu.memref_slice %arg12[%c1_i32_134] : memref<2x!tpu.dma_semaphore, #tpu.memory_space<semaphore_mem>> -> memref<1x!tpu.dma_semaphore, #tpu.memory_space<semaphore_mem>>
    %346 = tpu.memref_squeeze %345 : memref<1x!tpu.dma_semaphore, #tpu.memory_space<semaphore_mem>> -> memref<!tpu.dma_semaphore, #tpu.memory_space<semaphore_mem>>
    tpu.wait_dma2 semaphore(%346 : memref<!tpu.dma_semaphore, #tpu.memory_space<semaphore_mem>>) src(%arg6 : memref<1x128xf32, #tpu.memory_space<any>>) dst(%arg10 : memref<1x128xf32, #tpu.memory_space<vmem>>)
    %c0_135 = arith.constant 0 : index
    %c0_136 = arith.constant 0 : index
    %347 = vector.load %arg9[%c0_135, %c0_136] : memref<128x128xf32, #tpu.memory_space<vmem>>, vector<128x128xf32>
    %cst_137 = arith.constant dense<0.000000e+00> : vector<1x128xf32>
    %348 = tpu.matmul %342, %347, %cst_137 {dimension_numbers = #tpu.dot_dimension_numbers<[1], [0], [0], [1], [0, 0, 1, 1], [], []>} : vector<1x128xf32>, vector<128x128xf32>, vector<1x128xf32> -> vector<1x128xf32>
    %c0_138 = arith.constant 0 : index
    %c0_139 = arith.constant 0 : index
    %349 = vector.load %arg10[%c0_138, %c0_139] : memref<1x128xf32, #tpu.memory_space<vmem>>, vector<1x128xf32>
    %350 = arith.addf %348, %349 : vector<1x128xf32>
    %c0_140 = arith.constant 0 : index
    %c0_141 = arith.constant 0 : index
    %351 = vector.load %arg7[%c0_140, %c0_141] : memref<1x128xf32, #tpu.memory_space<vmem>>, vector<1x128xf32>
    tpu.vector_store %arg7[%c0_140, %c0_141], %350 {strides = array<i32>} : memref<1x128xf32, #tpu.memory_space<vmem>>, vector<1x128xf32>,
    return
  }
}

</mosaic_0001>

<bundles_post_ra>
// kernel: _gru_policy_logits.1
= control target key start
LH: loop header
LB: loop body
LE: loop exit
PB: predicated region body
PF: predicated region fallthrough
CT: control target
= control target key end

     0   :  { %13 = vsyncpa [#allocation11], 0  ;;  %s3744_s0 = inlined_call_operand.<no memory space> [shape: s32[1], index: 0, kind: input, shape index: {}]   ;;  %s3745_s1 = inlined_call_operand.vmem [shape: s32[8], index: 1, kind: input, shape index: {}]   ;;  %s3746_s2 = inlined_call_operand.hbm [shape: f32[65,384], index: 2, kind: input, shape index: {}]   ;;  %s3747_s3 = inlined_call_operand.hbm [shape: f32[128,384], index: 3, kind: input, shape index: {}]   ;;  %s3748_s4 = inlined_call_operand.vmem [shape: f32[1,384], index: 4, kind: input, shape index: {}]   ;;  %s3749_s5 = inlined_call_operand.hbm [shape: f32[128,128], index: 5, kind: input, shape index: {}]   ;;  %s3750_s6 = inlined_call_operand.vmem [shape: f32[1,128], index: 6, kind: input, shape index: {}]   ;;  %s3751_s7 = inlined_call_operand.hbm [shape: f32[1,128], index: 7, kind: output, shape index: {}]  }
   0x1   :  { %14 = vsyncpa [#allocation9], 0 }
   0x2   :  { %15 = vsyncpa [#allocation10], 0  ;;  %s24_s26 = sshll.u32 %s3745_s1, 4  ;;  %s25_s26 = int_to_ptr.vmem [resolvable:$true] %s24_s26 }
   0x3   :  { %s2943_s27 = scalar_lea.vmem %s25_s26, 16  ;;  %p2948_p1 = scmp.lt.s32.totalorder %s25_s26, %s25_s26 }
   0x4   :  { %p2944_p0 = scmp.ne.s32.totalorder %s25_s26, %s2943_s27  ;;  %p2949_p2 = scmp.lt.s32.totalorder %s2943_s27, %s2943_s27 }
   0x6   :  { %p2950_p3 = por %p2949_p2, %p2948_p1 }
   0x8   :  { %p2951_p4 = pnand %p2950_p3, %p2944_p0 }
   0xa   :  { %2954 = shalt.err (!%p2951_p4)
}
   0xb   :  { %s3217_s28 = smov [#allocation8]   ;;  %s3218_s29 = smov [#allocation12]  }
   0xc   :  { %27 = dma.vmem_to_smem %s25_s26, 16, %s3217_s28, [#allocation11]  }
   0xd   :  { %s33_s30 = sshll.u32 %s3218_s29, 4  ;;  %s34_s30 = int_to_ptr.vmem [resolvable:$true] %s33_s30 }
   0xe   :  { %s2963_s8 = scalar_lea.vmem %s34_s30, 6144  ;;  %p2968_p6 = scmp.lt.s32.totalorder %s34_s30, %s34_s30 }
   0xf   :  { %p2964_p5 = scmp.ne.s32.totalorder %s34_s30, %s2963_s8  ;;  %p2969_p7 = scmp.lt.s32.totalorder %s2963_s8, %s2963_s8 }
  0x11   :  { %p2970_p8 = por %p2969_p7, %p2968_p6 }
  0x13   :  { %p2971_p9 = pnand %p2970_p8, %p2964_p5 }
  0x15   :  { %2974 = shalt.err (!%p2971_p9)
}
  0x16   :  { %s3219_s1 = smov 384   ;;  %s3220_s9 = smov 24  }
  0x17   :  { %39 = dma.hbm_to_vmem [thread:$0]  %s3747_s3, 6144, %s34_s30, [#allocation9], %s3219_s1, %s3219_s1, %s3220_s9  }
  0x18   :  { %3191 = dma.done.wait [#allocation11], 16  }
  0x19   :  { %3192 = vsyncadd [#allocation11], 4294967280 }
  0x1a   :  { %3193 = dma.done.wait [#allocation9], 6144  }
  0x1b   :  { %3194 = vsyncadd [#allocation9], 4294961152 }
  0x1c   :  { %48 = sfence }
  0x1d   :  { %v79_v0 = vld [vmem:[%s3750_s6] sm:$0x1]  ;;  %s3221_s14 = smov [#allocation3]  }
  0x1e   :  { %s56_s15 = sshll.u32 %s3221_s14, 4  ;;  %80 = vst [vmem:[#allocation4] sm:$0x1] %v79_v0  ;;  %s57_s15 = int_to_ptr.vmem [resolvable:$true] %s56_s15 }
  0x1f   :  { %s2983_s16 = scalar_lea.vmem %s57_s15, 2048  ;;  %p2988_p11 = scmp.lt.s32.totalorder %s57_s15, %s57_s15 }
  0x20   :  { %p2984_p10 = scmp.ne.s32.totalorder %s57_s15, %s2983_s16  ;;  %p2989_p12 = scmp.lt.s32.totalorder %s2983_s16, %s2983_s16 }
  0x22   :  { %p2990_p13 = por %p2989_p12, %p2988_p11 }
  0x24   :  { %p2991_p0 = pnand %p2990_p13, %p2984_p10 }
  0x26   :  { %2994 = shalt.err (!%p2991_p0)  }
  0x27   :  { %59 = dma.hbm_to_vmem [thread:$0]  %s3749_s5, 2048, %s57_s15, [#allocation6] }
  0x28   :  { %106 = vsyncadd [#allocation6 + $0x1], 16  ;;  %s107_s18 = sld [smem:[#allocation8]]  ;;  %s3222_s19 = smov [#allocation2]   ;;  %v3291_v1 = vld [vmem:[%s3748_s4] sm:$0x7] }
  0x29   :  { %s115_s20 = sshll.u32 %s3222_s19, 4  ;;  %s3295_s22 = sld [smem:[#allocation8 + $0x1]]  ;;  %s3293_s20 = int_to_ptr.vmem [resolvable:$true] %s115_s20 }
  0x2a   :  { %s3223_s23 = smov [#allocation2 + $0x1]   ;;  %s3297_s25 = sld [smem:[#allocation8 + $0x2]] }
  0x2b   :  { %s129_s24 = sshll.u32 %s3223_s23, 4  ;;  %s3224_s28 = smov [#allocation2 + $0x2]   ;;  %s3299_s24 = int_to_ptr.vmem [resolvable:$true] %s129_s24 }
  0x2c   :  { %s143_s29 = sshll.u32 %s3224_s28, 4  ;;  %s3303_s4 = sld [smem:[#allocation8 + $0x3]]  ;;  %s3301_s29 = int_to_ptr.vmem [resolvable:$true] %s143_s29 }
  0x2d   :  { %s3313_s3 = scalar_lea.hbm %s3746_s2, 3456 }
  0x2e   :  { %s108_s5 = sshrl.u32 %s107_s18, 3  ;;  %s109_s26 = sand.u32 7, %s107_s18  }
  0x2f   :  { %s110_s27 = smul.u32 24, %s108_s5  ;;  %s120_s8 = sshrl.u32 %s3295_s22, 3 }
  0x30   :  { %s121_s9 = sand.u32 7, %s3295_s22   ;;  %s122_s13 = smul.u32 24, %s120_s8 }
  0x31   :  { %s111_s30 = sadd.s32 %s110_s27, %s109_s26 }
  0x32   :  { %s2375_s1 = sshll.u32 %s111_s30, 4 }
  0x33   :  { %s113_s12 = scalar_lea.hbm %s3746_s2, %s2375_s1 }
  0x34   :  { %s2995_s14 = scalar_lea.hbm %s113_s12, 48  ;;  %p2998_p2 = scmp.lt.s32.totalorder %s113_s12, %s3746_s2 }
  0x35   :  { %p2996_p1 = scmp.ne.s32.totalorder %s113_s12, %s2995_s14  ;;  %p2999_p3 = scmp.lt.s32.totalorder %s3313_s3, %s2995_s14 }
  0x37   :  { %p3000_p4 = por %p2999_p3, %p2998_p2 }
  0x39   :  { %p3001_p5 = pnand %p3000_p4, %p2996_p1 }
  0x3b   :  { %3004 = shalt.err (!%p3001_p5)  }
  0x3c   :  { %s3005_s19 = scalar_lea.vmem %s3293_s20, 48  ;;  %s3322_s6 = scalar_lea.vmem %s3293_s20, 384 }
  0x3d   :  { %p3006_p6 = scmp.ne.s32.totalorder %s3293_s20, %s3005_s19  ;;  %p3010_p7 = scmp.lt.s32.totalorder %s3293_s20, %s3293_s20 }
  0x3e   :  { %p3011_p8 = scmp.lt.s32.totalorder %s3322_s6, %s3005_s19 }
  0x40   :  { %p3012_p9 = por %p3011_p8, %p3010_p7 }
  0x42   :  { %p3013_p10 = pnand %p3012_p9, %p3006_p6 }
  0x44   :  { %3016 = shalt.err (!%p3013_p10)  }
  0x45   :  { %s3752_s21 = smov 128   ;;  %s3226_s22 = smov 1  }
  0x46   :  { %118 = dma.hbm_to_vmem [thread:$0]  %s113_s12, 48, %s3293_s20, [#allocation5], %s3752_s21, %s3752_s21, %s3226_s22 }
  0x47   :  { %s123_s23 = sadd.s32 %s122_s13, %s121_s9  ;;  %s134_s5 = sshrl.u32 %s3297_s25, 3 }
  0x48   :  { %s2377_s26 = sshll.u32 %s123_s23, 4  ;;  %s135_s27 = sand.u32 7, %s3297_s25  }
  0x49   :  { %s125_s8 = scalar_lea.hbm %s3746_s2, %s2377_s26  ;;  %s136_s1 = smul.u32 24, %s134_s5 }
  0x4a   :  { %s3017_s10 = scalar_lea.hbm %s125_s8, 48  ;;  %p3020_p12 = scmp.lt.s32.totalorder %s125_s8, %s3746_s2 }
  0x4b   :  { %p3018_p11 = scmp.ne.s32.totalorder %s125_s8, %s3017_s10  ;;  %p3021_p13 = scmp.lt.s32.totalorder %s3313_s3, %s3017_s10 }
  0x4d   :  { %p3022_p0 = por %p3021_p13, %p3020_p12 }
  0x4f   :  { %p3023_p1 = pnand %p3022_p0, %p3018_p11 }
  0x51   :  { %3026 = shalt.err (!%p3023_p1)  }
  0x52   :  { %s3027_s25 = scalar_lea.vmem %s3299_s24, 48  ;;  %p3032_p3 = scmp.lt.s32.totalorder %s3299_s24, %s3293_s20 }
  0x53   :  { %p3028_p2 = scmp.ne.s32.totalorder %s3299_s24, %s3027_s25  ;;  %p3033_p4 = scmp.lt.s32.totalorder %s3322_s6, %s3027_s25 }
  0x55   :  { %p3034_p5 = por %p3033_p4, %p3032_p3 }
  0x57   :  { %p3035_p6 = pnand %p3034_p5, %p3028_p2 }
  0x59   :  { %3038 = shalt.err (!%p3035_p6)  }
  0x5a   :  { %132 = dma.hbm_to_vmem [thread:$0]  %s125_s8, 48, %s3299_s24, [#allocation5 + $0x1], %s3752_s21, %s3752_s21, %s3226_s22 }
  0x5b   :  { %s137_s9 = sadd.s32 %s136_s1, %s135_s27  ;;  %s148_s12 = sshrl.u32 %s3303_s4, 3 }
  0x5c   :  { %s2379_s13 = sshll.u32 %s137_s9, 4  ;;  %s149_s15 = sand.u32 7, %s3303_s4  }
  0x5d   :  { %s139_s18 = scalar_lea.hbm %s3746_s2, %s2379_s13  ;;  %s150_s19 = smul.u32 24, %s148_s12 }
  0x5e   :  { %s3039_s23 = scalar_lea.hbm %s139_s18, 48  ;;  %p3042_p8 = scmp.lt.s32.totalorder %s139_s18, %s3746_s2 }
  0x5f   :  { %p3040_p7 = scmp.ne.s32.totalorder %s139_s18, %s3039_s23  ;;  %p3043_p9 = scmp.lt.s32.totalorder %s3313_s3, %s3039_s23 }
  0x61   :  { %p3044_p10 = por %p3043_p9, %p3042_p8 }
  0x63   :  { %p3045_p11 = pnand %p3044_p10, %p3040_p7 }
  0x65   :  { %3048 = shalt.err (!%p3045_p11)  }
  0x66   :  { %s3049_s24 = scalar_lea.vmem %s3301_s29, 48  ;;  %p3054_p13 = scmp.lt.s32.totalorder %s3301_s29, %s3293_s20 }
  0x67   :  { %p3050_p12 = scmp.ne.s32.totalorder %s3301_s29, %s3049_s24  ;;  %p3055_p0 = scmp.lt.s32.totalorder %s3322_s6, %s3049_s24 }
  0x69   :  { %p3056_p1 = por %p3055_p0, %p3054_p13 }
  0x6b   :  { %p3057_p2 = pnand %p3056_p1, %p3050_p12 }
  0x6d   :  { %3060 = shalt.err (!%p3057_p2)  }
  0x6e   :  { %146 = dma.hbm_to_vmem [thread:$0]  %s139_s18, 48, %s3301_s29, [#allocation5 + $0x2], %s3752_s21, %s3752_s21, %s3226_s22 }
  0x6f   :  { %s151_s4 = sadd.s32 %s150_s19, %s149_s15  ;;  %s3227_s28 = smov [#allocation2 + $0x3]  }
  0x70   :  { %s2381_s27 = sshll.u32 %s151_s4, 4  ;;  %s157_s30 = sshll.u32 %s3227_s28, 4  ;;  %s158_s30 = int_to_ptr.vmem [resolvable:$true] %s157_s30 }
  0x71   :  { %s153_s10 = scalar_lea.hbm %s3746_s2, %s2381_s27 }
  0x72   :  { %s3061_s11 = scalar_lea.hbm %s153_s10, 48  ;;  %p3064_p4 = scmp.lt.s32.totalorder %s153_s10, %s3746_s2 }
  0x73   :  { %p3062_p3 = scmp.ne.s32.totalorder %s153_s10, %s3061_s11  ;;  %p3065_p5 = scmp.lt.s32.totalorder %s3313_s3, %s3061_s11 }
  0x75   :  { %p3066_p6 = por %p3065_p5, %p3064_p4 }
  0x77   :  { %p3067_p7 = pnand %p3066_p6, %p3062_p3 }
  0x79   :  { %3070 = shalt.err (!%p3067_p7)  }
  0x7a   :  { %s3071_s29 = scalar_lea.vmem %s158_s30, 48  ;;  %p3076_p9 = scmp.lt.s32.totalorder %s158_s30, %s3293_s20 }
  0x7b   :  { %p3072_p8 = scmp.ne.s32.totalorder %s158_s30, %s3071_s29  ;;  %p3077_p10 = scmp.lt.s32.totalorder %s3322_s6, %s3071_s29 }
  0x7d   :  { %p3078_p11 = por %p3077_p10, %p3076_p9 }
  0x7f   :  { %p3079_p12 = pnand %p3078_p11, %p3072_p8 }
  0x81   :  { %3082 = shalt.err (!%p3079_p12)  }
  0x82   :  { %160 = dma.hbm_to_vmem [thread:$0]  %s153_s10, 48, %s158_s30, [#allocation5 + $0x3], %s3752_s21, %s3752_s21, %s3226_s22 }
  0x83   :  { %s2382_s9 = sld [smem:[#allocation8 + $0x4]]  ;;  %s3228_s12 = smov [#allocation2 + $0x4]  }
  0x84   :  { %s171_s13 = sshll.u32 %s3228_s12, 4  ;;  %s2384_s15 = sld [smem:[#allocation8 + $0x5]]  ;;  %s3379_s13 = int_to_ptr.vmem [resolvable:$true] %s171_s13 }
  0x85   :  { %s3229_s16 = smov [#allocation2 + $0x5]   ;;  %s3381_s18 = sld [smem:[#allocation8 + $0x6]] }
  0x86   :  { %s185_s17 = sshll.u32 %s3229_s16, 4  ;;  %s3230_s19 = smov [#allocation2 + $0x6]   ;;  %s3383_s17 = int_to_ptr.vmem [resolvable:$true] %s185_s17 }
  0x87   :  { %s3385_s23 = sshll.u32 %s3230_s19, 4  ;;  %s3387_s5 = sld [smem:[#allocation8 + $0x7]]  ;;  %s200_s23 = int_to_ptr.vmem [resolvable:$true] %s3385_s23 }
  0x89   :  { %s162_s26 = sshrl.u32 %s2382_s9, 3  ;;  %s163_s24 = sand.u32 7, %s2382_s9  }
  0x8a   :  { %s164_s4 = smul.u32 24, %s162_s26  ;;  %s176_s27 = sshrl.u32 %s2384_s15, 3 }
  0x8b   :  { %s177_s28 = sand.u32 7, %s2384_s15   ;;  %s178_s30 = smul.u32 24, %s176_s27 }
  0x8c   :  { %s165_s8 = sadd.s32 %s164_s4, %s163_s24  ;;  %s190_s1 = sshrl.u32 %s3381_s18, 3 }
  0x8d   :  { %s2383_s10 = sshll.u32 %s165_s8, 4  ;;  %s179_s11 = sadd.s32 %s178_s30, %s177_s28 }
  0x8e   :  { %s167_s29 = scalar_lea.hbm %s3746_s2, %s2383_s10  ;;  %s2385_s12 = sshll.u32 %s179_s11, 4 }
  0x8f   :  { %s3083_s16 = scalar_lea.hbm %s167_s29, 48  ;;  %p3086_p0 = scmp.lt.s32.totalorder %s167_s29, %s3746_s2 }
  0x90   :  { %p3084_p13 = scmp.ne.s32.totalorder %s167_s29, %s3083_s16  ;;  %p3087_p1 = scmp.lt.s32.totalorder %s3313_s3, %s3083_s16 }
  0x92   :  { %p3088_p2 = por %p3087_p1, %p3086_p0 }
  0x94   :  { %p3089_p3 = pnand %p3088_p2, %p3084_p13 }
  0x96   :  { %3092 = shalt.err (!%p3089_p3)  }
  0x97   :  { %s3093_s9 = scalar_lea.vmem %s3379_s13, 48  ;;  %p3098_p5 = scmp.lt.s32.totalorder %s3379_s13, %s3293_s20 }
  0x98   :  { %p3094_p4 = scmp.ne.s32.totalorder %s3379_s13, %s3093_s9  ;;  %p3099_p6 = scmp.lt.s32.totalorder %s3322_s6, %s3093_s9 }
  0x9a   :  { %p3100_p7 = por %p3099_p6, %p3098_p5 }
  0x9c   :  { %p3101_p8 = pnand %p3100_p7, %p3094_p4 }
  0x9e   :  { %3104 = shalt.err (!%p3101_p8)  }
  0x9f   :  { %s3754_s15 = smov 128   ;;  %s181_s24 = scalar_lea.hbm %s3746_s2, %s2385_s12 }
  0xa0   :  { %174 = dma.hbm_to_vmem [thread:$0]  %s167_s29, 48, %s3379_s13, [#allocation5 + $0x4], %s3754_s15, %s3754_s15, %s3226_s22 }
  0xa1   :  { %s191_s4 = sand.u32 7, %s3381_s18   ;;  %s3105_s27 = scalar_lea.hbm %s181_s24, 48 }
  0xa2   :  { %p3106_p9 = scmp.ne.s32.totalorder %s181_s24, %s3105_s27  ;;  %p3108_p10 = scmp.lt.s32.totalorder %s181_s24, %s3746_s2 }
  0xa3   :  { %p3109_p11 = scmp.lt.s32.totalorder %s3313_s3, %s3105_s27 }
  0xa5   :  { %p3110_p12 = por %p3109_p11, %p3108_p10 }
  0xa7   :  { %p3111_p13 = pnand %p3110_p12, %p3106_p9 }
  0xa9   :  { %3114 = shalt.err (!%p3111_p13)  }
  0xaa   :  { %s3115_s13 = scalar_lea.vmem %s3383_s17, 48  ;;  %p3120_p1 = scmp.lt.s32.totalorder %s3383_s17, %s3293_s20 }
  0xab   :  { %p3116_p0 = scmp.ne.s32.totalorder %s3383_s17, %s3115_s13  ;;  %p3121_p2 = scmp.lt.s32.totalorder %s3322_s6, %s3115_s13 }
  0xad   :  { %p3122_p3 = por %p3121_p2, %p3120_p1 }
  0xaf   :  { %p3123_p4 = pnand %p3122_p3, %p3116_p0 }
  0xb1   :  { %3126 = shalt.err (!%p3123_p4)  }
  0xb2   :  { %188 = dma.hbm_to_vmem [thread:$0]  %s181_s24, 48, %s3383_s17, [#allocation5 + $0x5], %s3754_s15, %s3754_s15, %s3226_s22 }
  0xb3   :  { %s192_s8 = smul.u32 24, %s190_s1  ;;  %s204_s10 = sshrl.u32 %s3387_s5, 3 }
  0xb4   :  { %s205_s11 = sand.u32 7, %s3387_s5   ;;  %s206_s25 = smul.u32 24, %s204_s10 }
  0xb5   :  { %s193_s14 = sadd.s32 %s192_s8, %s191_s4 }
  0xb6   :  { %s2387_s29 = sshll.u32 %s193_s14, 4  ;;  %s207_s9 = sadd.s32 %s206_s25, %s205_s11 }
  0xb7   :  { %s195_s19 = scalar_lea.hbm %s3746_s2, %s2387_s29 }
  0xb8   :  { %s3127_s21 = scalar_lea.hbm %s195_s19, 48  ;;  %p3130_p6 = scmp.lt.s32.totalorder %s195_s19, %s3746_s2 }
  0xb9   :  { %p3128_p5 = scmp.ne.s32.totalorder %s195_s19, %s3127_s21  ;;  %p3131_p7 = scmp.lt.s32.totalorder %s3313_s3, %s3127_s21 }
  0xbb   :  { %p3132_p8 = por %p3131_p7, %p3130_p6 }
  0xbd   :  { %p3133_p9 = pnand %p3132_p8, %p3128_p5 }
  0xbf   :  { %3136 = shalt.err (!%p3133_p9)  }
  0xc0   :  { %s3137_s17 = scalar_lea.vmem %s200_s23, 48  ;;  %p3142_p11 = scmp.lt.s32.totalorder %s200_s23, %s3293_s20 }
  0xc1   :  { %p3138_p10 = scmp.ne.s32.totalorder %s200_s23, %s3137_s17  ;;  %p3143_p12 = scmp.lt.s32.totalorder %s3322_s6, %s3137_s17 }
  0xc3   :  { %p3144_p13 = por %p3143_p12, %p3142_p11 }
  0xc5   :  { %p3145_p0 = pnand %p3144_p13, %p3138_p10 }
  0xc7   :  { %3148 = shalt.err (!%p3145_p0)  }
  0xc8   :  { %202 = dma.hbm_to_vmem [thread:$0]  %s195_s19, 48, %s200_s23, [#allocation5 + $0x6], %s3754_s15, %s3754_s15, %s3226_s22 }
  0xc9   :  { %s2389_s18 = sshll.u32 %s207_s9, 4  ;;  %s3231_s5 = smov [#allocation2 + $0x7]  }
  0xca   :  { %s213_s1 = sshll.u32 %s3231_s5, 4  ;;  %s209_s28 = scalar_lea.hbm %s3746_s2, %s2389_s18  ;;  %s214_s1 = int_to_ptr.vmem [resolvable:$true] %s213_s1 }
  0xcb   :  { %s3149_s30 = scalar_lea.hbm %s209_s28, 48  ;;  %p3152_p2 = scmp.lt.s32.totalorder %s209_s28, %s3746_s2 }
  0xcc   :  { %p3150_p1 = scmp.ne.s32.totalorder %s209_s28, %s3149_s30  ;;  %p3153_p3 = scmp.lt.s32.totalorder %s3313_s3, %s3149_s30 }
  0xce   :  { %p3154_p4 = por %p3153_p3, %p3152_p2 }
  0xd0   :  { %p3155_p5 = pnand %p3154_p4, %p3150_p1 }
  0xd2   :  { %3158 = shalt.err (!%p3155_p5)  }
  0xd3   :  { %s3159_s10 = scalar_lea.vmem %s214_s1, 48  ;;  %p3164_p7 = scmp.lt.s32.totalorder %s214_s1, %s3293_s20 }
  0xd4   :  { %p3160_p6 = scmp.ne.s32.totalorder %s214_s1, %s3159_s10  ;;  %p3165_p8 = scmp.lt.s32.totalorder %s3322_s6, %s3159_s10 }
  0xd6   :  { %p3166_p9 = por %p3165_p8, %p3164_p7 }
  0xd8   :  { %p3167_p10 = pnand %p3166_p9, %p3160_p6 }
  0xda   :  { %3170 = shalt.err (!%p3167_p10)  }
  0xdb   :  { %216 = dma.hbm_to_vmem [thread:$0]  %s209_s28, 48, %s214_s1, [#allocation5 + $0x7], %s3754_s15, %s3754_s15, %s3226_s22 }
  0xdc   :  { %3195 = dma.done.wait [#allocation5], 48 }
  0xdd   :  { %3196 = vsyncadd [#allocation5], 4294967248  ;;  %v3232_v2 = vmov 0.0   ;;  %vm3233_vm0 = vmmov 0   ;;  %v269_v3 = vld [vmem:[#allocation12 + $0x170] sm:$0xff]  ;;  %v268_v4 = vld [vmem:[#allocation12 + $0x168] sm:$0xff]  ;;  %v272_v51 = vlaneseq }
  0xde   :  { %351 = vmatprep.mubr.f32.mxu0 %v3232_v2  ;;  %2561 = vmatprep.subr.mxu1 %v3232_v2  ;;  %v266_v5 = vld [vmem:[#allocation12 + $0x158] sm:$0xff]  ;;  %v265_v6 = vld [vmem:[#allocation12 + $0x150] sm:$0xff]  ;;  %v263_v7 = vld [vmem:[#allocation12 + $0x140] sm:$0xff]  ;;  %v3234_v55 = vmov 1966171168   ;;  %p466_p11 = scmp.gt.s32.totalorder %s3744_s0, 0 }
  0xdf   :  { %2593 = vmatprep.mubr.msk.f32.mxu1 %vm3233_vm0, %v3232_v2  ;;  %287 = vmatprep.subr.mxu0 %v269_v3  ;;  %v262_v8 = vld [vmem:[#allocation12 + $0x138] sm:$0xff]  ;;  %v260_v9 = vld [vmem:[#allocation12 + $0x128] sm:$0xff]  ;;  %v259_v10 = vld [vmem:[#allocation12 + $0x120] sm:$0xff]  ;;  %v273_v52 = vshrl.u32 %v272_v51, 7  ;;  %v432_v56 = vunpack.c.l.s4 %v3234_v55 }
  0xe0   :  { %288 = vmatpush1.msra.mxu0 %v268_v4  ;;  %v257_v11 = vld [vmem:[#allocation12 + $0x110] sm:$0xff]  ;;  %v256_v12 = vld [vmem:[#allocation12 + $0x108] sm:$0xff]  ;;  %v254_v13 = vld [vmem:[#allocation12 + $0xf8] sm:$0xff]  ;;  %s467_s3 = scalar_select %p466_p11, 1, 0 }
  0xe1   :  { %289 = vmatprep.subr.mxu0 %v266_v5  ;;  %v253_v14 = vld [vmem:[#allocation12 + $0xf0] sm:$0xff]  ;;  %v251_v15 = vld [vmem:[#allocation12 + $0xe0] sm:$0xff]  ;;  %v270_v16 = vld [vmem:[#allocation12 + $0x178] sm:$0xff]  ;;  %v274_v53 = vsub.s32 0, %v273_v52  ;;  %v278_v54 = vsub.s32 1, %v273_v52  ;;  %v433_v59 = vunpack.c.0.s8 %v432_v56 }
  0xe2   :  { %290 = vmatpush1.msra.mxu0 %v265_v6  ;;  %v250_v17 = vld [vmem:[#allocation12 + $0xd8] sm:$0xff]  ;;  %2562 = vmatpush3.msra.mxu1 %v270_v16  ;;  %v267_v18 = vld [vmem:[#allocation12 + $0x160] sm:$0xff]  ;;  %v248_v19 = vld [vmem:[#allocation12 + $0xc8] sm:$0xff]  ;;  %s468_s6 = scvt.s32.f32 %s467_s3 }
  0xe3   :  { %291 = vmatprep.subr.mxu0 %v263_v7  ;;  %2563 = vmatprep.subr.mxu1 %v3232_v2  ;;  %v264_v20 = vld [vmem:[#allocation12 + $0x148] sm:$0xff]  ;;  %v247_v21 = vld [vmem:[#allocation12 + $0xc0] sm:$0xff]  ;;  %v245_v22 = vld [vmem:[#allocation12 + $0xb0] sm:$0xff]  ;;  %v3474_v57 = vrot.slane %v3291_v1, %v274_v53  ;;  %v3477_v58 = vrot.slane %v3291_v1, %v278_v54  ;;  %v3481_v0 = vsub.s32 %v433_v59, %v273_v52 }
  0xe4   :  { %292 = vmatpush1.msra.mxu0 %v262_v8  ;;  %2564 = vmatpush3.msra.mxu1 %v267_v18  ;;  %v261_v23 = vld [vmem:[#allocation12 + $0x130] sm:$0xff]  ;;  %v244_v24 = vld [vmem:[#allocation12 + $0xa8] sm:$0xff]  ;;  %v242_v25 = vld [vmem:[#allocation12 + $0x98] sm:$0xff]  ;;  %s471_s22 = ssub.f32 1.0, %s468_s6 }
  0xe5   :  { %293 = vmatprep.subr.mxu0 %v260_v9  ;;  %2565 = vmatprep.subr.mxu1 %v3232_v2  ;;  %v258_v26 = vld [vmem:[#allocation12 + $0x118] sm:$0xff]  ;;  %v241_v27 = vld [vmem:[#allocation12 + $0x90] sm:$0xff]  ;;  %v239_v28 = vld [vmem:[#allocation12 + $0x80] sm:$0xff] }
  0xe6   :  { %294 = vmatpush1.msra.mxu0 %v259_v10  ;;  %2566 = vmatpush3.msra.mxu1 %v264_v20  ;;  %v255_v29 = vld [vmem:[#allocation12 + $0x100] sm:$0xff]  ;;  %v238_v30 = vld [vmem:[#allocation12 + $0x78] sm:$0xff]  ;;  %v236_v31 = vld [vmem:[#allocation12 + $0x68] sm:$0xff] }
  0xe7   :  { %295 = vmatprep.subr.mxu0 %v257_v11  ;;  %2567 = vmatprep.subr.mxu1 %v3232_v2  ;;  %v252_v32 = vld [vmem:[#allocation12 + $0xe8] sm:$0xff]  ;;  %v235_v33 = vld [vmem:[#allocation12 + $0x60] sm:$0xff]  ;;  %v233_v34 = vld [vmem:[#allocation12 + $0x50] sm:$0xff] }
  0xe8   :  { %296 = vmatpush1.msra.mxu0 %v256_v12  ;;  %2568 = vmatpush3.msra.mxu1 %v261_v23  ;;  %v249_v35 = vld [vmem:[#allocation12 + $0xd0] sm:$0xff]  ;;  %v232_v36 = vld [vmem:[#allocation12 + $0x48] sm:$0xff]  ;;  %v230_v37 = vld [vmem:[#allocation12 + $0x38] sm:$0xff]  ;;  %v472_v23 = vstv %s471_s22 }
  0xe9   :  { %297 = vmatprep.subr.mxu0 %v254_v13  ;;  %2569 = vmatprep.subr.mxu1 %v3232_v2  ;;  %v246_v38 = vld [vmem:[#allocation12 + $0xb8] sm:$0xff]  ;;  %v229_v39 = vld [vmem:[#allocation12 + $0x30] sm:$0xff]  ;;  %v227_v40 = vld [vmem:[#allocation12 + $0x20] sm:$0xff]  ;;  %v282_v13 = vsub.s32 2, %v273_v52 }
  0xea   :  { %298 = vmatpush1.msra.mxu0 %v253_v14  ;;  %2570 = vmatpush3.msra.mxu1 %v258_v26  ;;  %v243_v41 = vld [vmem:[#allocation12 + $0xa0] sm:$0xff]  ;;  %v226_v42 = vld [vmem:[#allocation12 + $0x18] sm:$0xff]  ;;  %v224_v43 = vld [vmem:[#allocation12 + $0x8] sm:$0xff] }
  0xeb   :  { %299 = vmatprep.subr.mxu0 %v251_v15  ;;  %2571 = vmatprep.subr.mxu1 %v3232_v2  ;;  %v240_v44 = vld [vmem:[#allocation12 + $0x88] sm:$0xff]  ;;  %v223_v45 = vld [vmem:[#allocation12] sm:$0xff]  ;;  %v237_v46 = vld [vmem:[#allocation12 + $0x70] sm:$0xff]  ;;  %v3486_v14 = vrot.slane %v3291_v1, %v282_v13 }
  0xec   :  { %300 = vmatpush1.msra.mxu0 %v250_v17  ;;  %2572 = vmatpush3.msra.mxu1 %v255_v29  ;;  %v234_v47 = vld [vmem:[#allocation12 + $0x58] sm:$0xff]  ;;  %v231_v48 = vld [vmem:[#allocation12 + $0x40] sm:$0xff]  ;;  %v228_v49 = vld [vmem:[#allocation12 + $0x28] sm:$0xff] }
  0xed   :  { %301 = vmatprep.subr.mxu0 %v248_v19  ;;  %2573 = vmatprep.subr.mxu1 %v3232_v2  ;;  %v225_v50 = vld [vmem:[#allocation12 + $0x10] sm:$0xff] }
  0xee   :  { %302 = vmatpush1.msra.mxu0 %v247_v21  ;;  %2574 = vmatpush3.msra.mxu1 %v252_v32  ;;  %v222_v5 = vld [vmem:[#allocation2] ss:$8 sm:$0x7] }
  0xef   :  { %303 = vmatprep.subr.mxu0 %v245_v22  ;;  %2575 = vmatprep.subr.mxu1 %v3232_v2  ;;  %v455_v16 = vrot.slane %v222_v5, 2 }
  0xf0   :  { %304 = vmatpush1.msra.mxu0 %v244_v24  ;;  %2576 = vmatpush3.msra.mxu1 %v249_v35 }
  0xf1   :  { %305 = vmatprep.subr.mxu0 %v242_v25  ;;  %2577 = vmatprep.subr.mxu1 %v3232_v2  ;;  %v469_v25 = vstv %s468_s6 }
  0xf2   :  { %306 = vmatpush1.msra.mxu0 %v241_v27  ;;  %2578 = vmatpush3.msra.mxu1 %v246_v38  ;;  %v473_v27 = vmul.f32 0.0, %v472_v23 }
  0xf3   :  { %307 = vmatprep.subr.mxu0 %v239_v28  ;;  %2579 = vmatprep.subr.mxu1 %v3232_v2 }
  0xf4   :  { %308 = vmatpush1.msra.mxu0 %v238_v30  ;;  %2580 = vmatpush3.msra.mxu1 %v243_v41 }
  0xf5   :  { %309 = vmatprep.subr.mxu0 %v236_v31  ;;  %2581 = vmatprep.subr.mxu1 %v3232_v2 }
  0xf6   :  { %310 = vmatpush1.msra.mxu0 %v235_v33  ;;  %2582 = vmatpush3.msra.mxu1 %v240_v44 }
  0xf7   :  { %311 = vmatprep.subr.mxu0 %v233_v34  ;;  %2583 = vmatprep.subr.mxu1 %v3232_v2 }
  0xf8   :  { %312 = vmatpush1.msra.mxu0 %v232_v36  ;;  %2584 = vmatpush3.msra.mxu1 %v237_v46 }
  0xf9   :  { %313 = vmatprep.subr.mxu0 %v230_v37  ;;  %2585 = vmatprep.subr.mxu1 %v3232_v2 }
  0xfa   :  { %314 = vmatpush1.msra.mxu0 %v229_v39  ;;  %2586 = vmatpush3.msra.mxu1 %v234_v47 }
  0xfb   :  { %315 = vmatprep.subr.mxu0 %v227_v40  ;;  %2587 = vmatprep.subr.mxu1 %v3232_v2 }
  0xfc   :  { %316 = vmatpush1.msra.mxu0 %v226_v42  ;;  %2588 = vmatpush3.msra.mxu1 %v231_v48 }
  0xfd   :  { %317 = vmatprep.subr.mxu0 %v224_v43  ;;  %2589 = vmatprep.subr.mxu1 %v3232_v2 }
  0xfe   :  { %318 = vmatpush1.msra.mxu0 %v223_v45  ;;  %2590 = vmatpush3.msra.mxu1 %v228_v49 }
  0xff   :  { %352 = vmatmul.mubr.f32.vlgmr.msra.gmra.mxu0 %v3232_v2  ;;  %2591 = vmatprep.subr.mxu1 %v3232_v2 }
 0x100   :  { %2592 = vmatpush3.msra.mxu1 %v225_v50 }
 0x101   :  { %2594 = vmatmul.mubr.f32.vlgmr.msra.gmra.mxu1 %v3232_v2 }
 0x1bf   :  { %v353_v60 = vpop.f32.mrf.mxu0 }
 0x1c0   :  { %v354_v62 = vadd.f32 %v353_v60, %v3474_v57 }
 0x1c1   :  { %v355_v61 = vpop.f32.mrf.mxu0  ;;  %v424_v7 = vpop.f32.mrf.mxu1 }
 0x1c2   :  { %v356_v63 = vadd.f32 %v355_v61, %v3477_v58  ;;  %v425_v15 = vadd.f32 %v424_v7, %v3486_v14 }
 0x1c3   :  { %v2595_v9 = vpop.f32.mrf.mxu1 }
 0x1c4   :  { %v430_v3 = vcombine.low %v354_v62, %v356_v63 }
 0x1c6   :  { %v437_v4 = vrot.slane %v430_v3, %v3481_v0 }
 0x1c8   :  { %v444_v6 = vrot.slane %v437_v4, %v3481_v0 }
 0x1ca   :  { %v446_v8 = vadd.f32 %v444_v6, %v222_v5 }
 0x1cc   :  { %v2390_v10 = vmul.f32 -1.442695, %v446_v8 }
 0x1ce   :  { %2895 = vpow2.f32 %v2390_v10 }
 0x1db   :  { %v2896_v11 = vpop.eup %2895 }
 0x1dc   :  { %v450_v12 = vadd.f32 1.0, %v2896_v11 }
 0x1de   :  { %2897 = vrcp.f32 %v450_v12 }
 0x1eb   :  { %v2898_v17 = vpop.eup %2897 }
 0x1ec   :  { %v453_v18 = vmul.f32 %v2898_v17, %v425_v15  ;;  %v460_v20 = vrot.slane %v2898_v17, 1 }
 0x1ee   :  { %v457_v19 = vadd.f32 %v455_v16, %v453_v18  ;;  %v462_v21 = vsub.f32 1.0, %v460_v20  ;;  %v464_v24 = vmul.f32 0.0, %v460_v20 }
 0x1f0   :  { %2899 = vtanh.f32 %v457_v19 }
 0x1fd   :  { %v2900_v22 = vpop.eup %2899 }
 0x1fe   :  { %v463_v1 = vmul.f32 %v2900_v22, %v462_v21 }
 0x200   :  { %v465_v26 = vadd.f32 %v464_v24, %v463_v1 }
 0x202   :  { %v470_v28 = vmul.f32 %v469_v25, %v465_v26 }
 0x204   :  { %v3492_v29 = vadd.f32 %v473_v27, %v470_v28 }
 0x205   :  { %3197 = dma.done.wait [#allocation5 + $0x1], 48 }
 0x206   :  { %3198 = vsyncadd [#allocation5 + $0x1], 4294967248  ;;  %591 = vmatprep.mubr.f32.mxu0 %v3232_v2  ;;  %2596 = vmatprep.subr.mxu1 %v3232_v2  ;;  %v525_v30 = vld [vmem:[#allocation12 + $0x170] sm:$0xff]  ;;  %v524_v31 = vld [vmem:[#allocation12 + $0x168] sm:$0xff]  ;;  %p706_p12 = scmp.gt.s32.totalorder %s3744_s0, 1 }
 0x207   :  { %2628 = vmatprep.mubr.msk.f32.mxu1 %vm3233_vm0, %v3232_v2  ;;  %v522_v32 = vld [vmem:[#allocation12 + $0x158] sm:$0xff]  ;;  %527 = vmatprep.subr.mxu0 %v525_v30  ;;  %v521_v33 = vld [vmem:[#allocation12 + $0x150] sm:$0xff]  ;;  %v519_v34 = vld [vmem:[#allocation12 + $0x140] sm:$0xff] }
 0x208   :  { %528 = vmatpush1.msra.mxu0 %v524_v31  ;;  %v518_v35 = vld [vmem:[#allocation12 + $0x138] sm:$0xff]  ;;  %v516_v36 = vld [vmem:[#allocation12 + $0x128] sm:$0xff]  ;;  %v515_v37 = vld [vmem:[#allocation12 + $0x120] sm:$0xff]  ;;  %s707_s11 = scalar_select %p706_p12, 1, 0 }
 0x209   :  { %529 = vmatprep.subr.mxu0 %v522_v32  ;;  %v513_v38 = vld [vmem:[#allocation12 + $0x110] sm:$0xff]  ;;  %v512_v39 = vld [vmem:[#allocation12 + $0x108] sm:$0xff]  ;;  %v510_v40 = vld [vmem:[#allocation12 + $0xf8] sm:$0xff] }
 0x20a   :  { %530 = vmatpush1.msra.mxu0 %v521_v33  ;;  %v509_v41 = vld [vmem:[#allocation12 + $0xf0] sm:$0xff]  ;;  %v507_v42 = vld [vmem:[#allocation12 + $0xe0] sm:$0xff]  ;;  %v526_v43 = vld [vmem:[#allocation12 + $0x178] sm:$0xff]  ;;  %s708_s14 = scvt.s32.f32 %s707_s11 }
 0x20b   :  { %531 = vmatprep.subr.mxu0 %v519_v34  ;;  %v506_v44 = vld [vmem:[#allocation12 + $0xd8] sm:$0xff]  ;;  %2597 = vmatpush3.msra.mxu1 %v526_v43  ;;  %v523_v45 = vld [vmem:[#allocation12 + $0x160] sm:$0xff]  ;;  %v504_v46 = vld [vmem:[#allocation12 + $0xc8] sm:$0xff] }
 0x20c   :  { %532 = vmatpush1.msra.mxu0 %v518_v35  ;;  %2598 = vmatprep.subr.mxu1 %v3232_v2  ;;  %v520_v47 = vld [vmem:[#allocation12 + $0x148] sm:$0xff]  ;;  %v503_v48 = vld [vmem:[#allocation12 + $0xc0] sm:$0xff]  ;;  %v501_v49 = vld [vmem:[#allocation12 + $0xb0] sm:$0xff]  ;;  %s711_s25 = ssub.f32 1.0, %s708_s14 }
 0x20d   :  { %533 = vmatprep.subr.mxu0 %v516_v36  ;;  %2599 = vmatpush3.msra.mxu1 %v523_v45  ;;  %v517_v50 = vld [vmem:[#allocation12 + $0x130] sm:$0xff]  ;;  %v500_v51 = vld [vmem:[#allocation12 + $0xa8] sm:$0xff]  ;;  %v498_v52 = vld [vmem:[#allocation12 + $0x98] sm:$0xff]  ;;  %v709_v45 = vstv %s708_s14 }
 0x20e   :  { %534 = vmatpush1.msra.mxu0 %v515_v37  ;;  %2600 = vmatprep.subr.mxu1 %v3232_v2  ;;  %v514_v53 = vld [vmem:[#allocation12 + $0x118] sm:$0xff]  ;;  %v497_v54 = vld [vmem:[#allocation12 + $0x90] sm:$0xff]  ;;  %v495_v55 = vld [vmem:[#allocation12 + $0x80] sm:$0xff] }
 0x20f   :  { %535 = vmatprep.subr.mxu0 %v513_v38  ;;  %2601 = vmatpush3.msra.mxu1 %v520_v47  ;;  %v511_v56 = vld [vmem:[#allocation12 + $0x100] sm:$0xff]  ;;  %v494_v59 = vld [vmem:[#allocation12 + $0x78] sm:$0xff]  ;;  %v492_v60 = vld [vmem:[#allocation12 + $0x68] sm:$0xff] }
 0x210   :  { %536 = vmatpush1.msra.mxu0 %v512_v39  ;;  %2602 = vmatprep.subr.mxu1 %v3232_v2  ;;  %v508_v61 = vld [vmem:[#allocation12 + $0xe8] sm:$0xff]  ;;  %v491_v62 = vld [vmem:[#allocation12 + $0x60] sm:$0xff]  ;;  %v489_v63 = vld [vmem:[#allocation12 + $0x50] sm:$0xff] }
 0x211   :  { %537 = vmatprep.subr.mxu0 %v510_v40  ;;  %2603 = vmatpush3.msra.mxu1 %v517_v50  ;;  %v505_v3 = vld [vmem:[#allocation12 + $0xd0] sm:$0xff]  ;;  %v488_v4 = vld [vmem:[#allocation12 + $0x48] sm:$0xff]  ;;  %v486_v5 = vld [vmem:[#allocation12 + $0x38] sm:$0xff] }
 0x212   :  { %538 = vmatpush1.msra.mxu0 %v509_v41  ;;  %2604 = vmatprep.subr.mxu1 %v3232_v2  ;;  %v502_v6 = vld [vmem:[#allocation12 + $0xb8] sm:$0xff]  ;;  %v485_v7 = vld [vmem:[#allocation12 + $0x30] sm:$0xff]  ;;  %v483_v8 = vld [vmem:[#allocation12 + $0x20] sm:$0xff] }
 0x213   :  { %539 = vmatprep.subr.mxu0 %v507_v42  ;;  %2605 = vmatpush3.msra.mxu1 %v514_v53  ;;  %v499_v9 = vld [vmem:[#allocation12 + $0xa0] sm:$0xff]  ;;  %v482_v10 = vld [vmem:[#allocation12 + $0x18] sm:$0xff]  ;;  %v480_v11 = vld [vmem:[#allocation12 + $0x8] sm:$0xff]  ;;  %v712_v42 = vstv %s711_s25 }
 0x214   :  { %540 = vmatpush1.msra.mxu0 %v506_v44  ;;  %2606 = vmatprep.subr.mxu1 %v3232_v2  ;;  %v496_v12 = vld [vmem:[#allocation12 + $0x88] sm:$0xff]  ;;  %v479_v13 = vld [vmem:[#allocation12] sm:$0xff]  ;;  %v493_v15 = vld [vmem:[#allocation12 + $0x70] sm:$0xff]  ;;  %v713_v47 = vmul.f32 %v712_v42, %v3492_v29 }
 0x215   :  { %541 = vmatprep.subr.mxu0 %v504_v46  ;;  %2607 = vmatpush3.msra.mxu1 %v511_v56  ;;  %v490_v16 = vld [vmem:[#allocation12 + $0x58] sm:$0xff]  ;;  %v487_v17 = vld [vmem:[#allocation12 + $0x40] sm:$0xff]  ;;  %v484_v18 = vld [vmem:[#allocation12 + $0x28] sm:$0xff] }
 0x216   :  { %542 = vmatpush1.msra.mxu0 %v503_v48  ;;  %2608 = vmatprep.subr.mxu1 %v3232_v2  ;;  %v481_v19 = vld [vmem:[#allocation12 + $0x10] sm:$0xff] }
 0x217   :  { %543 = vmatprep.subr.mxu0 %v501_v49  ;;  %2609 = vmatpush3.msra.mxu1 %v508_v61  ;;  %v478_v25 = vld [vmem:[#allocation2 + $0x1] ss:$8 sm:$0x7] }
 0x218   :  { %544 = vmatpush1.msra.mxu0 %v500_v51  ;;  %2610 = vmatprep.subr.mxu1 %v3232_v2  ;;  %v695_v35 = vrot.slane %v478_v25, 2 }
 0x219   :  { %545 = vmatprep.subr.mxu0 %v498_v52  ;;  %2611 = vmatpush3.msra.mxu1 %v505_v3 }
 0x21a   :  { %546 = vmatpush1.msra.mxu0 %v497_v54  ;;  %2612 = vmatprep.subr.mxu1 %v3232_v2 }
 0x21b   :  { %547 = vmatprep.subr.mxu0 %v495_v55  ;;  %2613 = vmatpush3.msra.mxu1 %v502_v6 }
 0x21c   :  { %548 = vmatpush1.msra.mxu0 %v494_v59  ;;  %2614 = vmatprep.subr.mxu1 %v3232_v2 }
 0x21d   :  { %549 = vmatprep.subr.mxu0 %v492_v60  ;;  %2615 = vmatpush3.msra.mxu1 %v499_v9 }
 0x21e   :  { %550 = vmatpush1.msra.mxu0 %v491_v62  ;;  %2616 = vmatprep.subr.mxu1 %v3232_v2 }
 0x21f   :  { %551 = vmatprep.subr.mxu0 %v489_v63  ;;  %2617 = vmatpush3.msra.mxu1 %v496_v12 }
 0x220   :  { %552 = vmatpush1.msra.mxu0 %v488_v4  ;;  %2618 = vmatprep.subr.mxu1 %v3232_v2 }
 0x221   :  { %553 = vmatprep.subr.mxu0 %v486_v5  ;;  %2619 = vmatpush3.msra.mxu1 %v493_v15 }
 0x222   :  { %554 = vmatpush1.msra.mxu0 %v485_v7  ;;  %2620 = vmatprep.subr.mxu1 %v3232_v2 }
 0x223   :  { %555 = vmatprep.subr.mxu0 %v483_v8  ;;  %2621 = vmatpush3.msra.mxu1 %v490_v16 }
 0x224   :  { %556 = vmatpush1.msra.mxu0 %v482_v10  ;;  %2622 = vmatprep.subr.mxu1 %v3232_v2 }
 0x225   :  { %557 = vmatprep.subr.mxu0 %v480_v11  ;;  %2623 = vmatpush3.msra.mxu1 %v487_v17 }
 0x226   :  { %558 = vmatpush1.msra.mxu0 %v479_v13  ;;  %2624 = vmatprep.subr.mxu1 %v3232_v2 }
 0x227   :  { %592 = vmatmul.mubr.f32.vlgmr.msra.gmra.mxu0 %v3492_v29  ;;  %2625 = vmatpush3.msra.mxu1 %v484_v18 }
 0x228   :  { %2626 = vmatprep.subr.mxu1 %v3232_v2 }
 0x229   :  { %2627 = vmatpush3.msra.mxu1 %v481_v19 }
 0x22a   :  { %2629 = vmatmul.mubr.f32.vlgmr.msra.gmra.mxu1 %v3492_v29 }
 0x2e7   :  { %v593_v20 = vpop.f32.mrf.mxu0 }
 0x2e8   :  { %v594_v22 = vadd.f32 %v593_v20, %v3474_v57 }
 0x2e9   :  { %v595_v21 = vpop.f32.mrf.mxu0 }
 0x2ea   :  { %v596_v23 = vadd.f32 %v595_v21, %v3477_v58  ;;  %v664_v27 = vpop.f32.mrf.mxu1 }
 0x2eb   :  { %v665_v34 = vadd.f32 %v664_v27, %v3486_v14 }
 0x2ec   :  { %v670_v1 = vcombine.low %v594_v22, %v596_v23  ;;  %v2630_v30 = vpop.f32.mrf.mxu1 }
 0x2ee   :  { %v677_v24 = vrot.slane %v670_v1, %v3481_v0 }
 0x2f0   :  { %v684_v26 = vrot.slane %v677_v24, %v3481_v0 }
 0x2f2   :  { %v686_v28 = vadd.f32 %v684_v26, %v478_v25 }
 0x2f4   :  { %v2391_v31 = vmul.f32 -1.442695, %v686_v28 }
 0x2f6   :  { %2901 = vpow2.f32 %v2391_v31 }
 0x303   :  { %v2902_v32 = vpop.eup %2901 }
 0x304   :  { %v690_v33 = vadd.f32 1.0, %v2902_v32 }
 0x306   :  { %2903 = vrcp.f32 %v690_v33 }
 0x313   :  { %v2904_v36 = vpop.eup %2903 }
 0x314   :  { %v693_v37 = vmul.f32 %v2904_v36, %v665_v34  ;;  %v700_v39 = vrot.slane %v2904_v36, 1 }
 0x316   :  { %v697_v38 = vadd.f32 %v695_v35, %v693_v37  ;;  %v702_v40 = vsub.f32 1.0, %v700_v39  ;;  %v704_v44 = vmul.f32 %v700_v39, %v3492_v29 }
 0x318   :  { %2905 = vtanh.f32 %v697_v38 }
 0x325   :  { %v2906_v41 = vpop.eup %2905 }
 0x326   :  { %v703_v43 = vmul.f32 %v2906_v41, %v702_v40 }
 0x328   :  { %v705_v46 = vadd.f32 %v704_v44, %v703_v43 }
 0x32a   :  { %v710_v48 = vmul.f32 %v709_v45, %v705_v46 }
 0x32c   :  { %v3525_v49 = vadd.f32 %v713_v47, %v710_v48 }
 0x32d   :  { %3199 = dma.done.wait [#allocation5 + $0x2], 48 }
 0x32e   :  { %3200 = vsyncadd [#allocation5 + $0x2], 4294967248  ;;  %831 = vmatprep.mubr.f32.mxu0 %v3232_v2  ;;  %2631 = vmatprep.subr.mxu1 %v3232_v2  ;;  %v765_v50 = vld [vmem:[#allocation12 + $0x170] sm:$0xff]  ;;  %v764_v51 = vld [vmem:[#allocation12 + $0x168] sm:$0xff]  ;;  %p946_p13 = scmp.gt.s32.totalorder %s3744_s0, 2 }
 0x32f   :  { %2663 = vmatprep.mubr.msk.f32.mxu1 %vm3233_vm0, %v3232_v2  ;;  %v762_v52 = vld [vmem:[#allocation12 + $0x158] sm:$0xff]  ;;  %767 = vmatprep.subr.mxu0 %v765_v50  ;;  %v761_v53 = vld [vmem:[#allocation12 + $0x150] sm:$0xff]  ;;  %v759_v54 = vld [vmem:[#allocation12 + $0x140] sm:$0xff] }
 0x330   :  { %768 = vmatpush1.msra.mxu0 %v764_v51  ;;  %v758_v29 = vld [vmem:[#allocation12 + $0x138] sm:$0xff]  ;;  %v756_v55 = vld [vmem:[#allocation12 + $0x128] sm:$0xff]  ;;  %v755_v56 = vld [vmem:[#allocation12 + $0x120] sm:$0xff]  ;;  %s947_s16 = scalar_select %p946_p13, 1, 0 }
 0x331   :  { %769 = vmatprep.subr.mxu0 %v762_v52  ;;  %v753_v59 = vld [vmem:[#allocation12 + $0x110] sm:$0xff]  ;;  %v752_v60 = vld [vmem:[#allocation12 + $0x108] sm:$0xff]  ;;  %v750_v61 = vld [vmem:[#allocation12 + $0xf8] sm:$0xff] }
 0x332   :  { %770 = vmatpush1.msra.mxu0 %v761_v53  ;;  %v749_v62 = vld [vmem:[#allocation12 + $0xf0] sm:$0xff]  ;;  %v747_v63 = vld [vmem:[#allocation12 + $0xe0] sm:$0xff]  ;;  %v766_v3 = vld [vmem:[#allocation12 + $0x178] sm:$0xff]  ;;  %s948_s19 = scvt.s32.f32 %s947_s16 }
 0x333   :  { %771 = vmatprep.subr.mxu0 %v759_v54  ;;  %v746_v4 = vld [vmem:[#allocation12 + $0xd8] sm:$0xff]  ;;  %2632 = vmatpush3.msra.mxu1 %v766_v3  ;;  %v763_v5 = vld [vmem:[#allocation12 + $0x160] sm:$0xff]  ;;  %v744_v6 = vld [vmem:[#allocation12 + $0xc8] sm:$0xff] }
 0x334   :  { %772 = vmatpush1.msra.mxu0 %v758_v29  ;;  %2633 = vmatprep.subr.mxu1 %v3232_v2  ;;  %v760_v7 = vld [vmem:[#allocation12 + $0x148] sm:$0xff]  ;;  %v743_v8 = vld [vmem:[#allocation12 + $0xc0] sm:$0xff]  ;;  %v741_v9 = vld [vmem:[#allocation12 + $0xb0] sm:$0xff]  ;;  %s951_s9 = ssub.f32 1.0, %s948_s19 }
 0x335   :  { %773 = vmatprep.subr.mxu0 %v756_v55  ;;  %2634 = vmatpush3.msra.mxu1 %v763_v5  ;;  %v757_v10 = vld [vmem:[#allocation12 + $0x130] sm:$0xff]  ;;  %v740_v11 = vld [vmem:[#allocation12 + $0xa8] sm:$0xff]  ;;  %v738_v12 = vld [vmem:[#allocation12 + $0x98] sm:$0xff]  ;;  %v949_v5 = vstv %s948_s19 }
 0x336   :  { %774 = vmatpush1.msra.mxu0 %v755_v56  ;;  %2635 = vmatprep.subr.mxu1 %v3232_v2  ;;  %v754_v13 = vld [vmem:[#allocation12 + $0x118] sm:$0xff]  ;;  %v737_v15 = vld [vmem:[#allocation12 + $0x90] sm:$0xff]  ;;  %v735_v16 = vld [vmem:[#allocation12 + $0x80] sm:$0xff] }
 0x337   :  { %775 = vmatprep.subr.mxu0 %v753_v59  ;;  %2636 = vmatpush3.msra.mxu1 %v760_v7  ;;  %v751_v17 = vld [vmem:[#allocation12 + $0x100] sm:$0xff]  ;;  %v734_v18 = vld [vmem:[#allocation12 + $0x78] sm:$0xff]  ;;  %v732_v19 = vld [vmem:[#allocation12 + $0x68] sm:$0xff] }
 0x338   :  { %776 = vmatpush1.msra.mxu0 %v752_v60  ;;  %2637 = vmatprep.subr.mxu1 %v3232_v2  ;;  %v748_v20 = vld [vmem:[#allocation12 + $0xe8] sm:$0xff]  ;;  %v731_v21 = vld [vmem:[#allocation12 + $0x60] sm:$0xff]  ;;  %v729_v22 = vld [vmem:[#allocation12 + $0x50] sm:$0xff] }
 0x339   :  { %777 = vmatprep.subr.mxu0 %v750_v61  ;;  %2638 = vmatpush3.msra.mxu1 %v757_v10  ;;  %v745_v23 = vld [vmem:[#allocation12 + $0xd0] sm:$0xff]  ;;  %v728_v1 = vld [vmem:[#allocation12 + $0x48] sm:$0xff]  ;;  %v726_v24 = vld [vmem:[#allocation12 + $0x38] sm:$0xff] }
 0x33a   :  { %778 = vmatpush1.msra.mxu0 %v749_v62  ;;  %2639 = vmatprep.subr.mxu1 %v3232_v2  ;;  %v742_v25 = vld [vmem:[#allocation12 + $0xb8] sm:$0xff]  ;;  %v725_v26 = vld [vmem:[#allocation12 + $0x30] sm:$0xff]  ;;  %v723_v27 = vld [vmem:[#allocation12 + $0x20] sm:$0xff] }
 0x33b   :  { %779 = vmatprep.subr.mxu0 %v747_v63  ;;  %2640 = vmatpush3.msra.mxu1 %v754_v13  ;;  %v739_v28 = vld [vmem:[#allocation12 + $0xa0] sm:$0xff]  ;;  %v722_v30 = vld [vmem:[#allocation12 + $0x18] sm:$0xff]  ;;  %v720_v31 = vld [vmem:[#allocation12 + $0x8] sm:$0xff]  ;;  %v952_v63 = vstv %s951_s9 }
 0x33c   :  { %780 = vmatpush1.msra.mxu0 %v746_v4  ;;  %2641 = vmatprep.subr.mxu1 %v3232_v2  ;;  %v736_v32 = vld [vmem:[#allocation12 + $0x88] sm:$0xff]  ;;  %v719_v33 = vld [vmem:[#allocation12] sm:$0xff]  ;;  %v733_v34 = vld [vmem:[#allocation12 + $0x70] sm:$0xff]  ;;  %v953_v7 = vmul.f32 %v952_v63, %v3525_v49 }
 0x33d   :  { %781 = vmatprep.subr.mxu0 %v744_v6  ;;  %2642 = vmatpush3.msra.mxu1 %v751_v17  ;;  %v730_v35 = vld [vmem:[#allocation12 + $0x58] sm:$0xff]  ;;  %v727_v36 = vld [vmem:[#allocation12 + $0x40] sm:$0xff]  ;;  %v724_v37 = vld [vmem:[#allocation12 + $0x28] sm:$0xff] }
 0x33e   :  { %782 = vmatpush1.msra.mxu0 %v743_v8  ;;  %2643 = vmatprep.subr.mxu1 %v3232_v2  ;;  %v721_v38 = vld [vmem:[#allocation12 + $0x10] sm:$0xff] }
 0x33f   :  { %783 = vmatprep.subr.mxu0 %v741_v9  ;;  %2644 = vmatpush3.msra.mxu1 %v748_v20  ;;  %v718_v45 = vld [vmem:[#allocation2 + $0x2] ss:$8 sm:$0x7] }
 0x340   :  { %784 = vmatpush1.msra.mxu0 %v740_v11  ;;  %2645 = vmatprep.subr.mxu1 %v3232_v2  ;;  %v935_v29 = vrot.slane %v718_v45, 2 }
 0x341   :  { %785 = vmatprep.subr.mxu0 %v738_v12  ;;  %2646 = vmatpush3.msra.mxu1 %v745_v23 }
 0x342   :  { %786 = vmatpush1.msra.mxu0 %v737_v15  ;;  %2647 = vmatprep.subr.mxu1 %v3232_v2 }
 0x343   :  { %787 = vmatprep.subr.mxu0 %v735_v16  ;;  %2648 = vmatpush3.msra.mxu1 %v742_v25 }
 0x344   :  { %788 = vmatpush1.msra.mxu0 %v734_v18  ;;  %2649 = vmatprep.subr.mxu1 %v3232_v2 }
 0x345   :  { %789 = vmatprep.subr.mxu0 %v732_v19  ;;  %2650 = vmatpush3.msra.mxu1 %v739_v28 }
 0x346   :  { %790 = vmatpush1.msra.mxu0 %v731_v21  ;;  %2651 = vmatprep.subr.mxu1 %v3232_v2 }
 0x347   :  { %791 = vmatprep.subr.mxu0 %v729_v22  ;;  %2652 = vmatpush3.msra.mxu1 %v736_v32 }
 0x348   :  { %792 = vmatpush1.msra.mxu0 %v728_v1  ;;  %2653 = vmatprep.subr.mxu1 %v3232_v2 }
 0x349   :  { %793 = vmatprep.subr.mxu0 %v726_v24  ;;  %2654 = vmatpush3.msra.mxu1 %v733_v34 }
 0x34a   :  { %794 = vmatpush1.msra.mxu0 %v725_v26  ;;  %2655 = vmatprep.subr.mxu1 %v3232_v2 }
 0x34b   :  { %795 = vmatprep.subr.mxu0 %v723_v27  ;;  %2656 = vmatpush3.msra.mxu1 %v730_v35 }
 0x34c   :  { %796 = vmatpush1.msra.mxu0 %v722_v30  ;;  %2657 = vmatprep.subr.mxu1 %v3232_v2 }
 0x34d   :  { %797 = vmatprep.subr.mxu0 %v720_v31  ;;  %2658 = vmatpush3.msra.mxu1 %v727_v36 }
 0x34e   :  { %798 = vmatpush1.msra.mxu0 %v719_v33  ;;  %2659 = vmatprep.subr.mxu1 %v3232_v2 }
 0x34f   :  { %832 = vmatmul.mubr.f32.vlgmr.msra.gmra.mxu0 %v3525_v49  ;;  %2660 = vmatpush3.msra.mxu1 %v724_v37 }
 0x350   :  { %2661 = vmatprep.subr.mxu1 %v3232_v2 }
 0x351   :  { %2662 = vmatpush3.msra.mxu1 %v721_v38 }
 0x352   :  { %2664 = vmatmul.mubr.f32.vlgmr.msra.gmra.mxu1 %v3525_v49 }
 0x40f   :  { %v833_v39 = vpop.f32.mrf.mxu0 }
 0x410   :  { %v834_v41 = vadd.f32 %v833_v39, %v3474_v57 }
 0x411   :  { %v835_v40 = vpop.f32.mrf.mxu0 }
 0x412   :  { %v836_v42 = vadd.f32 %v835_v40, %v3477_v58  ;;  %v904_v47 = vpop.f32.mrf.mxu1 }
 0x413   :  { %v905_v54 = vadd.f32 %v904_v47, %v3486_v14 }
 0x414   :  { %v910_v43 = vcombine.low %v834_v41, %v836_v42  ;;  %v2665_v50 = vpop.f32.mrf.mxu1 }
 0x416   :  { %v917_v44 = vrot.slane %v910_v43, %v3481_v0 }
 0x418   :  { %v924_v46 = vrot.slane %v917_v44, %v3481_v0 }
 0x41a   :  { %v926_v48 = vadd.f32 %v924_v46, %v718_v45 }
 0x41c   :  { %v2392_v51 = vmul.f32 -1.442695, %v926_v48 }
 0x41e   :  { %2907 = vpow2.f32 %v2392_v51 }
 0x42b   :  { %v2908_v52 = vpop.eup %2907 }
 0x42c   :  { %v930_v53 = vadd.f32 1.0, %v2908_v52 }
 0x42e   :  { %2909 = vrcp.f32 %v930_v53 }
 0x43b   :  { %v2910_v55 = vpop.eup %2909 }
 0x43c   :  { %v933_v56 = vmul.f32 %v2910_v55, %v905_v54  ;;  %v940_v60 = vrot.slane %v2910_v55, 1 }
 0x43e   :  { %v937_v59 = vadd.f32 %v935_v29, %v933_v56  ;;  %v942_v61 = vsub.f32 1.0, %v940_v60  ;;  %v944_v4 = vmul.f32 %v940_v60, %v3525_v49 }
 0x440   :  { %2911 = vtanh.f32 %v937_v59 }
 0x44d   :  { %v2912_v62 = vpop.eup %2911 }
 0x44e   :  { %v943_v3 = vmul.f32 %v2912_v62, %v942_v61 }
 0x450   :  { %v945_v6 = vadd.f32 %v944_v4, %v943_v3 }
 0x452   :  { %v950_v8 = vmul.f32 %v949_v5, %v945_v6 }
 0x454   :  { %v3558_v9 = vadd.f32 %v953_v7, %v950_v8 }
 0x455   :  { %3201 = dma.done.wait [#allocation5 + $0x3], 48 }
 0x456   :  { %3202 = vsyncadd [#allocation5 + $0x3], 4294967248  ;;  %1071 = vmatprep.mubr.f32.mxu0 %v3232_v2  ;;  %2666 = vmatprep.subr.mxu1 %v3232_v2  ;;  %v1005_v10 = vld [vmem:[#allocation12 + $0x170] sm:$0xff]  ;;  %v1004_v11 = vld [vmem:[#allocation12 + $0x168] sm:$0xff]  ;;  %p1186_p0 = scmp.gt.s32.totalorder %s3744_s0, 3 }
 0x457   :  { %2698 = vmatprep.mubr.msk.f32.mxu1 %vm3233_vm0, %v3232_v2  ;;  %v1002_v12 = vld [vmem:[#allocation12 + $0x158] sm:$0xff]  ;;  %1007 = vmatprep.subr.mxu0 %v1005_v10  ;;  %v1001_v13 = vld [vmem:[#allocation12 + $0x150] sm:$0xff]  ;;  %v999_v15 = vld [vmem:[#allocation12 + $0x140] sm:$0xff] }
 0x458   :  { %1008 = vmatpush1.msra.mxu0 %v1004_v11  ;;  %v998_v49 = vld [vmem:[#allocation12 + $0x138] sm:$0xff]  ;;  %v996_v16 = vld [vmem:[#allocation12 + $0x128] sm:$0xff]  ;;  %v995_v17 = vld [vmem:[#allocation12 + $0x120] sm:$0xff]  ;;  %s1187_s27 = scalar_select %p1186_p0, 1, 0 }
 0x459   :  { %1009 = vmatprep.subr.mxu0 %v1002_v12  ;;  %v993_v18 = vld [vmem:[#allocation12 + $0x110] sm:$0xff]  ;;  %v992_v19 = vld [vmem:[#allocation12 + $0x108] sm:$0xff]  ;;  %v990_v20 = vld [vmem:[#allocation12 + $0xf8] sm:$0xff] }
 0x45a   :  { %1010 = vmatpush1.msra.mxu0 %v1001_v13  ;;  %v989_v21 = vld [vmem:[#allocation12 + $0xf0] sm:$0xff]  ;;  %v987_v22 = vld [vmem:[#allocation12 + $0xe0] sm:$0xff]  ;;  %v1006_v23 = vld [vmem:[#allocation12 + $0x178] sm:$0xff]  ;;  %s1188_s17 = scvt.s32.f32 %s1187_s27 }
 0x45b   :  { %1011 = vmatprep.subr.mxu0 %v999_v15  ;;  %v986_v1 = vld [vmem:[#allocation12 + $0xd8] sm:$0xff]  ;;  %2667 = vmatpush3.msra.mxu1 %v1006_v23  ;;  %v1003_v24 = vld [vmem:[#allocation12 + $0x160] sm:$0xff]  ;;  %v984_v25 = vld [vmem:[#allocation12 + $0xc8] sm:$0xff] }
 0x45c   :  { %1012 = vmatpush1.msra.mxu0 %v998_v49  ;;  %2668 = vmatprep.subr.mxu1 %v3232_v2  ;;  %v1000_v26 = vld [vmem:[#allocation12 + $0x148] sm:$0xff]  ;;  %v983_v27 = vld [vmem:[#allocation12 + $0xc0] sm:$0xff]  ;;  %v981_v28 = vld [vmem:[#allocation12 + $0xb0] sm:$0xff]  ;;  %s1191_s18 = ssub.f32 1.0, %s1188_s17 }
 0x45d   :  { %1013 = vmatprep.subr.mxu0 %v996_v16  ;;  %2669 = vmatpush3.msra.mxu1 %v1003_v24  ;;  %v997_v30 = vld [vmem:[#allocation12 + $0x130] sm:$0xff]  ;;  %v980_v31 = vld [vmem:[#allocation12 + $0xa8] sm:$0xff]  ;;  %v978_v32 = vld [vmem:[#allocation12 + $0x98] sm:$0xff]  ;;  %v1189_v24 = vstv %s1188_s17 }
 0x45e   :  { %1014 = vmatpush1.msra.mxu0 %v995_v17  ;;  %2670 = vmatprep.subr.mxu1 %v3232_v2  ;;  %v994_v33 = vld [vmem:[#allocation12 + $0x118] sm:$0xff]  ;;  %v977_v34 = vld [vmem:[#allocation12 + $0x90] sm:$0xff]  ;;  %v975_v35 = vld [vmem:[#allocation12 + $0x80] sm:$0xff] }
 0x45f   :  { %1015 = vmatprep.subr.mxu0 %v993_v18  ;;  %2671 = vmatpush3.msra.mxu1 %v1000_v26  ;;  %v991_v36 = vld [vmem:[#allocation12 + $0x100] sm:$0xff]  ;;  %v974_v37 = vld [vmem:[#allocation12 + $0x78] sm:$0xff]  ;;  %v972_v38 = vld [vmem:[#allocation12 + $0x68] sm:$0xff] }
 0x460   :  { %1016 = vmatpush1.msra.mxu0 %v992_v19  ;;  %2672 = vmatprep.subr.mxu1 %v3232_v2  ;;  %v988_v39 = vld [vmem:[#allocation12 + $0xe8] sm:$0xff]  ;;  %v971_v40 = vld [vmem:[#allocation12 + $0x60] sm:$0xff]  ;;  %v969_v41 = vld [vmem:[#allocation12 + $0x50] sm:$0xff] }
 0x461   :  { %1017 = vmatprep.subr.mxu0 %v990_v20  ;;  %2673 = vmatpush3.msra.mxu1 %v997_v30  ;;  %v985_v42 = vld [vmem:[#allocation12 + $0xd0] sm:$0xff]  ;;  %v968_v43 = vld [vmem:[#allocation12 + $0x48] sm:$0xff]  ;;  %v966_v44 = vld [vmem:[#allocation12 + $0x38] sm:$0xff] }
 0x462   :  { %1018 = vmatpush1.msra.mxu0 %v989_v21  ;;  %2674 = vmatprep.subr.mxu1 %v3232_v2  ;;  %v982_v45 = vld [vmem:[#allocation12 + $0xb8] sm:$0xff]  ;;  %v965_v46 = vld [vmem:[#allocation12 + $0x30] sm:$0xff]  ;;  %v963_v47 = vld [vmem:[#allocation12 + $0x20] sm:$0xff] }
 0x463   :  { %1019 = vmatprep.subr.mxu0 %v987_v22  ;;  %2675 = vmatpush3.msra.mxu1 %v994_v33  ;;  %v979_v48 = vld [vmem:[#allocation12 + $0xa0] sm:$0xff]  ;;  %v962_v50 = vld [vmem:[#allocation12 + $0x18] sm:$0xff]  ;;  %v960_v51 = vld [vmem:[#allocation12 + $0x8] sm:$0xff]  ;;  %v1192_v22 = vstv %s1191_s18 }
 0x464   :  { %1020 = vmatpush1.msra.mxu0 %v986_v1  ;;  %2676 = vmatprep.subr.mxu1 %v3232_v2  ;;  %v976_v52 = vld [vmem:[#allocation12 + $0x88] sm:$0xff]  ;;  %v959_v53 = vld [vmem:[#allocation12] sm:$0xff]  ;;  %v973_v54 = vld [vmem:[#allocation12 + $0x70] sm:$0xff]  ;;  %v1193_v26 = vmul.f32 %v1192_v22, %v3558_v9 }
 0x465   :  { %1021 = vmatprep.subr.mxu0 %v984_v25  ;;  %2677 = vmatpush3.msra.mxu1 %v991_v36  ;;  %v970_v29 = vld [vmem:[#allocation12 + $0x58] sm:$0xff]  ;;  %v967_v55 = vld [vmem:[#allocation12 + $0x40] sm:$0xff]  ;;  %v964_v56 = vld [vmem:[#allocation12 + $0x28] sm:$0xff] }
 0x466   :  { %1022 = vmatpush1.msra.mxu0 %v983_v27  ;;  %2678 = vmatprep.subr.mxu1 %v3232_v2  ;;  %v961_v59 = vld [vmem:[#allocation12 + $0x10] sm:$0xff] }
 0x467   :  { %1023 = vmatprep.subr.mxu0 %v981_v28  ;;  %2679 = vmatpush3.msra.mxu1 %v988_v39  ;;  %v958_v5 = vld [vmem:[#allocation2 + $0x3] ss:$8 sm:$0x7] }
 0x468   :  { %1024 = vmatpush1.msra.mxu0 %v980_v31  ;;  %2680 = vmatprep.subr.mxu1 %v3232_v2  ;;  %v1175_v49 = vrot.slane %v958_v5, 2 }
 0x469   :  { %1025 = vmatprep.subr.mxu0 %v978_v32  ;;  %2681 = vmatpush3.msra.mxu1 %v985_v42 }
 0x46a   :  { %1026 = vmatpush1.msra.mxu0 %v977_v34  ;;  %2682 = vmatprep.subr.mxu1 %v3232_v2 }
 0x46b   :  { %1027 = vmatprep.subr.mxu0 %v975_v35  ;;  %2683 = vmatpush3.msra.mxu1 %v982_v45 }
 0x46c   :  { %1028 = vmatpush1.msra.mxu0 %v974_v37  ;;  %2684 = vmatprep.subr.mxu1 %v3232_v2 }
 0x46d   :  { %1029 = vmatprep.subr.mxu0 %v972_v38  ;;  %2685 = vmatpush3.msra.mxu1 %v979_v48 }
 0x46e   :  { %1030 = vmatpush1.msra.mxu0 %v971_v40  ;;  %2686 = vmatprep.subr.mxu1 %v3232_v2 }
 0x46f   :  { %1031 = vmatprep.subr.mxu0 %v969_v41  ;;  %2687 = vmatpush3.msra.mxu1 %v976_v52 }
 0x470   :  { %1032 = vmatpush1.msra.mxu0 %v968_v43  ;;  %2688 = vmatprep.subr.mxu1 %v3232_v2 }
 0x471   :  { %1033 = vmatprep.subr.mxu0 %v966_v44  ;;  %2689 = vmatpush3.msra.mxu1 %v973_v54 }
 0x472   :  { %1034 = vmatpush1.msra.mxu0 %v965_v46  ;;  %2690 = vmatprep.subr.mxu1 %v3232_v2 }
 0x473   :  { %1035 = vmatprep.subr.mxu0 %v963_v47  ;;  %2691 = vmatpush3.msra.mxu1 %v970_v29 }
 0x474   :  { %1036 = vmatpush1.msra.mxu0 %v962_v50  ;;  %2692 = vmatprep.subr.mxu1 %v3232_v2 }
 0x475   :  { %1037 = vmatprep.subr.mxu0 %v960_v51  ;;  %2693 = vmatpush3.msra.mxu1 %v967_v55 }
 0x476   :  { %1038 = vmatpush1.msra.mxu0 %v959_v53  ;;  %2694 = vmatprep.subr.mxu1 %v3232_v2 }
 0x477   :  { %1072 = vmatmul.mubr.f32.vlgmr.msra.gmra.mxu0 %v3558_v9  ;;  %2695 = vmatpush3.msra.mxu1 %v964_v56 }
 0x478   :  { %2696 = vmatprep.subr.mxu1 %v3232_v2 }
 0x479   :  { %2697 = vmatpush3.msra.mxu1 %v961_v59 }
 0x47a   :  { %2699 = vmatmul.mubr.f32.vlgmr.msra.gmra.mxu1 %v3558_v9 }
 0x537   :  { %v1073_v60 = vpop.f32.mrf.mxu0 }
 0x538   :  { %v1074_v62 = vadd.f32 %v1073_v60, %v3474_v57 }
 0x539   :  { %v1075_v61 = vpop.f32.mrf.mxu0 }
 0x53a   :  { %v1076_v63 = vadd.f32 %v1075_v61, %v3477_v58  ;;  %v1144_v7 = vpop.f32.mrf.mxu1 }
 0x53b   :  { %v1145_v15 = vadd.f32 %v1144_v7, %v3486_v14 }
 0x53c   :  { %v1150_v3 = vcombine.low %v1074_v62, %v1076_v63  ;;  %v2700_v10 = vpop.f32.mrf.mxu1 }
 0x53e   :  { %v1157_v4 = vrot.slane %v1150_v3, %v3481_v0 }
 0x540   :  { %v1164_v6 = vrot.slane %v1157_v4, %v3481_v0 }
 0x542   :  { %v1166_v8 = vadd.f32 %v1164_v6, %v958_v5 }
 0x544   :  { %v2393_v11 = vmul.f32 -1.442695, %v1166_v8 }
 0x546   :  { %2913 = vpow2.f32 %v2393_v11 }
 0x553   :  { %v2914_v12 = vpop.eup %2913 }
 0x554   :  { %v1170_v13 = vadd.f32 1.0, %v2914_v12 }
 0x556   :  { %2915 = vrcp.f32 %v1170_v13 }
 0x563   :  { %v2916_v16 = vpop.eup %2915 }
 0x564   :  { %v1173_v17 = vmul.f32 %v2916_v16, %v1145_v15  ;;  %v1180_v19 = vrot.slane %v2916_v16, 1 }
 0x566   :  { %v1177_v18 = vadd.f32 %v1175_v49, %v1173_v17  ;;  %v1182_v20 = vsub.f32 1.0, %v1180_v19  ;;  %v1184_v1 = vmul.f32 %v1180_v19, %v3558_v9 }
 0x568   :  { %2917 = vtanh.f32 %v1177_v18 }
 0x575   :  { %v2918_v21 = vpop.eup %2917 }
 0x576   :  { %v1183_v23 = vmul.f32 %v2918_v21, %v1182_v20 }
 0x578   :  { %v1185_v25 = vadd.f32 %v1184_v1, %v1183_v23 }
 0x57a   :  { %v1190_v27 = vmul.f32 %v1189_v24, %v1185_v25 }
 0x57c   :  { %v3591_v28 = vadd.f32 %v1193_v26, %v1190_v27 }
 0x57d   :  { %3203 = dma.done.wait [#allocation5 + $0x4], 48 }
 0x57e   :  { %3204 = vsyncadd [#allocation5 + $0x4], 4294967248  ;;  %1311 = vmatprep.mubr.f32.mxu0 %v3232_v2  ;;  %2701 = vmatprep.subr.mxu1 %v3232_v2  ;;  %v1245_v30 = vld [vmem:[#allocation12 + $0x170] sm:$0xff]  ;;  %v1244_v31 = vld [vmem:[#allocation12 + $0x168] sm:$0xff]  ;;  %p1426_p1 = scmp.gt.s32.totalorder %s3744_s0, 4 }
 0x57f   :  { %2733 = vmatprep.mubr.msk.f32.mxu1 %vm3233_vm0, %v3232_v2  ;;  %v1242_v32 = vld [vmem:[#allocation12 + $0x158] sm:$0xff]  ;;  %1247 = vmatprep.subr.mxu0 %v1245_v30  ;;  %v1241_v33 = vld [vmem:[#allocation12 + $0x150] sm:$0xff]  ;;  %v1239_v34 = vld [vmem:[#allocation12 + $0x140] sm:$0xff] }
 0x580   :  { %1248 = vmatpush1.msra.mxu0 %v1244_v31  ;;  %v1238_v9 = vld [vmem:[#allocation12 + $0x138] sm:$0xff]  ;;  %v1236_v35 = vld [vmem:[#allocation12 + $0x128] sm:$0xff]  ;;  %v1235_v36 = vld [vmem:[#allocation12 + $0x120] sm:$0xff]  ;;  %s1427_s24 = scalar_select %p1426_p1, 1, 0 }
 0x581   :  { %1249 = vmatprep.subr.mxu0 %v1242_v32  ;;  %v1233_v37 = vld [vmem:[#allocation12 + $0x110] sm:$0xff]  ;;  %v1232_v38 = vld [vmem:[#allocation12 + $0x108] sm:$0xff]  ;;  %v1230_v39 = vld [vmem:[#allocation12 + $0xf8] sm:$0xff] }
 0x582   :  { %1250 = vmatpush1.msra.mxu0 %v1241_v33  ;;  %v1229_v40 = vld [vmem:[#allocation12 + $0xf0] sm:$0xff]  ;;  %v1227_v41 = vld [vmem:[#allocation12 + $0xe0] sm:$0xff]  ;;  %v1246_v42 = vld [vmem:[#allocation12 + $0x178] sm:$0xff]  ;;  %s1428_s4 = scvt.s32.f32 %s1427_s24 }
 0x583   :  { %1251 = vmatprep.subr.mxu0 %v1239_v34  ;;  %v1226_v43 = vld [vmem:[#allocation12 + $0xd8] sm:$0xff]  ;;  %2702 = vmatpush3.msra.mxu1 %v1246_v42  ;;  %v1243_v44 = vld [vmem:[#allocation12 + $0x160] sm:$0xff]  ;;  %v1224_v45 = vld [vmem:[#allocation12 + $0xc8] sm:$0xff] }
 0x584   :  { %1252 = vmatpush1.msra.mxu0 %v1238_v9  ;;  %2703 = vmatprep.subr.mxu1 %v3232_v2  ;;  %v1240_v46 = vld [vmem:[#allocation12 + $0x148] sm:$0xff]  ;;  %v1223_v47 = vld [vmem:[#allocation12 + $0xc0] sm:$0xff]  ;;  %v1221_v48 = vld [vmem:[#allocation12 + $0xb0] sm:$0xff]  ;;  %s1431_s28 = ssub.f32 1.0, %s1428_s4 }
 0x585   :  { %1253 = vmatprep.subr.mxu0 %v1236_v35  ;;  %2704 = vmatpush3.msra.mxu1 %v1243_v44  ;;  %v1237_v50 = vld [vmem:[#allocation12 + $0x130] sm:$0xff]  ;;  %v1220_v51 = vld [vmem:[#allocation12 + $0xa8] sm:$0xff]  ;;  %v1218_v52 = vld [vmem:[#allocation12 + $0x98] sm:$0xff]  ;;  %v1429_v44 = vstv %s1428_s4 }
 0x586   :  { %1254 = vmatpush1.msra.mxu0 %v1235_v36  ;;  %2705 = vmatprep.subr.mxu1 %v3232_v2  ;;  %v1234_v53 = vld [vmem:[#allocation12 + $0x118] sm:$0xff]  ;;  %v1217_v54 = vld [vmem:[#allocation12 + $0x90] sm:$0xff]  ;;  %v1215_v29 = vld [vmem:[#allocation12 + $0x80] sm:$0xff] }
 0x587   :  { %1255 = vmatprep.subr.mxu0 %v1233_v37  ;;  %2706 = vmatpush3.msra.mxu1 %v1240_v46  ;;  %v1231_v55 = vld [vmem:[#allocation12 + $0x100] sm:$0xff]  ;;  %v1214_v56 = vld [vmem:[#allocation12 + $0x78] sm:$0xff]  ;;  %v1212_v59 = vld [vmem:[#allocation12 + $0x68] sm:$0xff] }
 0x588   :  { %1256 = vmatpush1.msra.mxu0 %v1232_v38  ;;  %2707 = vmatprep.subr.mxu1 %v3232_v2  ;;  %v1228_v60 = vld [vmem:[#allocation12 + $0xe8] sm:$0xff]  ;;  %v1211_v61 = vld [vmem:[#allocation12 + $0x60] sm:$0xff]  ;;  %v1209_v62 = vld [vmem:[#allocation12 + $0x50] sm:$0xff] }
 0x589   :  { %1257 = vmatprep.subr.mxu0 %v1230_v39  ;;  %2708 = vmatpush3.msra.mxu1 %v1237_v50  ;;  %v1225_v63 = vld [vmem:[#allocation12 + $0xd0] sm:$0xff]  ;;  %v1208_v3 = vld [vmem:[#allocation12 + $0x48] sm:$0xff]  ;;  %v1206_v4 = vld [vmem:[#allocation12 + $0x38] sm:$0xff] }
 0x58a   :  { %1258 = vmatpush1.msra.mxu0 %v1229_v40  ;;  %2709 = vmatprep.subr.mxu1 %v3232_v2  ;;  %v1222_v5 = vld [vmem:[#allocation12 + $0xb8] sm:$0xff]  ;;  %v1205_v6 = vld [vmem:[#allocation12 + $0x30] sm:$0xff]  ;;  %v1203_v7 = vld [vmem:[#allocation12 + $0x20] sm:$0xff] }
 0x58b   :  { %1259 = vmatprep.subr.mxu0 %v1227_v41  ;;  %2710 = vmatpush3.msra.mxu1 %v1234_v53  ;;  %v1219_v8 = vld [vmem:[#allocation12 + $0xa0] sm:$0xff]  ;;  %v1202_v10 = vld [vmem:[#allocation12 + $0x18] sm:$0xff]  ;;  %v1200_v11 = vld [vmem:[#allocation12 + $0x8] sm:$0xff]  ;;  %v1432_v41 = vstv %s1431_s28 }
 0x58c   :  { %1260 = vmatpush1.msra.mxu0 %v1226_v43  ;;  %2711 = vmatprep.subr.mxu1 %v3232_v2  ;;  %v1216_v12 = vld [vmem:[#allocation12 + $0x88] sm:$0xff]  ;;  %v1199_v13 = vld [vmem:[#allocation12] sm:$0xff]  ;;  %v1213_v15 = vld [vmem:[#allocation12 + $0x70] sm:$0xff]  ;;  %v1433_v46 = vmul.f32 %v1432_v41, %v3591_v28 }
 0x58d   :  { %1261 = vmatprep.subr.mxu0 %v1224_v45  ;;  %2712 = vmatpush3.msra.mxu1 %v1231_v55  ;;  %v1210_v49 = vld [vmem:[#allocation12 + $0x58] sm:$0xff]  ;;  %v1207_v16 = vld [vmem:[#allocation12 + $0x40] sm:$0xff]  ;;  %v1204_v17 = vld [vmem:[#allocation12 + $0x28] sm:$0xff] }
 0x58e   :  { %1262 = vmatpush1.msra.mxu0 %v1223_v47  ;;  %2713 = vmatprep.subr.mxu1 %v3232_v2  ;;  %v1201_v18 = vld [vmem:[#allocation12 + $0x10] sm:$0xff] }
 0x58f   :  { %1263 = vmatprep.subr.mxu0 %v1221_v48  ;;  %2714 = vmatpush3.msra.mxu1 %v1228_v60  ;;  %v1198_v24 = vld [vmem:[#allocation2 + $0x4] ss:$8 sm:$0x7] }
 0x590   :  { %1264 = vmatpush1.msra.mxu0 %v1220_v51  ;;  %2715 = vmatprep.subr.mxu1 %v3232_v2  ;;  %v1415_v9 = vrot.slane %v1198_v24, 2 }
 0x591   :  { %1265 = vmatprep.subr.mxu0 %v1218_v52  ;;  %2716 = vmatpush3.msra.mxu1 %v1225_v63 }
 0x592   :  { %1266 = vmatpush1.msra.mxu0 %v1217_v54  ;;  %2717 = vmatprep.subr.mxu1 %v3232_v2 }
 0x593   :  { %1267 = vmatprep.subr.mxu0 %v1215_v29  ;;  %2718 = vmatpush3.msra.mxu1 %v1222_v5 }
 0x594   :  { %1268 = vmatpush1.msra.mxu0 %v1214_v56  ;;  %2719 = vmatprep.subr.mxu1 %v3232_v2 }
 0x595   :  { %1269 = vmatprep.subr.mxu0 %v1212_v59  ;;  %2720 = vmatpush3.msra.mxu1 %v1219_v8 }
 0x596   :  { %1270 = vmatpush1.msra.mxu0 %v1211_v61  ;;  %2721 = vmatprep.subr.mxu1 %v3232_v2 }
 0x597   :  { %1271 = vmatprep.subr.mxu0 %v1209_v62  ;;  %2722 = vmatpush3.msra.mxu1 %v1216_v12 }
 0x598   :  { %1272 = vmatpush1.msra.mxu0 %v1208_v3  ;;  %2723 = vmatprep.subr.mxu1 %v3232_v2 }
 0x599   :  { %1273 = vmatprep.subr.mxu0 %v1206_v4  ;;  %2724 = vmatpush3.msra.mxu1 %v1213_v15 }
 0x59a   :  { %1274 = vmatpush1.msra.mxu0 %v1205_v6  ;;  %2725 = vmatprep.subr.mxu1 %v3232_v2 }
 0x59b   :  { %1275 = vmatprep.subr.mxu0 %v1203_v7  ;;  %2726 = vmatpush3.msra.mxu1 %v1210_v49 }
 0x59c   :  { %1276 = vmatpush1.msra.mxu0 %v1202_v10  ;;  %2727 = vmatprep.subr.mxu1 %v3232_v2 }
 0x59d   :  { %1277 = vmatprep.subr.mxu0 %v1200_v11  ;;  %2728 = vmatpush3.msra.mxu1 %v1207_v16 }
 0x59e   :  { %1278 = vmatpush1.msra.mxu0 %v1199_v13  ;;  %2729 = vmatprep.subr.mxu1 %v3232_v2 }
 0x59f   :  { %1312 = vmatmul.mubr.f32.vlgmr.msra.gmra.mxu0 %v3591_v28  ;;  %2730 = vmatpush3.msra.mxu1 %v1204_v17 }
 0x5a0   :  { %2731 = vmatprep.subr.mxu1 %v3232_v2 }
 0x5a1   :  { %2732 = vmatpush3.msra.mxu1 %v1201_v18 }
 0x5a2   :  { %2734 = vmatmul.mubr.f32.vlgmr.msra.gmra.mxu1 %v3591_v28 }
 0x65f   :  { %v1313_v19 = vpop.f32.mrf.mxu0 }
 0x660   :  { %v1314_v21 = vadd.f32 %v1313_v19, %v3474_v57 }
 0x661   :  { %v1315_v20 = vpop.f32.mrf.mxu0 }
 0x662   :  { %v1316_v22 = vadd.f32 %v1315_v20, %v3477_v58  ;;  %v1384_v26 = vpop.f32.mrf.mxu1 }
 0x663   :  { %v1385_v34 = vadd.f32 %v1384_v26, %v3486_v14 }
 0x664   :  { %v1390_v23 = vcombine.low %v1314_v21, %v1316_v22  ;;  %v2735_v30 = vpop.f32.mrf.mxu1 }
 0x666   :  { %v1397_v1 = vrot.slane %v1390_v23, %v3481_v0 }
 0x668   :  { %v1404_v25 = vrot.slane %v1397_v1, %v3481_v0 }
 0x66a   :  { %v1406_v27 = vadd.f32 %v1404_v25, %v1198_v24 }
 0x66c   :  { %v2394_v31 = vmul.f32 -1.442695, %v1406_v27 }
 0x66e   :  { %2919 = vpow2.f32 %v2394_v31 }
 0x67b   :  { %v2920_v32 = vpop.eup %2919 }
 0x67c   :  { %v1410_v33 = vadd.f32 1.0, %v2920_v32 }
 0x67e   :  { %2921 = vrcp.f32 %v1410_v33 }
 0x68b   :  { %v2922_v35 = vpop.eup %2921 }
 0x68c   :  { %v1413_v36 = vmul.f32 %v2922_v35, %v1385_v34  ;;  %v1420_v38 = vrot.slane %v2922_v35, 1 }
 0x68e   :  { %v1417_v37 = vadd.f32 %v1415_v9, %v1413_v36  ;;  %v1422_v39 = vsub.f32 1.0, %v1420_v38  ;;  %v1424_v43 = vmul.f32 %v1420_v38, %v3591_v28 }
 0x690   :  { %2923 = vtanh.f32 %v1417_v37 }
 0x69d   :  { %v2924_v40 = vpop.eup %2923 }
 0x69e   :  { %v1423_v42 = vmul.f32 %v2924_v40, %v1422_v39 }
 0x6a0   :  { %v1425_v45 = vadd.f32 %v1424_v43, %v1423_v42 }
 0x6a2   :  { %v1430_v47 = vmul.f32 %v1429_v44, %v1425_v45 }
 0x6a4   :  { %v3624_v48 = vadd.f32 %v1433_v46, %v1430_v47 }
 0x6a5   :  { %3205 = dma.done.wait [#allocation5 + $0x5], 48 }
 0x6a6   :  { %3206 = vsyncadd [#allocation5 + $0x5], 4294967248  ;;  %1551 = vmatprep.mubr.f32.mxu0 %v3232_v2  ;;  %2736 = vmatprep.subr.mxu1 %v3232_v2  ;;  %v1485_v50 = vld [vmem:[#allocation12 + $0x170] sm:$0xff]  ;;  %v1484_v51 = vld [vmem:[#allocation12 + $0x168] sm:$0xff]  ;;  %p1666_p2 = scmp.gt.s32.totalorder %s3744_s0, 5 }
 0x6a7   :  { %2768 = vmatprep.mubr.msk.f32.mxu1 %vm3233_vm0, %v3232_v2  ;;  %v1482_v52 = vld [vmem:[#allocation12 + $0x158] sm:$0xff]  ;;  %1487 = vmatprep.subr.mxu0 %v1485_v50  ;;  %v1481_v53 = vld [vmem:[#allocation12 + $0x150] sm:$0xff]  ;;  %v1479_v54 = vld [vmem:[#allocation12 + $0x140] sm:$0xff] }
 0x6a8   :  { %1488 = vmatpush1.msra.mxu0 %v1484_v51  ;;  %v1478_v28 = vld [vmem:[#allocation12 + $0x138] sm:$0xff]  ;;  %v1476_v29 = vld [vmem:[#allocation12 + $0x128] sm:$0xff]  ;;  %v1475_v55 = vld [vmem:[#allocation12 + $0x120] sm:$0xff]  ;;  %s1667_s8 = scalar_select %p1666_p2, 1, 0 }
 0x6a9   :  { %1489 = vmatprep.subr.mxu0 %v1482_v52  ;;  %v1473_v56 = vld [vmem:[#allocation12 + $0x110] sm:$0xff]  ;;  %v1472_v59 = vld [vmem:[#allocation12 + $0x108] sm:$0xff]  ;;  %v1470_v60 = vld [vmem:[#allocation12 + $0xf8] sm:$0xff] }
 0x6aa   :  { %1490 = vmatpush1.msra.mxu0 %v1481_v53  ;;  %v1469_v61 = vld [vmem:[#allocation12 + $0xf0] sm:$0xff]  ;;  %v1467_v62 = vld [vmem:[#allocation12 + $0xe0] sm:$0xff]  ;;  %v1486_v63 = vld [vmem:[#allocation12 + $0x178] sm:$0xff]  ;;  %s1668_s10 = scvt.s32.f32 %s1667_s8 }
 0x6ab   :  { %1491 = vmatprep.subr.mxu0 %v1479_v54  ;;  %v1466_v3 = vld [vmem:[#allocation12 + $0xd8] sm:$0xff]  ;;  %2737 = vmatpush3.msra.mxu1 %v1486_v63  ;;  %v1483_v4 = vld [vmem:[#allocation12 + $0x160] sm:$0xff]  ;;  %v1464_v5 = vld [vmem:[#allocation12 + $0xc8] sm:$0xff] }
 0x6ac   :  { %1492 = vmatpush1.msra.mxu0 %v1478_v28  ;;  %2738 = vmatprep.subr.mxu1 %v3232_v2  ;;  %v1480_v6 = vld [vmem:[#allocation12 + $0x148] sm:$0xff]  ;;  %v1463_v7 = vld [vmem:[#allocation12 + $0xc0] sm:$0xff]  ;;  %v1461_v8 = vld [vmem:[#allocation12 + $0xb0] sm:$0xff]  ;;  %s1671_s2 = ssub.f32 1.0, %s1668_s10 }
 0x6ad   :  { %1493 = vmatprep.subr.mxu0 %v1476_v29  ;;  %2739 = vmatpush3.msra.mxu1 %v1483_v4  ;;  %v1477_v10 = vld [vmem:[#allocation12 + $0x130] sm:$0xff]  ;;  %v1460_v11 = vld [vmem:[#allocation12 + $0xa8] sm:$0xff]  ;;  %v1458_v12 = vld [vmem:[#allocation12 + $0x98] sm:$0xff]  ;;  %v1669_v4 = vstv %s1668_s10 }
 0x6ae   :  { %1494 = vmatpush1.msra.mxu0 %v1475_v55  ;;  %2740 = vmatprep.subr.mxu1 %v3232_v2  ;;  %v1474_v13 = vld [vmem:[#allocation12 + $0x118] sm:$0xff]  ;;  %v1457_v15 = vld [vmem:[#allocation12 + $0x90] sm:$0xff]  ;;  %v1455_v49 = vld [vmem:[#allocation12 + $0x80] sm:$0xff] }
 0x6af   :  { %1495 = vmatprep.subr.mxu0 %v1473_v56  ;;  %2741 = vmatpush3.msra.mxu1 %v1480_v6  ;;  %v1471_v16 = vld [vmem:[#allocation12 + $0x100] sm:$0xff]  ;;  %v1454_v17 = vld [vmem:[#allocation12 + $0x78] sm:$0xff]  ;;  %v1452_v18 = vld [vmem:[#allocation12 + $0x68] sm:$0xff] }
 0x6b0   :  { %1496 = vmatpush1.msra.mxu0 %v1472_v59  ;;  %2742 = vmatprep.subr.mxu1 %v3232_v2  ;;  %v1468_v19 = vld [vmem:[#allocation12 + $0xe8] sm:$0xff]  ;;  %v1451_v20 = vld [vmem:[#allocation12 + $0x60] sm:$0xff]  ;;  %v1449_v21 = vld [vmem:[#allocation12 + $0x50] sm:$0xff] }
 0x6b1   :  { %1497 = vmatprep.subr.mxu0 %v1470_v60  ;;  %2743 = vmatpush3.msra.mxu1 %v1477_v10  ;;  %v1465_v22 = vld [vmem:[#allocation12 + $0xd0] sm:$0xff]  ;;  %v1448_v23 = vld [vmem:[#allocation12 + $0x48] sm:$0xff]  ;;  %v1446_v1 = vld [vmem:[#allocation12 + $0x38] sm:$0xff] }
 0x6b2   :  { %1498 = vmatpush1.msra.mxu0 %v1469_v61  ;;  %2744 = vmatprep.subr.mxu1 %v3232_v2  ;;  %v1462_v24 = vld [vmem:[#allocation12 + $0xb8] sm:$0xff]  ;;  %v1445_v25 = vld [vmem:[#allocation12 + $0x30] sm:$0xff]  ;;  %v1443_v26 = vld [vmem:[#allocation12 + $0x20] sm:$0xff] }
 0x6b3   :  { %1499 = vmatprep.subr.mxu0 %v1467_v62  ;;  %2745 = vmatpush3.msra.mxu1 %v1474_v13  ;;  %v1459_v27 = vld [vmem:[#allocation12 + $0xa0] sm:$0xff]  ;;  %v1442_v30 = vld [vmem:[#allocation12 + $0x18] sm:$0xff]  ;;  %v1440_v31 = vld [vmem:[#allocation12 + $0x8] sm:$0xff]  ;;  %v1672_v62 = vstv %s1671_s2 }
 0x6b4   :  { %1500 = vmatpush1.msra.mxu0 %v1466_v3  ;;  %2746 = vmatprep.subr.mxu1 %v3232_v2  ;;  %v1456_v32 = vld [vmem:[#allocation12 + $0x88] sm:$0xff]  ;;  %v1439_v33 = vld [vmem:[#allocation12] sm:$0xff]  ;;  %v1453_v34 = vld [vmem:[#allocation12 + $0x70] sm:$0xff]  ;;  %v1673_v6 = vmul.f32 %v1672_v62, %v3624_v48 }
 0x6b5   :  { %1501 = vmatprep.subr.mxu0 %v1464_v5  ;;  %2747 = vmatpush3.msra.mxu1 %v1471_v16  ;;  %v1450_v9 = vld [vmem:[#allocation12 + $0x58] sm:$0xff]  ;;  %v1447_v35 = vld [vmem:[#allocation12 + $0x40] sm:$0xff]  ;;  %v1444_v36 = vld [vmem:[#allocation12 + $0x28] sm:$0xff] }
 0x6b6   :  { %1502 = vmatpush1.msra.mxu0 %v1463_v7  ;;  %2748 = vmatprep.subr.mxu1 %v3232_v2  ;;  %v1441_v37 = vld [vmem:[#allocation12 + $0x10] sm:$0xff] }
 0x6b7   :  { %1503 = vmatprep.subr.mxu0 %v1461_v8  ;;  %2749 = vmatpush3.msra.mxu1 %v1468_v19  ;;  %v1438_v44 = vld [vmem:[#allocation2 + $0x5] ss:$8 sm:$0x7] }
 0x6b8   :  { %1504 = vmatpush1.msra.mxu0 %v1460_v11  ;;  %2750 = vmatprep.subr.mxu1 %v3232_v2  ;;  %v1655_v28 = vrot.slane %v1438_v44, 2 }
 0x6b9   :  { %1505 = vmatprep.subr.mxu0 %v1458_v12  ;;  %2751 = vmatpush3.msra.mxu1 %v1465_v22 }
 0x6ba   :  { %1506 = vmatpush1.msra.mxu0 %v1457_v15  ;;  %2752 = vmatprep.subr.mxu1 %v3232_v2 }
 0x6bb   :  { %1507 = vmatprep.subr.mxu0 %v1455_v49  ;;  %2753 = vmatpush3.msra.mxu1 %v1462_v24 }
 0x6bc   :  { %1508 = vmatpush1.msra.mxu0 %v1454_v17  ;;  %2754 = vmatprep.subr.mxu1 %v3232_v2 }
 0x6bd   :  { %1509 = vmatprep.subr.mxu0 %v1452_v18  ;;  %2755 = vmatpush3.msra.mxu1 %v1459_v27 }
 0x6be   :  { %1510 = vmatpush1.msra.mxu0 %v1451_v20  ;;  %2756 = vmatprep.subr.mxu1 %v3232_v2 }
 0x6bf   :  { %1511 = vmatprep.subr.mxu0 %v1449_v21  ;;  %2757 = vmatpush3.msra.mxu1 %v1456_v32 }
 0x6c0   :  { %1512 = vmatpush1.msra.mxu0 %v1448_v23  ;;  %2758 = vmatprep.subr.mxu1 %v3232_v2 }
 0x6c1   :  { %1513 = vmatprep.subr.mxu0 %v1446_v1  ;;  %2759 = vmatpush3.msra.mxu1 %v1453_v34 }
 0x6c2   :  { %1514 = vmatpush1.msra.mxu0 %v1445_v25  ;;  %2760 = vmatprep.subr.mxu1 %v3232_v2 }
 0x6c3   :  { %1515 = vmatprep.subr.mxu0 %v1443_v26  ;;  %2761 = vmatpush3.msra.mxu1 %v1450_v9 }
 0x6c4   :  { %1516 = vmatpush1.msra.mxu0 %v1442_v30  ;;  %2762 = vmatprep.subr.mxu1 %v3232_v2 }
 0x6c5   :  { %1517 = vmatprep.subr.mxu0 %v1440_v31  ;;  %2763 = vmatpush3.msra.mxu1 %v1447_v35 }
 0x6c6   :  { %1518 = vmatpush1.msra.mxu0 %v1439_v33  ;;  %2764 = vmatprep.subr.mxu1 %v3232_v2 }
 0x6c7   :  { %1552 = vmatmul.mubr.f32.vlgmr.msra.gmra.mxu0 %v3624_v48  ;;  %2765 = vmatpush3.msra.mxu1 %v1444_v36 }
 0x6c8   :  { %2766 = vmatprep.subr.mxu1 %v3232_v2 }
 0x6c9   :  { %2767 = vmatpush3.msra.mxu1 %v1441_v37 }
 0x6ca   :  { %2769 = vmatmul.mubr.f32.vlgmr.msra.gmra.mxu1 %v3624_v48 }
 0x787   :  { %v1553_v38 = vpop.f32.mrf.mxu0 }
 0x788   :  { %v1554_v40 = vadd.f32 %v1553_v38, %v3474_v57 }
 0x789   :  { %v1555_v39 = vpop.f32.mrf.mxu0 }
 0x78a   :  { %v1556_v41 = vadd.f32 %v1555_v39, %v3477_v58  ;;  %v1624_v46 = vpop.f32.mrf.mxu1 }
 0x78b   :  { %v1625_v54 = vadd.f32 %v1624_v46, %v3486_v14 }
 0x78c   :  { %v1630_v42 = vcombine.low %v1554_v40, %v1556_v41  ;;  %v2770_v50 = vpop.f32.mrf.mxu1 }
 0x78e   :  { %v1637_v43 = vrot.slane %v1630_v42, %v3481_v0 }
 0x790   :  { %v1644_v45 = vrot.slane %v1637_v43, %v3481_v0 }
 0x792   :  { %v1646_v47 = vadd.f32 %v1644_v45, %v1438_v44 }
 0x794   :  { %v2395_v51 = vmul.f32 -1.442695, %v1646_v47 }
 0x796   :  { %2925 = vpow2.f32 %v2395_v51 }
 0x7a3   :  { %v2926_v52 = vpop.eup %2925 }
 0x7a4   :  { %v1650_v53 = vadd.f32 1.0, %v2926_v52 }
 0x7a6   :  { %2927 = vrcp.f32 %v1650_v53 }
 0x7b3   :  { %v2928_v29 = vpop.eup %2927 }
 0x7b4   :  { %v1653_v55 = vmul.f32 %v2928_v29, %v1625_v54  ;;  %v1660_v59 = vrot.slane %v2928_v29, 1 }
 0x7b6   :  { %v1657_v56 = vadd.f32 %v1655_v28, %v1653_v55  ;;  %v1662_v60 = vsub.f32 1.0, %v1660_v59  ;;  %v1664_v3 = vmul.f32 %v1660_v59, %v3624_v48 }
 0x7b8   :  { %2929 = vtanh.f32 %v1657_v56 }
 0x7c5   :  { %v2930_v61 = vpop.eup %2929 }
 0x7c6   :  { %v1663_v63 = vmul.f32 %v2930_v61, %v1662_v60 }
 0x7c8   :  { %v1665_v5 = vadd.f32 %v1664_v3, %v1663_v63 }
 0x7ca   :  { %v1670_v7 = vmul.f32 %v1669_v4, %v1665_v5 }
 0x7cc   :  { %v3657_v8 = vadd.f32 %v1673_v6, %v1670_v7 }
 0x7cd   :  { %3207 = dma.done.wait [#allocation5 + $0x6], 48 }
 0x7ce   :  { %3208 = vsyncadd [#allocation5 + $0x6], 4294967248  ;;  %1791 = vmatprep.mubr.f32.mxu0 %v3232_v2  ;;  %2771 = vmatprep.subr.mxu1 %v3232_v2  ;;  %v1725_v10 = vld [vmem:[#allocation12 + $0x170] sm:$0xff]  ;;  %v1724_v11 = vld [vmem:[#allocation12 + $0x168] sm:$0xff]  ;;  %p1906_p3 = scmp.gt.s32.totalorder %s3744_s0, 6 }
 0x7cf   :  { %2803 = vmatprep.mubr.msk.f32.mxu1 %vm3233_vm0, %v3232_v2  ;;  %v1722_v12 = vld [vmem:[#allocation12 + $0x158] sm:$0xff]  ;;  %1727 = vmatprep.subr.mxu0 %v1725_v10  ;;  %v1721_v13 = vld [vmem:[#allocation12 + $0x150] sm:$0xff]  ;;  %v1719_v15 = vld [vmem:[#allocation12 + $0x140] sm:$0xff] }
 0x7d0   :  { %1728 = vmatpush1.msra.mxu0 %v1724_v11  ;;  %v1718_v48 = vld [vmem:[#allocation12 + $0x138] sm:$0xff]  ;;  %v1716_v49 = vld [vmem:[#allocation12 + $0x128] sm:$0xff]  ;;  %v1715_v16 = vld [vmem:[#allocation12 + $0x120] sm:$0xff]  ;;  %s1907_s6 = scalar_select %p1906_p3, 1, 0 }
 0x7d1   :  { %1729 = vmatprep.subr.mxu0 %v1722_v12  ;;  %v1713_v17 = vld [vmem:[#allocation12 + $0x110] sm:$0xff]  ;;  %v1712_v18 = vld [vmem:[#allocation12 + $0x108] sm:$0xff]  ;;  %v1710_v19 = vld [vmem:[#allocation12 + $0xf8] sm:$0xff] }
 0x7d2   :  { %1730 = vmatpush1.msra.mxu0 %v1721_v13  ;;  %v1709_v20 = vld [vmem:[#allocation12 + $0xf0] sm:$0xff]  ;;  %v1707_v21 = vld [vmem:[#allocation12 + $0xe0] sm:$0xff]  ;;  %v1726_v22 = vld [vmem:[#allocation12 + $0x178] sm:$0xff]  ;;  %s1908_s22 = scvt.s32.f32 %s1907_s6 }
 0x7d3   :  { %1731 = vmatprep.subr.mxu0 %v1719_v15  ;;  %v1706_v23 = vld [vmem:[#allocation12 + $0xd8] sm:$0xff]  ;;  %2772 = vmatpush3.msra.mxu1 %v1726_v22  ;;  %v1723_v1 = vld [vmem:[#allocation12 + $0x160] sm:$0xff]  ;;  %v1704_v24 = vld [vmem:[#allocation12 + $0xc8] sm:$0xff] }
 0x7d4   :  { %1732 = vmatpush1.msra.mxu0 %v1718_v48  ;;  %2773 = vmatprep.subr.mxu1 %v3232_v2  ;;  %v1720_v25 = vld [vmem:[#allocation12 + $0x148] sm:$0xff]  ;;  %v1703_v26 = vld [vmem:[#allocation12 + $0xc0] sm:$0xff]  ;;  %v1701_v27 = vld [vmem:[#allocation12 + $0xb0] sm:$0xff]  ;;  %s1911_s23 = ssub.f32 1.0, %s1908_s22 }
 0x7d5   :  { %1733 = vmatprep.subr.mxu0 %v1716_v49  ;;  %2774 = vmatpush3.msra.mxu1 %v1723_v1  ;;  %v1717_v30 = vld [vmem:[#allocation12 + $0x130] sm:$0xff]  ;;  %v1700_v31 = vld [vmem:[#allocation12 + $0xa8] sm:$0xff]  ;;  %v1698_v32 = vld [vmem:[#allocation12 + $0x98] sm:$0xff]  ;;  %v1909_v1 = vstv %s1908_s22 }
 0x7d6   :  { %1734 = vmatpush1.msra.mxu0 %v1715_v16  ;;  %2775 = vmatprep.subr.mxu1 %v3232_v2  ;;  %v1714_v33 = vld [vmem:[#allocation12 + $0x118] sm:$0xff]  ;;  %v1697_v34 = vld [vmem:[#allocation12 + $0x90] sm:$0xff]  ;;  %v1695_v9 = vld [vmem:[#allocation12 + $0x80] sm:$0xff] }
 0x7d7   :  { %1735 = vmatprep.subr.mxu0 %v1713_v17  ;;  %2776 = vmatpush3.msra.mxu1 %v1720_v25  ;;  %v1711_v35 = vld [vmem:[#allocation12 + $0x100] sm:$0xff]  ;;  %v1694_v36 = vld [vmem:[#allocation12 + $0x78] sm:$0xff]  ;;  %v1692_v37 = vld [vmem:[#allocation12 + $0x68] sm:$0xff] }
 0x7d8   :  { %1736 = vmatpush1.msra.mxu0 %v1712_v18  ;;  %2777 = vmatprep.subr.mxu1 %v3232_v2  ;;  %v1708_v38 = vld [vmem:[#allocation12 + $0xe8] sm:$0xff]  ;;  %v1691_v39 = vld [vmem:[#allocation12 + $0x60] sm:$0xff]  ;;  %v1689_v40 = vld [vmem:[#allocation12 + $0x50] sm:$0xff] }
 0x7d9   :  { %1737 = vmatprep.subr.mxu0 %v1710_v19  ;;  %2778 = vmatpush3.msra.mxu1 %v1717_v30  ;;  %v1705_v41 = vld [vmem:[#allocation12 + $0xd0] sm:$0xff]  ;;  %v1688_v42 = vld [vmem:[#allocation12 + $0x48] sm:$0xff]  ;;  %v1686_v43 = vld [vmem:[#allocation12 + $0x38] sm:$0xff] }
 0x7da   :  { %1738 = vmatpush1.msra.mxu0 %v1709_v20  ;;  %2779 = vmatprep.subr.mxu1 %v3232_v2  ;;  %v1702_v44 = vld [vmem:[#allocation12 + $0xb8] sm:$0xff]  ;;  %v1685_v45 = vld [vmem:[#allocation12 + $0x30] sm:$0xff]  ;;  %v1683_v46 = vld [vmem:[#allocation12 + $0x20] sm:$0xff] }
 0x7db   :  { %1739 = vmatprep.subr.mxu0 %v1707_v21  ;;  %2780 = vmatpush3.msra.mxu1 %v1714_v33  ;;  %v1699_v47 = vld [vmem:[#allocation12 + $0xa0] sm:$0xff]  ;;  %v1682_v50 = vld [vmem:[#allocation12 + $0x18] sm:$0xff]  ;;  %v1680_v51 = vld [vmem:[#allocation12 + $0x8] sm:$0xff]  ;;  %v1912_v21 = vstv %s1911_s23 }
 0x7dc   :  { %1740 = vmatpush1.msra.mxu0 %v1706_v23  ;;  %2781 = vmatprep.subr.mxu1 %v3232_v2  ;;  %v1696_v52 = vld [vmem:[#allocation12 + $0x88] sm:$0xff]  ;;  %v1679_v53 = vld [vmem:[#allocation12] sm:$0xff]  ;;  %v1693_v54 = vld [vmem:[#allocation12 + $0x70] sm:$0xff]  ;;  %v1913_v25 = vmul.f32 %v1912_v21, %v3657_v8 }
 0x7dd   :  { %1741 = vmatprep.subr.mxu0 %v1704_v24  ;;  %2782 = vmatpush3.msra.mxu1 %v1711_v35  ;;  %v1690_v28 = vld [vmem:[#allocation12 + $0x58] sm:$0xff]  ;;  %v1687_v29 = vld [vmem:[#allocation12 + $0x40] sm:$0xff]  ;;  %v1684_v55 = vld [vmem:[#allocation12 + $0x28] sm:$0xff] }
 0x7de   :  { %1742 = vmatpush1.msra.mxu0 %v1703_v26  ;;  %2783 = vmatprep.subr.mxu1 %v3232_v2  ;;  %v1681_v56 = vld [vmem:[#allocation12 + $0x10] sm:$0xff] }
 0x7df   :  { %1743 = vmatprep.subr.mxu0 %v1701_v27  ;;  %2784 = vmatpush3.msra.mxu1 %v1708_v38  ;;  %v1678_v4 = vld [vmem:[#allocation2 + $0x6] ss:$8 sm:$0x7] }
 0x7e0   :  { %1744 = vmatpush1.msra.mxu0 %v1700_v31  ;;  %2785 = vmatprep.subr.mxu1 %v3232_v2  ;;  %v1895_v48 = vrot.slane %v1678_v4, 2 }
 0x7e1   :  { %1745 = vmatprep.subr.mxu0 %v1698_v32  ;;  %2786 = vmatpush3.msra.mxu1 %v1705_v41 }
 0x7e2   :  { %1746 = vmatpush1.msra.mxu0 %v1697_v34  ;;  %2787 = vmatprep.subr.mxu1 %v3232_v2 }
 0x7e3   :  { %1747 = vmatprep.subr.mxu0 %v1695_v9  ;;  %2788 = vmatpush3.msra.mxu1 %v1702_v44 }
 0x7e4   :  { %1748 = vmatpush1.msra.mxu0 %v1694_v36  ;;  %2789 = vmatprep.subr.mxu1 %v3232_v2 }
 0x7e5   :  { %1749 = vmatprep.subr.mxu0 %v1692_v37  ;;  %2790 = vmatpush3.msra.mxu1 %v1699_v47 }
 0x7e6   :  { %1750 = vmatpush1.msra.mxu0 %v1691_v39  ;;  %2791 = vmatprep.subr.mxu1 %v3232_v2 }
 0x7e7   :  { %1751 = vmatprep.subr.mxu0 %v1689_v40  ;;  %2792 = vmatpush3.msra.mxu1 %v1696_v52 }
 0x7e8   :  { %1752 = vmatpush1.msra.mxu0 %v1688_v42  ;;  %2793 = vmatprep.subr.mxu1 %v3232_v2 }
 0x7e9   :  { %1753 = vmatprep.subr.mxu0 %v1686_v43  ;;  %2794 = vmatpush3.msra.mxu1 %v1693_v54 }
 0x7ea   :  { %1754 = vmatpush1.msra.mxu0 %v1685_v45  ;;  %2795 = vmatprep.subr.mxu1 %v3232_v2 }
 0x7eb   :  { %1755 = vmatprep.subr.mxu0 %v1683_v46  ;;  %2796 = vmatpush3.msra.mxu1 %v1690_v28 }
 0x7ec   :  { %1756 = vmatpush1.msra.mxu0 %v1682_v50  ;;  %2797 = vmatprep.subr.mxu1 %v3232_v2 }
 0x7ed   :  { %1757 = vmatprep.subr.mxu0 %v1680_v51  ;;  %2798 = vmatpush3.msra.mxu1 %v1687_v29 }
 0x7ee   :  { %1758 = vmatpush1.msra.mxu0 %v1679_v53  ;;  %2799 = vmatprep.subr.mxu1 %v3232_v2 }
 0x7ef   :  { %1792 = vmatmul.mubr.f32.vlgmr.msra.gmra.mxu0 %v3657_v8  ;;  %2800 = vmatpush3.msra.mxu1 %v1684_v55 }
 0x7f0   :  { %2801 = vmatprep.subr.mxu1 %v3232_v2 }
 0x7f1   :  { %2802 = vmatpush3.msra.mxu1 %v1681_v56 }
 0x7f2   :  { %2804 = vmatmul.mubr.f32.vlgmr.msra.gmra.mxu1 %v3657_v8 }
 0x8af   :  { %v1793_v59 = vpop.f32.mrf.mxu0 }
 0x8b0   :  { %v1794_v61 = vadd.f32 %v1793_v59, %v3474_v57 }
 0x8b1   :  { %v1795_v60 = vpop.f32.mrf.mxu0 }
 0x8b2   :  { %v1796_v62 = vadd.f32 %v1795_v60, %v3477_v58  ;;  %v1864_v6 = vpop.f32.mrf.mxu1 }
 0x8b3   :  { %v1865_v15 = vadd.f32 %v1864_v6, %v3486_v14 }
 0x8b4   :  { %v1870_v63 = vcombine.low %v1794_v61, %v1796_v62  ;;  %v2805_v10 = vpop.f32.mrf.mxu1 }
 0x8b6   :  { %v1877_v3 = vrot.slane %v1870_v63, %v3481_v0 }
 0x8b8   :  { %v1884_v5 = vrot.slane %v1877_v3, %v3481_v0 }
 0x8ba   :  { %v1886_v7 = vadd.f32 %v1884_v5, %v1678_v4 }
 0x8bc   :  { %v2396_v11 = vmul.f32 -1.442695, %v1886_v7 }
 0x8be   :  { %2931 = vpow2.f32 %v2396_v11 }
 0x8cb   :  { %v2932_v12 = vpop.eup %2931 }
 0x8cc   :  { %v1890_v13 = vadd.f32 1.0, %v2932_v12 }
 0x8ce   :  { %2933 = vrcp.f32 %v1890_v13 }
 0x8db   :  { %v2934_v49 = vpop.eup %2933 }
 0x8dc   :  { %v1893_v16 = vmul.f32 %v2934_v49, %v1865_v15  ;;  %v1900_v18 = vrot.slane %v2934_v49, 1 }
 0x8de   :  { %v1897_v17 = vadd.f32 %v1895_v48, %v1893_v16  ;;  %v1902_v19 = vsub.f32 1.0, %v1900_v18  ;;  %v1904_v23 = vmul.f32 %v1900_v18, %v3657_v8 }
 0x8e0   :  { %2935 = vtanh.f32 %v1897_v17 }
 0x8ed   :  { %v2936_v20 = vpop.eup %2935 }
 0x8ee   :  { %v1903_v22 = vmul.f32 %v2936_v20, %v1902_v19 }
 0x8f0   :  { %v1905_v24 = vadd.f32 %v1904_v23, %v1903_v22 }
 0x8f2   :  { %v1910_v26 = vmul.f32 %v1909_v1, %v1905_v24 }
 0x8f4   :  { %v3690_v27 = vadd.f32 %v1913_v25, %v1910_v26 }
 0x8f5   :  { %3209 = dma.done.wait [#allocation5 + $0x7], 48 }
 0x8f6   :  { %3210 = vsyncadd [#allocation5 + $0x7], 4294967248  ;;  %2031 = vmatprep.mubr.f32.mxu0 %v3232_v2  ;;  %2806 = vmatprep.subr.mxu1 %v3232_v2  ;;  %v1965_v30 = vld [vmem:[#allocation12 + $0x170] sm:$0xff]  ;;  %v1964_v31 = vld [vmem:[#allocation12 + $0x168] sm:$0xff]  ;;  %p2146_p4 = scmp.gt.s32.totalorder %s3744_s0, 7 }
 0x8f7   :  { %2838 = vmatprep.mubr.msk.f32.mxu1 %vm3233_vm0, %v3232_v2  ;;  %v1962_v32 = vld [vmem:[#allocation12 + $0x158] sm:$0xff]  ;;  %1967 = vmatprep.subr.mxu0 %v1965_v30  ;;  %v1961_v33 = vld [vmem:[#allocation12 + $0x150] sm:$0xff]  ;;  %v1959_v34 = vld [vmem:[#allocation12 + $0x140] sm:$0xff] }
 0x8f8   :  { %1968 = vmatpush1.msra.mxu0 %v1964_v31  ;;  %v1958_v8 = vld [vmem:[#allocation12 + $0x138] sm:$0xff]  ;;  %v1956_v9 = vld [vmem:[#allocation12 + $0x128] sm:$0xff]  ;;  %v1955_v35 = vld [vmem:[#allocation12 + $0x120] sm:$0xff]  ;;  %s2147_s14 = scalar_select %p2146_p4, 1, 0 }
 0x8f9   :  { %1969 = vmatprep.subr.mxu0 %v1962_v32  ;;  %v1953_v36 = vld [vmem:[#allocation12 + $0x110] sm:$0xff]  ;;  %v1952_v37 = vld [vmem:[#allocation12 + $0x108] sm:$0xff]  ;;  %v1950_v38 = vld [vmem:[#allocation12 + $0xf8] sm:$0xff] }
 0x8fa   :  { %1970 = vmatpush1.msra.mxu0 %v1961_v33  ;;  %v1949_v39 = vld [vmem:[#allocation12 + $0xf0] sm:$0xff]  ;;  %v1947_v40 = vld [vmem:[#allocation12 + $0xe0] sm:$0xff]  ;;  %v1966_v41 = vld [vmem:[#allocation12 + $0x178] sm:$0xff]  ;;  %s2148_s25 = scvt.s32.f32 %s2147_s14 }
 0x8fb   :  { %1971 = vmatprep.subr.mxu0 %v1959_v34  ;;  %v1946_v42 = vld [vmem:[#allocation12 + $0xd8] sm:$0xff]  ;;  %2807 = vmatpush3.msra.mxu1 %v1966_v41  ;;  %v1963_v43 = vld [vmem:[#allocation12 + $0x160] sm:$0xff]  ;;  %v1944_v44 = vld [vmem:[#allocation12 + $0xc8] sm:$0xff] }
 0x8fc   :  { %1972 = vmatpush1.msra.mxu0 %v1958_v8  ;;  %2808 = vmatprep.subr.mxu1 %v3232_v2  ;;  %v1960_v45 = vld [vmem:[#allocation12 + $0x148] sm:$0xff]  ;;  %v1943_v46 = vld [vmem:[#allocation12 + $0xc0] sm:$0xff]  ;;  %v1941_v47 = vld [vmem:[#allocation12 + $0xb0] sm:$0xff]  ;;  %s2151_s29 = ssub.f32 1.0, %s2148_s25 }
 0x8fd   :  { %1973 = vmatprep.subr.mxu0 %v1956_v9  ;;  %2809 = vmatpush3.msra.mxu1 %v1963_v43  ;;  %v1957_v50 = vld [vmem:[#allocation12 + $0x130] sm:$0xff]  ;;  %v1940_v51 = vld [vmem:[#allocation12 + $0xa8] sm:$0xff]  ;;  %v1938_v52 = vld [vmem:[#allocation12 + $0x98] sm:$0xff] }
 0x8fe   :  { %1974 = vmatpush1.msra.mxu0 %v1955_v35  ;;  %2810 = vmatprep.subr.mxu1 %v3232_v2  ;;  %v1954_v53 = vld [vmem:[#allocation12 + $0x118] sm:$0xff]  ;;  %v1937_v54 = vld [vmem:[#allocation12 + $0x90] sm:$0xff]  ;;  %v1935_v28 = vld [vmem:[#allocation12 + $0x80] sm:$0xff] }
 0x8ff   :  { %1975 = vmatprep.subr.mxu0 %v1953_v36  ;;  %2811 = vmatpush3.msra.mxu1 %v1960_v45  ;;  %v1951_v29 = vld [vmem:[#allocation12 + $0x100] sm:$0xff]  ;;  %v1934_v55 = vld [vmem:[#allocation12 + $0x78] sm:$0xff]  ;;  %v1932_v56 = vld [vmem:[#allocation12 + $0x68] sm:$0xff] }
 0x900   :  { %1976 = vmatpush1.msra.mxu0 %v1952_v37  ;;  %2812 = vmatprep.subr.mxu1 %v3232_v2  ;;  %v1948_v59 = vld [vmem:[#allocation12 + $0xe8] sm:$0xff]  ;;  %v1931_v60 = vld [vmem:[#allocation12 + $0x60] sm:$0xff]  ;;  %v1929_v61 = vld [vmem:[#allocation12 + $0x50] sm:$0xff]  ;;  %v2152_v37 = vstv %s2151_s29 }
 0x901   :  { %1977 = vmatprep.subr.mxu0 %v1950_v38  ;;  %2813 = vmatpush3.msra.mxu1 %v1957_v50  ;;  %v1945_v62 = vld [vmem:[#allocation12 + $0xd0] sm:$0xff]  ;;  %v1928_v63 = vld [vmem:[#allocation12 + $0x48] sm:$0xff]  ;;  %v1926_v3 = vld [vmem:[#allocation12 + $0x38] sm:$0xff]  ;;  %v2153_v41 = vmul.f32 %v2152_v37, %v3690_v27 }
 0x902   :  { %1978 = vmatpush1.msra.mxu0 %v1949_v39  ;;  %2814 = vmatprep.subr.mxu1 %v3232_v2  ;;  %v1942_v4 = vld [vmem:[#allocation12 + $0xb8] sm:$0xff]  ;;  %v1925_v5 = vld [vmem:[#allocation12 + $0x30] sm:$0xff]  ;;  %v1923_v6 = vld [vmem:[#allocation12 + $0x20] sm:$0xff] }
 0x903   :  { %1979 = vmatprep.subr.mxu0 %v1947_v40  ;;  %2815 = vmatpush3.msra.mxu1 %v1954_v53  ;;  %v1939_v7 = vld [vmem:[#allocation12 + $0xa0] sm:$0xff]  ;;  %v1922_v10 = vld [vmem:[#allocation12 + $0x18] sm:$0xff]  ;;  %v1920_v11 = vld [vmem:[#allocation12 + $0x8] sm:$0xff] }
 0x904   :  { %1980 = vmatpush1.msra.mxu0 %v1946_v42  ;;  %2816 = vmatprep.subr.mxu1 %v3232_v2  ;;  %v1936_v12 = vld [vmem:[#allocation12 + $0x88] sm:$0xff]  ;;  %v1919_v13 = vld [vmem:[#allocation12] sm:$0xff]  ;;  %v1933_v15 = vld [vmem:[#allocation12 + $0x70] sm:$0xff] }
 0x905   :  { %1981 = vmatprep.subr.mxu0 %v1944_v44  ;;  %2817 = vmatpush3.msra.mxu1 %v1951_v29  ;;  %v1930_v48 = vld [vmem:[#allocation12 + $0x58] sm:$0xff]  ;;  %v1927_v49 = vld [vmem:[#allocation12 + $0x40] sm:$0xff]  ;;  %v1924_v16 = vld [vmem:[#allocation12 + $0x28] sm:$0xff] }
 0x906   :  { %1982 = vmatpush1.msra.mxu0 %v1943_v46  ;;  %2818 = vmatprep.subr.mxu1 %v3232_v2  ;;  %v1921_v17 = vld [vmem:[#allocation12 + $0x10] sm:$0xff] }
 0x907   :  { %1983 = vmatprep.subr.mxu0 %v1941_v47  ;;  %2819 = vmatpush3.msra.mxu1 %v1948_v59  ;;  %v1918_v1 = vld [vmem:[#allocation2 + $0x7] ss:$8 sm:$0x7] }
 0x908   :  { %1984 = vmatpush1.msra.mxu0 %v1940_v51  ;;  %2820 = vmatprep.subr.mxu1 %v3232_v2  ;;  %v2135_v8 = vrot.slane %v1918_v1, 2 }
 0x909   :  { %1985 = vmatprep.subr.mxu0 %v1938_v52  ;;  %2821 = vmatpush3.msra.mxu1 %v1945_v62 }
 0x90a   :  { %1986 = vmatpush1.msra.mxu0 %v1937_v54  ;;  %2822 = vmatprep.subr.mxu1 %v3232_v2 }
 0x90b   :  { %1987 = vmatprep.subr.mxu0 %v1935_v28  ;;  %2823 = vmatpush3.msra.mxu1 %v1942_v4 }
 0x90c   :  { %1988 = vmatpush1.msra.mxu0 %v1934_v55  ;;  %2824 = vmatprep.subr.mxu1 %v3232_v2 }
 0x90d   :  { %1989 = vmatprep.subr.mxu0 %v1932_v56  ;;  %2825 = vmatpush3.msra.mxu1 %v1939_v7 }
 0x90e   :  { %1990 = vmatpush1.msra.mxu0 %v1931_v60  ;;  %2826 = vmatprep.subr.mxu1 %v3232_v2 }
 0x90f   :  { %1991 = vmatprep.subr.mxu0 %v1929_v61  ;;  %2827 = vmatpush3.msra.mxu1 %v1936_v12 }
 0x910   :  { %1992 = vmatpush1.msra.mxu0 %v1928_v63  ;;  %2828 = vmatprep.subr.mxu1 %v3232_v2 }
 0x911   :  { %1993 = vmatprep.subr.mxu0 %v1926_v3  ;;  %2829 = vmatpush3.msra.mxu1 %v1933_v15 }
 0x912   :  { %1994 = vmatpush1.msra.mxu0 %v1925_v5  ;;  %2830 = vmatprep.subr.mxu1 %v3232_v2 }
 0x913   :  { %1995 = vmatprep.subr.mxu0 %v1923_v6  ;;  %2831 = vmatpush3.msra.mxu1 %v1930_v48 }
 0x914   :  { %1996 = vmatpush1.msra.mxu0 %v1922_v10  ;;  %2832 = vmatprep.subr.mxu1 %v3232_v2 }
 0x915   :  { %1997 = vmatprep.subr.mxu0 %v1920_v11  ;;  %2833 = vmatpush3.msra.mxu1 %v1927_v49 }
 0x916   :  { %1998 = vmatpush1.msra.mxu0 %v1919_v13  ;;  %2834 = vmatprep.subr.mxu1 %v3232_v2 }
 0x917   :  { %2032 = vmatmul.mubr.f32.vlgmr.msra.gmra.mxu0 %v3690_v27  ;;  %2835 = vmatpush3.msra.mxu1 %v1924_v16 }
 0x918   :  { %2836 = vmatprep.subr.mxu1 %v3232_v2 }
 0x919   :  { %2837 = vmatpush3.msra.mxu1 %v1921_v17 }
 0x91a   :  { %2839 = vmatmul.mubr.f32.vlgmr.msra.gmra.mxu1 %v3690_v27 }
 0x9d7   :  { %v2033_v18 = vpop.f32.mrf.mxu0 }
 0x9d8   :  { %v2034_v20 = vadd.f32 %v2033_v18, %v3474_v57 }
 0x9d9   :  { %v2035_v19 = vpop.f32.mrf.mxu0 }
 0x9da   :  { %v2036_v21 = vadd.f32 %v2035_v19, %v3477_v58  ;;  %v2104_v25 = vpop.f32.mrf.mxu1 }
 0x9db   :  { %v2105_v34 = vadd.f32 %v2104_v25, %v3486_v14  ;;  %v2149_v14 = vstv %s2148_s25 }
 0x9dc   :  { %v2110_v22 = vcombine.low %v2034_v20, %v2036_v21  ;;  %v2840_v30 = vpop.f32.mrf.mxu1 }
 0x9de   :  { %v2117_v23 = vrot.slane %v2110_v22, %v3481_v0 }
 0x9e0   :  { %v2124_v24 = vrot.slane %v2117_v23, %v3481_v0 }
 0x9e2   :  { %v2126_v26 = vadd.f32 %v2124_v24, %v1918_v1 }
 0x9e4   :  { %v2397_v31 = vmul.f32 -1.442695, %v2126_v26 }
 0x9e6   :  { %2937 = vpow2.f32 %v2397_v31 }
 0x9f3   :  { %v2938_v32 = vpop.eup %2937 }
 0x9f4   :  { %v2130_v33 = vadd.f32 1.0, %v2938_v32 }
 0x9f6   :  { %2939 = vrcp.f32 %v2130_v33 }
 0xa03   :  { %v2940_v57 = vpop.eup %2939 }
 0xa04   :  { %v2133_v9 = vmul.f32 %v2940_v57, %v2105_v34  ;;  %v2140_v0 = vrot.slane %v2940_v57, 1 }
 0xa06   :  { %v2137_v58 = vadd.f32 %v2135_v8, %v2133_v9  ;;  %v2142_v35 = vsub.f32 1.0, %v2140_v0  ;;  %v2144_v39 = vmul.f32 %v2140_v0, %v3690_v27 }
 0xa08   :  { %2941 = vtanh.f32 %v2137_v58 }
 0xa15   :  { %v2942_v36 = vpop.eup %2941 }
 0xa16   :  { %v2143_v38 = vmul.f32 %v2942_v36, %v2142_v35 }
 0xa18   :  { %v2145_v40 = vadd.f32 %v2144_v39, %v2143_v38 }
 0xa1a   :  { %v2150_v42 = vmul.f32 %v2149_v14, %v2145_v40 }
 0xa1c   :  { %v2154_v43 = vadd.f32 %v2153_v41, %v2150_v42 }
 0xa1d   :  { %3211 = dma.done.wait [#allocation6], 2048 }
 0xa1e   :  { %3212 = vsyncadd [#allocation6], 4294965248 }
 0xa1f   :  { %3213 = dma.done.wait [#allocation6 + $0x1], 16 }
 0xa20   :  { %3214 = vsyncadd [#allocation6 + $0x1], 4294967280  ;;  %2841 = vmatprep.subr.mxu0 %v3232_v2  ;;  %2873 = vmatprep.mubr.msk.f32.mxu0 %vm3233_vm0, %v3232_v2  ;;  %v2176_v44 = vld [vmem:[#allocation3 + $0x78] sm:$0xff]  ;;  %v2175_v45 = vld [vmem:[#allocation3 + $0x70] sm:$0xff]  ;;  %s3235_s0 = smov [#allocation13]  }
 0xa21   :  { %2842 = vmatpush3.msra.mxu0 %v2176_v44  ;;  %v2174_v46 = vld [vmem:[#allocation3 + $0x68] sm:$0xff]  ;;  %v2173_v27 = vld [vmem:[#allocation3 + $0x60] sm:$0xff]  ;;  %v2172_v47 = vld [vmem:[#allocation3 + $0x58] sm:$0xff]  ;;  %s2255_s12 = sshll.u32 %s3235_s0, 4  ;;  %s2256_s12 = int_to_ptr.vmem [resolvable:$true] %s2255_s12 }
 0xa22   :  { %2843 = vmatprep.subr.mxu0 %v3232_v2  ;;  %v2171_v50 = vld [vmem:[#allocation3 + $0x50] sm:$0xff]  ;;  %v2170_v51 = vld [vmem:[#allocation3 + $0x48] sm:$0xff]  ;;  %v2169_v52 = vld [vmem:[#allocation3 + $0x40] sm:$0xff]  ;;  %s3171_s16 = scalar_lea.vmem %s2256_s12, 16  ;;  %s3175_s19 = scalar_lea.vmem %s2256_s12, 32 }
 0xa23   :  { %2844 = vmatpush3.msra.mxu0 %v2175_v45  ;;  %v2168_v53 = vld [vmem:[#allocation3 + $0x38] sm:$0xff]  ;;  %v2167_v54 = vld [vmem:[#allocation3 + $0x30] sm:$0xff]  ;;  %v2166_v28 = vld [vmem:[#allocation3 + $0x28] sm:$0xff]  ;;  %p3172_p5 = scmp.ne.s32.totalorder %s2256_s12, %s3171_s16  ;;  %p3176_p6 = scmp.lt.s32.totalorder %s2256_s12, %s2256_s12 }
 0xa24   :  { %2845 = vmatprep.subr.mxu0 %v3232_v2  ;;  %v2165_v29 = vld [vmem:[#allocation3 + $0x20] sm:$0xff]  ;;  %v2164_v55 = vld [vmem:[#allocation3 + $0x18] sm:$0xff]  ;;  %v2163_v56 = vld [vmem:[#allocation3 + $0x10] sm:$0xff]  ;;  %p3177_p7 = scmp.lt.s32.totalorder %s3175_s19, %s3171_s16 }
 0xa25   :  { %2846 = vmatpush3.msra.mxu0 %v2174_v46  ;;  %v2162_v59 = vld [vmem:[#allocation3 + $0x8] sm:$0xff]  ;;  %v2161_v60 = vld [vmem:[#allocation3] sm:$0xff] }
 0xa26   :  { %2847 = vmatprep.subr.mxu0 %v3232_v2  ;;  %v2177_v61 = vld [vmem:[#allocation4] sm:$0x1]  ;;  %p3178_p8 = por %p3177_p7, %p3176_p6 }
 0xa27   :  { %2848 = vmatpush3.msra.mxu0 %v2173_v27 }
 0xa28   :  { %2849 = vmatprep.subr.mxu0 %v3232_v2  ;;  %p3179_p9 = pnand %p3178_p8, %p3172_p5 }
 0xa29   :  { %2850 = vmatpush3.msra.mxu0 %v2172_v47 }
 0xa2a   :  { %2851 = vmatprep.subr.mxu0 %v3232_v2 }
 0xa2b   :  { %2852 = vmatpush3.msra.mxu0 %v2171_v50 }
 0xa2c   :  { %2853 = vmatprep.subr.mxu0 %v3232_v2 }
 0xa2d   :  { %2854 = vmatpush3.msra.mxu0 %v2170_v51 }
 0xa2e   :  { %2855 = vmatprep.subr.mxu0 %v3232_v2 }
 0xa2f   :  { %2856 = vmatpush3.msra.mxu0 %v2169_v52 }
 0xa30   :  { %2857 = vmatprep.subr.mxu0 %v3232_v2 }
 0xa31   :  { %2858 = vmatpush3.msra.mxu0 %v2168_v53 }
 0xa32   :  { %2859 = vmatprep.subr.mxu0 %v3232_v2 }
 0xa33   :  { %2860 = vmatpush3.msra.mxu0 %v2167_v54 }
 0xa34   :  { %2861 = vmatprep.subr.mxu0 %v3232_v2 }
 0xa35   :  { %2862 = vmatpush3.msra.mxu0 %v2166_v28 }
 0xa36   :  { %2863 = vmatprep.subr.mxu0 %v3232_v2 }
 0xa37   :  { %2864 = vmatpush3.msra.mxu0 %v2165_v29 }
 0xa38   :  { %2865 = vmatprep.subr.mxu0 %v3232_v2 }
 0xa39   :  { %2866 = vmatpush3.msra.mxu0 %v2164_v55 }
 0xa3a   :  { %2867 = vmatprep.subr.mxu0 %v3232_v2 }
 0xa3b   :  { %2868 = vmatpush3.msra.mxu0 %v2163_v56 }
 0xa3c   :  { %2869 = vmatprep.subr.mxu0 %v3232_v2 }
 0xa3d   :  { %2870 = vmatpush3.msra.mxu0 %v2162_v59 }
 0xa3e   :  { %2871 = vmatprep.subr.mxu0 %v3232_v2 }
 0xa3f   :  { %2872 = vmatpush3.msra.mxu0 %v2161_v60 }
 0xa40   :  { %2874 = vmatmul.mubr.f32.vlgmr.msra.gmra.mxu0 %v2154_v43 }
 0xb00   :  { %v2244_v62 = vpop.f32.mrf.mxu0 }
 0xb01   :  { %v2245_v63 = vadd.f32 %v2244_v62, %v2177_v61 }
 0xb02   :  { %v2875_v3 = vpop.f32.mrf.mxu0 }
 0xb03   :  { %2248 = vst [vmem:[#allocation13] sm:$0x1] %v2245_v63 }
 0xb04   :  { %3182 = shalt.err (!%p3179_p9)
}
 0xb05   :  { %2258 = dma.vmem_to_hbm [thread:$0]  %s2256_s12, 16, %s3751_s7, [#allocation10]  }
 0xb06   :  { %3215 = dma.done.wait [#allocation10], 16  }
 0xb07   :  { %3216 = vsyncadd [#allocation10], 4294967280 }
 0xb08   :  { %2262 = vsyncpa [#allocation9], 1 }
 0xb09   :  { %2263 = vsyncpa [#allocation10], 1 }
 0xb0a   :  { %2264 = vsyncpa [#allocation11], 1 }
 0xb0b   :  { %2265 = vsyncmov [#allocation5] }
 0xb0e   :  { %s2266_s26 = vpop.sfrf %2265 }
 0xb0f   :  { %p2398_p10 = scmp.ne.s32.totalorder %s2266_s26, 0 }
 0xb11   :  { %2270 = shalt.err (%p2398_p10)  }
 0xb12   :  { %2272 = vsyncmov [#allocation5 + $0x1] }
 0xb15   :  { %s2273_s27 = vpop.sfrf %2272 }
 0xb16   :  { %p2399_p11 = scmp.ne.s32.totalorder %s2273_s27, 0 }
 0xb18   :  { %2277 = shalt.err (%p2399_p11)  }
 0xb19   :  { %2279 = vsyncmov [#allocation5 + $0x2] }
 0xb1c   :  { %s2280_s17 = vpop.sfrf %2279 }
 0xb1d   :  { %p2400_p12 = scmp.ne.s32.totalorder %s2280_s17, 0 }
 0xb1f   :  { %2284 = shalt.err (%p2400_p12)  }
 0xb20   :  { %2286 = vsyncmov [#allocation5 + $0x3] }
 0xb23   :  { %s2287_s18 = vpop.sfrf %2286 }
 0xb24   :  { %p2401_p13 = scmp.ne.s32.totalorder %s2287_s18, 0 }
 0xb26   :  { %2291 = shalt.err (%p2401_p13)  }
 0xb27   :  { %2293 = vsyncmov [#allocation5 + $0x4] }
 0xb2a   :  { %s2294_s7 = vpop.sfrf %2293 }
 0xb2b   :  { %p2402_p0 = scmp.ne.s32.totalorder %s2294_s7, 0 }
 0xb2d   :  { %2298 = shalt.err (%p2402_p0)  }
 0xb2e   :  { %2300 = vsyncmov [#allocation5 + $0x5] }
 0xb31   :  { %s2301_s5 = vpop.sfrf %2300 }
 0xb32   :  { %p2403_p1 = scmp.ne.s32.totalorder %s2301_s5, 0 }
 0xb34   :  { %2305 = shalt.err (%p2403_p1)  }
 0xb35   :  { %2307 = vsyncmov [#allocation5 + $0x6] }
 0xb38   :  { %s2308_s1 = vpop.sfrf %2307 }
 0xb39   :  { %p2404_p2 = scmp.ne.s32.totalorder %s2308_s1, 0 }
 0xb3b   :  { %2312 = shalt.err (%p2404_p2)  }
 0xb3c   :  { %2314 = vsyncmov [#allocation5 + $0x7] }
 0xb3f   :  { %s2315_s24 = vpop.sfrf %2314 }
 0xb40   :  { %p2405_p3 = scmp.ne.s32.totalorder %s2315_s24, 0 }
 0xb42   :  { %2319 = shalt.err (%p2405_p3)  }
 0xb43   :  { %2320 = vsyncmov [#allocation6] }
 0xb46   :  { %s2321_s4 = vpop.sfrf %2320 }
 0xb47   :  { %p2406_p4 = scmp.ne.s32.totalorder %s2321_s4, 0 }
 0xb49   :  { %2325 = shalt.err (%p2406_p4)  }
 0xb4a   :  { %2327 = vsyncmov [#allocation6 + $0x1] }
 0xb4d   :  { %s2328_s28 = vpop.sfrf %2327 }
 0xb4e   :  { %p2407_p5 = scmp.ne.s32.totalorder %s2328_s28, 0 }
 0xb50   :  { %2332 = shalt.err (%p2407_p5)  }

</bundles_post_ra>
